<compile_context>
chip_gen: v7x
topology: tpu7x:2x2x1
jax: 0.10.0
libtpu: 0.0.40
codegen_flags: <defaults>
</compile_context>

<pallas_src>
import jax
import jax.numpy as jnp
from jax.experimental import pallas as pl
from jax.experimental.pallas import tpu as pltpu

_LANES = 128                  # lane-dense last dim -> unmasked vector stores
_TM_MAX = 4096                # rows/tile: (4096,128) f32 = 2 MiB; 8 MiB double-buffered in+out
_PALLAS_MIN_BYTES = 1 << 20   # below ~1 MiB the fixed pallas_call overhead dominates


def _round_up(v, m):
    return -(-v // m) * m


def _affine_kernel(wb_ref, x_ref, o_ref):
    # wb_ref: (2,) f32 in SMEM -> [w, b], read once per step on the scalar path.
    # x_ref, o_ref: (tm, 128) lane-dense tiles in VMEM.
    # Body is a single VPU fused multiply-add: no MXU, no transpose, no masked stores
    # (except the Pallas-masked partial last block when rows % tm != 0).
    w = wb_ref[0]
    b = wb_ref[1]
    o_ref[...] = (x_ref[...].astype(jnp.float32) * w + b).astype(o_ref.dtype)


def linear_forward(x, weight, bias):
    """Equivalent of torch.nn.Linear(1, 1): y = x * w + b for x of shape (..., 1)."""
    assert x.shape[-1] == 1 and weight.shape == (1, 1) and bias.shape == (1,)
    orig_shape = x.shape
    n = x.size

    # Small-batch fast path: fused XLA beats kernel-launch + DMA-priming overhead.
    if n * x.dtype.itemsize < _PALLAS_MIN_BYTES:
        w = weight.astype(jnp.float32).reshape(())
        b = bias.astype(jnp.float32).reshape(())
        return (x.astype(jnp.float32) * w + b).astype(x.dtype).reshape(orig_shape)

    rows = -(-n // _LANES)  # ceil(n / 128)
    # Tile rows: multiple of 8 sublanes, capped at _TM_MAX, and chosen so the grid
    # keeps >= 2 steps (megacore row-sharding on v7x stays effective).
    tm = min(_TM_MAX, _round_up(-(-rows // 2), 8))
    grid = -(-rows // tm)   # partial last block is masked by Pallas; no pad to tm*128

    x_flat = jnp.ravel(x)
    lane_pad = rows * _LANES - n
    if lane_pad:
        # Only ever pad to a multiple of 128 elements (at most 127 extra).
        x_flat = jnp.pad(x_flat, (0, lane_pad))
    x_slab = x_flat.reshape(rows, _LANES)   # layout-preserving reshape of the flat array

    wb = jnp.concatenate([weight.reshape(1), bias.reshape(1)]).astype(jnp.float32)

    out = pl.pallas_call(
        _affine_kernel,
        out_shape=jax.ShapeDtypeStruct((rows, _LANES), x.dtype),
        grid_spec=pltpu.PrefetchScalarGridSpec(
            num_scalar_prefetch=0,
            grid=(grid,),
            in_specs=[
                pl.BlockSpec(memory_space=pltpu.SMEM),         # [w, b] scalars, whole array
                pl.BlockSpec((tm, _LANES), lambda i: (i, 0)),  # x tile
            ],
            out_specs=pl.BlockSpec((tm, _LANES), lambda i: (i, 0)),
        ),
        compiler_params=pltpu.CompilerParams(
            dimension_semantics=("parallel",),
        ),
    )(wb, x_slab)

    if lane_pad:
        # Ragged tail: drop the (< 128) padded elements.
        return out.reshape(-1)[:n].reshape(orig_shape)
    return out.reshape(orig_shape)


if __name__ == "__main__":
    key = jax.random.PRNGKey(0)
    kx, kw, kb, kx2, kx3 = jax.random.split(key, 5)

    # Deterministic parameters (mimics nn.Linear's uniform(-1, 1) bound for fan_in=1).
    weight = jax.random.uniform(kw, (1, 1), dtype=jnp.float32, minval=-1.0, maxval=1.0)
    bias = jax.random.uniform(kb, (1,), dtype=jnp.float32, minval=-1.0, maxval=1.0)

    # Small input consistent with Linear(1, 1): batch=8, in_features=1 (XLA fast path).
    x_small = jax.random.normal(kx, (8, 1), dtype=jnp.float32)
    y_small = linear_forward(x_small, weight, bias)
    jax.block_until_ready(y_small)
    y_small_ref = x_small @ weight.T + bias
    assert y_small.shape == (8, 1)
    assert jnp.allclose(y_small, y_small_ref, atol=1e-5), "small-batch mismatch vs reference"

    # Large batch, multiple of 128: no pad, no output slice, 4 parallel grid steps.
    x_big = jax.random.normal(kx2, (2097152, 1), dtype=jnp.float32)
    y_big = linear_forward(x_big, weight, bias)
    jax.block_until_ready(y_big)
    y_big_ref = x_big @ weight.T + bias
    assert y_big.shape == (2097152, 1)
    assert jnp.allclose(y_big, y_big_ref, atol=1e-5), "large-batch mismatch vs reference"

    # Large ragged batch: exercises the 128-lane pad + partial last grid block path.
    x_ragged = jax.random.normal(kx3, (1000003, 1), dtype=jnp.float32)
    y_ragged = linear_forward(x_ragged, weight, bias)
    jax.block_until_ready(y_ragged)
    y_ragged_ref = x_ragged @ weight.T + bias
    assert y_ragged.shape == (1000003, 1)
    assert jnp.allclose(y_ragged, y_ragged_ref, atol=1e-5), "ragged-batch mismatch vs reference"

    print("KERNEL_OK")
</pallas_src>

<mosaic_0001>
module attributes {stable_mosaic.version = 11 : i64} {
  func.func @_affine_kernel(%arg0: i32, %arg1: memref<2xf32, #tpu.memory_space<smem>>, %arg2: memref<4096x128xf32, #tpu.memory_space<vmem>>, %arg3: memref<4096x128xf32, #tpu.memory_space<vmem>>) attributes {dimension_semantics = [#tpu.dimension_semantics<parallel>], iteration_bounds = array<i64: 4>, scalar_prefetch = 0 : i64, scratch_operands = 0 : i64, tpu.core_type = #tpu.core_type<tc>, window_params = [{transform_indices = @transform_0, window_bounds = array<i64: 2>}, {transform_indices = @transform_1, window_bounds = array<i64: 4096, 128>}, {transform_indices = @transform_2, window_bounds = array<i64: 4096, 128>}]} {
    %c0 = arith.constant 0 : index
    %0 = memref.load %arg1[%c0] : memref<2xf32, #tpu.memory_space<smem>>
    %c1 = arith.constant 1 : index
    %1 = memref.load %arg1[%c1] : memref<2xf32, #tpu.memory_space<smem>>
    %c0_0 = arith.constant 0 : index
    %c0_1 = arith.constant 0 : index
    %2 = vector.load %arg2[%c0_0, %c0_1] : memref<4096x128xf32, #tpu.memory_space<vmem>>, vector<4096x128xf32>
    %3 = vector.broadcast %0 : f32 to vector<4096x128xf32>
    %4 = arith.mulf %2, %3 : vector<4096x128xf32>
    %5 = vector.broadcast %1 : f32 to vector<4096x128xf32>
    %6 = arith.addf %4, %5 : vector<4096x128xf32>
    %c0_2 = arith.constant 0 : index
    %c0_3 = arith.constant 0 : index
    %7 = vector.load %arg3[%c0_2, %c0_3] : memref<4096x128xf32, #tpu.memory_space<vmem>>, vector<4096x128xf32>
    tpu.vector_store %arg3[%c0_2, %c0_3], %6 {strides = array<i32>} : memref<4096x128xf32, #tpu.memory_space<vmem>>, vector<4096x128xf32>,
    return
  }
  func.func @transform_0(%arg0: i32) -> i32 {
    %c0_i32 = arith.constant 0 : i32
    %c0_i32_0 = arith.constant 0 : i32
    return %c0_i32 : i32
  }
  func.func @transform_1(%arg0: i32) -> (i32, i32) {
    %c0_i32 = arith.constant 0 : i32
    %c0_i32_0 = arith.constant 0 : i32
    return %arg0, %c0_i32 : i32, i32
  }
  func.func @transform_2(%arg0: i32) -> (i32, i32) {
    %c0_i32 = arith.constant 0 : i32
    %c0_i32_0 = arith.constant 0 : i32
    return %arg0, %c0_i32 : i32, i32
  }
}

</mosaic_0001>

<bundles_post_ra>
// kernel: tpu_custom_call.1
= control target key start
LH: loop header
LB: loop body
LE: loop exit
PB: predicated region body
PF: predicated region fallthrough
CT: control target
= control target key end

     0   :  { %7 = vsyncpa [#allocation5], 0  ;;  %s4793_s0 = inlined_call_operand.hbm [shape: f32[2], index: 0, kind: input, shape index: {}]   ;;  %s4794_s1 = inlined_call_operand.hbm [shape: f32[16384,128], index: 1, kind: input, shape index: {}]   ;;  %s4795_s2 = inlined_call_operand.hbm [shape: f32[16384,128], index: 2, kind: output, shape index: {}]  }
   0x1   :  { %8 = vsyncpa [#allocation3], 0 }
   0x2   :  { %10 = vsyncpa [#allocation3 + $0x1], 0 }
   0x3   :  { %11 = vsyncpa [#allocation4], 0 }
   0x4   :  { %13 = vsyncpa [#allocation4 + $0x1], 0  ;;  %s2544_s9 = smov 0   ;;  %s2546_s10 = smov 0  }
   0x5   :  { %s2548_s11 = smov 0   ;;  %s2550_s12 = smov 0  }
   0x6 LB: > { %s2565_s13 = sadd.s32 4294967295, %s2520_s12   ;;  %s2327_s14 = sadd.s32 4294967294, %s2520_s12   ;;  %s2520_s12 = sphi %s2550_s12, %s4813_s12   ;;  %s2516_s11 = sphi %s2548_s11, %s4812_s11   ;;  %s2512_s10 = sphi %s2546_s10, %s4811_s10   ;;  %s2508_s9 = sphi %s2544_s9, %s4810_s9  }
   0x7   : > { %s2569_s15 = sadd.s32 1, %s2520_s12   ;;  %s47_s16 = sadd.s32 1, %s2516_s11 }
   0x8   : > { %s44_s17 = ssub.s32 %s2520_s12, %s2569_s15  ;;  %p54_p0 = scmp.ne.s32.totalorder %s2516_s11, %s2512_s10 }
   0x9   : > { %p45_p1 = scmp.eq.s32.totalorder %s44_s17, 0  ;;  %p55_p2 = scmp.eq.s32.totalorder %s2520_s12, 0 }
   0xa   : > { %p60_p3 = scmp.ne.s32.totalorder %s2512_s10, %s2508_s9  ;;  %p4797_p4 = scmp.eq.s32.totalorder %s2565_s13, 0 }
   0xb   : > { %s2581_s18 = scalar_select %p45_p1, %s2516_s11, %s47_s16  }
   0xc   : > { %p2583_p5 = por %p55_p2, %p54_p0  ;;  %p2589_p6 = por %p4797_p4, %p60_p3 }
   0xd   : > { %p84_p7 = scmp.eq.s32.totalorder %s2565_s13, 3  ;;  %p90_p8 = scmp.eq.s32.totalorder %s2327_s14, 3 }
   0xe   : > { %s4800_s20 = scalar_select %p2589_p6, 1, 0 }
   0xf   : > { %p2328_p9 = scmp.ge.s32.totalorder %s2520_s12, 1  ;;  %p97_p10 = scmp.lt.s32.totalorder %s2520_s12, 5 }
  0x10   : > { %p2596_p11 = por %p84_p7, %p54_p0  ;;  %p2600_p12 = por %p90_p8, %p60_p3 }
  0x11   : > { %p2604_p13 = pnand %p2328_p9, %p97_p10  ;;  %p2367_p2 = scmp.lt.s32.totalorder %s2520_s12, 4 }
  0x12   : > { %s4801_s21 = scalar_select %p2596_p11, 1, 0 }
  0x13   : > { %s4802_s22 = scalar_select %p2600_p12, 1, 0 }
  0x14   : > { %p2354_p1 = pneg %p2604_p13  ;;  %s119_s24 = sand.u32 1, %s2516_s11  }
  0x15   : > { %s2344_s25 = sshll.u32 %s2520_s12, 16  ;;  %p2617_p0 = pnand %p2367_p2, %p2583_p5 }
  0x16   : > { %p2355_p6 = pnand %p2354_p1, %p4797_p4  ;;  %s2331_s27 = sshll.u32 %s119_s24, 12 }
  0x17   : > { %s2407_s30 = scalar_lea.hbm %s4793_s0, 16 }
  0x18   : > { %p2408_p3 = scmp.ne.s32.totalorder %s4793_s0, %s2407_s30  ;;  %p2409_p7 = pneg %p2355_p6 }
  0x19   : > { %p2414_p10 = scmp.lt.u32.totalorder %s2407_s30, %s4793_s0 }
  0x1a   : > { %p2410_p8 = pnand %p2409_p7, %p2408_p3 }
  0x1c   : > { %p2411_p9 = pneg %p2410_p8 }
  0x1e   : > { %p2416_p5 = pnand %p2414_p10, %p2411_p9 }
  0x20   : > { %2419 = shalt.err (!%p2416_p5)
}
  0x21   : > { %s2522_s7 = smov [#allocation2]   ;;  %s2636_s19 = scalar_lea.hbm %s4794_s1, %s2344_s25 }
  0x22   : > { %2357 = dma.hbm_to_smem (!%p2355_p6), %s4793_s0, 16, %s2522_s7, [#allocation5]  }
  0x23   : > { %s123_s28 = scalar_lea.vmem [#allocation6], %s2331_s27  ;;  %s2640_s30 = scalar_lea.sflag [#allocation3], %s119_s24 }
  0x24   : > { %s130_s29 = sshll.u32 %s123_s28, 4  ;;  %s2420_s3 = scalar_lea.hbm %s2636_s19, 65536  ;;  %s2638_s29 = int_to_ptr.vmem [resolvable:$true] %s130_s29 }
  0x25   : > { %p2421_p1 = scmp.ne.s32.totalorder %s2636_s19, %s2420_s3  ;;  %p2422_p2 = pneg %p2617_p0 }
  0x26   : > { %s2425_s5 = scalar_lea.hbm %s4794_s1, 262144  ;;  %p2426_p7 = scmp.lt.u32.totalorder %s2636_s19, %s4794_s1 }
  0x27   : > { %p2423_p6 = pnand %p2422_p2, %p2421_p1  ;;  %p2427_p8 = scmp.lt.u32.totalorder %s2425_s5, %s2420_s3 }
  0x28   : > { %p2429_p10 = scmp.lt.u32.totalorder %s2420_s3, %s2636_s19 }
  0x29   : > { %p2424_p3 = pneg %p2423_p6  ;;  %p2428_p9 = por %p2427_p8, %p2426_p7 }
  0x2b   : > { %p2430_p5 = por %p2429_p10, %p2428_p9 }
  0x2d   : > { %p2431_p4 = pnand %p2430_p5, %p2424_p3 }
  0x2f   : > { %2434 = shalt.err (!%p2431_p4)
}
  0x30   : > { %s2435_s24 = scalar_lea.vmem %s2638_s29, 65536  ;;  %s2523_s27 = smov [#allocation6]  }
  0x31   : > { %p2436_p1 = scmp.ne.s32.totalorder %s2638_s29, %s2435_s24  ;;  %s2440_s8 = sshll.u32 %s2523_s27, 4  ;;  %s2441_s8 = int_to_ptr.vmem [resolvable:$false] %s2440_s8 }
  0x32   : > { %s2442_s14 = scalar_lea.vmem %s2441_s8, 131072  ;;  %p2443_p11 = scmp.lt.s32.totalorder %s2638_s29, %s2441_s8 }
  0x33   : > { %p2438_p6 = pnand %p2436_p1, %p2422_p2  ;;  %p2444_p7 = scmp.lt.s32.totalorder %s2442_s14, %s2435_s24 }
  0x35   : > { %p2439_p12 = pneg %p2438_p6  ;;  %p2445_p8 = por %p2444_p7, %p2443_p11 }
  0x37   : > { %p2446_p9 = pnand %p2445_p8, %p2439_p12 }
  0x39   : > { %2449 = shalt.err (!%p2446_p9)
}
  0x3a   : > { %s2524_s16 = smov 128   ;;  %s2525_s17 = smov 8  }
  0x3b   : > { %2361 = dma.hbm_to_vmem [thread:$0]  (!%p2617_p0), %s2636_s19, 65536, %s2638_s29, %s2640_s30, %s2524_s16, %s2524_s16, %s2525_s17  }
  0x3c   : > { %142 = sbr.rel (%p2604_p13) target bundleno = 417 (0x1a1), region = 28  ;;  %p4805_p4 = scmp.eq.s32.totalorder (!%p2604_p13), %s2565_s13, 0 }
  0x43   : > { %2495 = dma.done.wait (%p4805_p4), [#allocation5], 16   ;;  %p4806_p2 = pmov %p4805_p4 }
  0x44   : > { %s2675_s28 = sand.u32 1, %s2512_s10   ;;  %p4807_p11 = scmp.ne.s32.totalorder %s4800_s20, 0 }
  0x45   : > { %2497 = vsyncadd (%p4806_p2), [#allocation5], 4294967280  ;;  %s2336_s3 = sshll.u32 %s2675_s28, 12  ;;  %s149_s25 = scalar_lea.sflag [#allocation3], %s2675_s28 }
  0x46   : > { %s2681_s26 = scalar_lea.vmem [#allocation6], %s2336_s3 }
  0x47   : > { %2499 = dma.done.wait (%p4807_p11), %s149_s25, 65536  }
  0x48   : > { %2501 = vsyncadd (%p4807_p11), %s149_s25, 4294901760 }
  0x49   : > { %157 = sfence }
  0x4a   : > { %s176_s23 = sld [smem:[#allocation2]]  ;;  %s2338_s19 = sld [smem:[#allocation2 + $0x1]]  ;;  %v178_v0 = vld [vmem:[%s2681_s26] sm:$0xff]  ;;  %v179_v1 = vld [vmem:[%s2681_s26 + $0x8] sm:$0xff]  ;;  %v180_v2 = vld [vmem:[%s2681_s26 + $0x10] sm:$0xff] }
  0x4b   : > { %v181_v3 = vld [vmem:[%s2681_s26 + $0x18] sm:$0xff]  ;;  %v182_v4 = vld [vmem:[%s2681_s26 + $0x20] sm:$0xff]  ;;  %v183_v5 = vld [vmem:[%s2681_s26 + $0x28] sm:$0xff]  ;;  %s2724_s20 = scalar_lea.vmem [#allocation7], %s2336_s3  ;;  %s2345_s29 = sshll.u32 %s2565_s13, 16 }
  0x4c   : > { %v184_v6 = vld [vmem:[%s2681_s26 + $0x30] sm:$0xff]  ;;  %v185_v8 = vld [vmem:[%s2681_s26 + $0x38] sm:$0xff]  ;;  %v186_v13 = vld [vmem:[%s2681_s26 + $0x40] sm:$0xff]  ;;  %s2242_s30 = sshll.u32 %s2724_s20, 4  ;;  %s4739_s5 = scalar_lea.hbm %s4795_s2, %s2345_s29  ;;  %s4741_s30 = int_to_ptr.vmem [resolvable:$true] %s2242_s30 }
  0x4d   : > { %v187_v18 = vld [vmem:[%s2681_s26 + $0x48] sm:$0xff]  ;;  %v188_v19 = vld [vmem:[%s2681_s26 + $0x50] sm:$0xff]  ;;  %v189_v20 = vld [vmem:[%s2681_s26 + $0x58] sm:$0xff]  ;;  %s2229_s6 = scalar_lea.sflag [#allocation4], %s2675_s28  ;;  %s2450_s7 = scalar_lea.vmem %s4741_s30, 65536 }
  0x4e   : > { %v190_v25 = vld [vmem:[%s2681_s26 + $0x60] sm:$0xff]  ;;  %v191_v26 = vld [vmem:[%s2681_s26 + $0x68] sm:$0xff]  ;;  %v192_v27 = vld [vmem:[%s2681_s26 + $0x70] sm:$0xff]  ;;  %p2451_p12 = scmp.ne.s32.totalorder %s4741_s30, %s2450_s7  ;;  %p4808_p13 = scmp.ne.s32.totalorder %s4801_s21, 0 }
  0x4f   : > { %v193_v32 = vld [vmem:[%s2681_s26 + $0x78] sm:$0xff]  ;;  %v194_v37 = vld [vmem:[%s2681_s26 + $0x80] sm:$0xff]  ;;  %v195_v42 = vld [vmem:[%s2681_s26 + $0x88] sm:$0xff]  ;;  %s2526_s24 = smov [#allocation7]  }
  0x50   : > { %v2694_v7 = vstv %s176_s23  ;;  %v2698_v10 = vstv %s2338_s19  ;;  %v196_v43 = vld [vmem:[%s2681_s26 + $0x90] sm:$0xff]  ;;  %v197_v44 = vld [vmem:[%s2681_s26 + $0x98] sm:$0xff]  ;;  %p2452_p0 = pnand %p2451_p12, %p4808_p13  ;;  %s2454_s27 = sshll.u32 %s2526_s24, 4  ;;  %s2455_s27 = int_to_ptr.vmem [resolvable:$false] %s2454_s27 }
  0x51   : > { %v691_v9 = vmul.f32 %v2694_v7, %v178_v0  ;;  %v692_v11 = vmul.f32 %v2694_v7, %v179_v1  ;;  %v693_v12 = vmul.f32 %v2694_v7, %v180_v2  ;;  %v694_v14 = vmul.f32 %v2694_v7, %v181_v3  ;;  %v198_v49 = vld [vmem:[%s2681_s26 + $0xa0] sm:$0xff]  ;;  %v199_v50 = vld [vmem:[%s2681_s26 + $0xa8] sm:$0xff]  ;;  %v200_v51 = vld [vmem:[%s2681_s26 + $0xb0] sm:$0xff]  ;;  %s2456_s8 = scalar_lea.vmem %s2455_s27, 131072  ;;  %p2457_p10 = scmp.lt.s32.totalorder %s4741_s30, %s2455_s27 }
  0x52   : > { %v695_v15 = vmul.f32 %v2694_v7, %v182_v4  ;;  %v696_v16 = vmul.f32 %v2694_v7, %v183_v5  ;;  %v697_v17 = vmul.f32 %v2694_v7, %v184_v6  ;;  %v698_v24 = vmul.f32 %v2694_v7, %v185_v8  ;;  %v201_v56 = vld [vmem:[%s2681_s26 + $0xb8] sm:$0xff]  ;;  %v202_v61 = vld [vmem:[%s2681_s26 + $0xc0] sm:$0xff]  ;;  %v203_v2 = vld [vmem:[%s2681_s26 + $0xc8] sm:$0xff]  ;;  %p2453_p3 = pneg %p2452_p0  ;;  %p2458_p5 = scmp.lt.s32.totalorder %s2456_s8, %s2450_s7 }
  0x53   : > { %v1204_v21 = vadd.f32 %v2698_v10, %v691_v9  ;;  %v1205_v22 = vadd.f32 %v2698_v10, %v692_v11  ;;  %v1206_v23 = vadd.f32 %v2698_v10, %v693_v12  ;;  %v1207_v28 = vadd.f32 %v2698_v10, %v694_v14  ;;  %v204_v3 = vld [vmem:[%s2681_s26 + $0xd0] sm:$0xff]  ;;  %v205_v4 = vld [vmem:[%s2681_s26 + $0xd8] sm:$0xff]  ;;  %v206_v11 = vld [vmem:[%s2681_s26 + $0xe0] sm:$0xff] }
  0x54   : > { %v1208_v29 = vadd.f32 %v2698_v10, %v695_v15  ;;  %v1209_v30 = vadd.f32 %v2698_v10, %v696_v16  ;;  %v1210_v31 = vadd.f32 %v2698_v10, %v697_v17  ;;  %v1211_v33 = vadd.f32 %v2698_v10, %v698_v24  ;;  %v207_v12 = vld [vmem:[%s2681_s26 + $0xe8] sm:$0xff]  ;;  %p2459_p1 = por %p2458_p5, %p2457_p10 }
  0x55   : > { %1716 = vst [vmem:[%s2724_s20] sm:$0xff] %v1204_v21  ;;  %1717 = vst [vmem:[%s2724_s20 + $0x8] sm:$0xff] %v1205_v22  ;;  %v699_v34 = vmul.f32 %v2694_v7, %v186_v13  ;;  %v700_v35 = vmul.f32 %v2694_v7, %v187_v18  ;;  %v701_v36 = vmul.f32 %v2694_v7, %v188_v19  ;;  %v208_v13 = vld [vmem:[%s2681_s26 + $0xf0] sm:$0xff]  ;;  %v209_v18 = vld [vmem:[%s2681_s26 + $0xf8] sm:$0xff] }
  0x56   : > { %1718 = vst [vmem:[%s2724_s20 + $0x10] sm:$0xff] %v1206_v23  ;;  %1719 = vst [vmem:[%s2724_s20 + $0x18] sm:$0xff] %v1207_v28  ;;  %v702_v38 = vmul.f32 %v2694_v7, %v189_v20  ;;  %v703_v39 = vmul.f32 %v2694_v7, %v190_v25  ;;  %v704_v40 = vmul.f32 %v2694_v7, %v191_v26  ;;  %v210_v23 = vld [vmem:[%s2681_s26 + $0x100] sm:$0xff]  ;;  %v211_v28 = vld [vmem:[%s2681_s26 + $0x108] sm:$0xff]  ;;  %p2460_p6 = pnand %p2459_p1, %p2453_p3 }
  0x57   : > { %1720 = vst [vmem:[%s2724_s20 + $0x20] sm:$0xff] %v1208_v29  ;;  %1721 = vst [vmem:[%s2724_s20 + $0x28] sm:$0xff] %v1209_v30  ;;  %v705_v41 = vmul.f32 %v2694_v7, %v192_v27  ;;  %v1212_v45 = vadd.f32 %v2698_v10, %v699_v34  ;;  %v1213_v46 = vadd.f32 %v2698_v10, %v700_v35  ;;  %v212_v29 = vld [vmem:[%s2681_s26 + $0x110] sm:$0xff]  ;;  %v213_v30 = vld [vmem:[%s2681_s26 + $0x118] sm:$0xff] }
  0x58   : > { %1722 = vst [vmem:[%s2724_s20 + $0x30] sm:$0xff] %v1210_v31  ;;  %1723 = vst [vmem:[%s2724_s20 + $0x38] sm:$0xff] %v1211_v33  ;;  %v1214_v47 = vadd.f32 %v2698_v10, %v701_v36  ;;  %v706_v48 = vmul.f32 %v2694_v7, %v193_v32  ;;  %v1215_v52 = vadd.f32 %v2698_v10, %v702_v38  ;;  %v214_v35 = vld [vmem:[%s2681_s26 + $0x120] sm:$0xff]  ;;  %v215_v36 = vld [vmem:[%s2681_s26 + $0x128] sm:$0xff] }
  0x59   : > { %v1216_v53 = vadd.f32 %v2698_v10, %v703_v39  ;;  %v1217_v54 = vadd.f32 %v2698_v10, %v704_v40  ;;  %v1218_v55 = vadd.f32 %v2698_v10, %v705_v41  ;;  %1724 = vst [vmem:[%s2724_s20 + $0x40] sm:$0xff] %v1212_v45  ;;  %1725 = vst [vmem:[%s2724_s20 + $0x48] sm:$0xff] %v1213_v46 }
  0x5a   : > { %1726 = vst [vmem:[%s2724_s20 + $0x50] sm:$0xff] %v1214_v47  ;;  %v1219_v57 = vadd.f32 %v2698_v10, %v706_v48  ;;  %v707_v58 = vmul.f32 %v2694_v7, %v194_v37  ;;  %v708_v59 = vmul.f32 %v2694_v7, %v195_v42  ;;  %v709_v60 = vmul.f32 %v2694_v7, %v196_v43  ;;  %v216_v37 = vld [vmem:[%s2681_s26 + $0x130] sm:$0xff]  ;;  %v217_v42 = vld [vmem:[%s2681_s26 + $0x138] sm:$0xff]  ;;  %v218_v47 = vld [vmem:[%s2681_s26 + $0x140] sm:$0xff] }
  0x5b   : > { %1727 = vst [vmem:[%s2724_s20 + $0x58] sm:$0xff] %v1215_v52  ;;  %1728 = vst [vmem:[%s2724_s20 + $0x60] sm:$0xff] %v1216_v53  ;;  %v710_v62 = vmul.f32 %v2694_v7, %v197_v44  ;;  %v711_v63 = vmul.f32 %v2694_v7, %v198_v49  ;;  %v712_v0 = vmul.f32 %v2694_v7, %v199_v50  ;;  %v219_v52 = vld [vmem:[%s2681_s26 + $0x148] sm:$0xff]  ;;  %v220_v53 = vld [vmem:[%s2681_s26 + $0x150] sm:$0xff] }
  0x5c   : > { %1729 = vst [vmem:[%s2724_s20 + $0x68] sm:$0xff] %v1217_v54  ;;  %1730 = vst [vmem:[%s2724_s20 + $0x70] sm:$0xff] %v1218_v55  ;;  %v713_v1 = vmul.f32 %v2694_v7, %v200_v51  ;;  %v1220_v5 = vadd.f32 %v2698_v10, %v707_v58  ;;  %v1221_v6 = vadd.f32 %v2698_v10, %v708_v59  ;;  %v221_v54 = vld [vmem:[%s2681_s26 + $0x158] sm:$0xff]  ;;  %v222_v59 = vld [vmem:[%s2681_s26 + $0x160] sm:$0xff] }
  0x5d   : > { %1731 = vst [vmem:[%s2724_s20 + $0x78] sm:$0xff] %v1219_v57  ;;  %v1222_v8 = vadd.f32 %v2698_v10, %v709_v60  ;;  %v714_v9 = vmul.f32 %v2694_v7, %v201_v56  ;;  %v1223_v14 = vadd.f32 %v2698_v10, %v710_v62  ;;  %v1224_v15 = vadd.f32 %v2698_v10, %v711_v63  ;;  %v223_v60 = vld [vmem:[%s2681_s26 + $0x168] sm:$0xff] }
  0x5e   : > { %v1225_v16 = vadd.f32 %v2698_v10, %v712_v0  ;;  %v1226_v17 = vadd.f32 %v2698_v10, %v713_v1  ;;  %1732 = vst [vmem:[%s2724_s20 + $0x80] sm:$0xff] %v1220_v5  ;;  %1733 = vst [vmem:[%s2724_s20 + $0x88] sm:$0xff] %v1221_v6  ;;  %v715_v20 = vmul.f32 %v2694_v7, %v202_v61  ;;  %v224_v61 = vld [vmem:[%s2681_s26 + $0x170] sm:$0xff] }
  0x5f   : > { %1734 = vst [vmem:[%s2724_s20 + $0x90] sm:$0xff] %v1222_v8  ;;  %v1227_v19 = vadd.f32 %v2698_v10, %v714_v9  ;;  %v716_v21 = vmul.f32 %v2694_v7, %v203_v2  ;;  %v717_v22 = vmul.f32 %v2694_v7, %v204_v3  ;;  %1735 = vst [vmem:[%s2724_s20 + $0x98] sm:$0xff] %v1223_v14  ;;  %v225_v2 = vld [vmem:[%s2681_s26 + $0x178] sm:$0xff]  ;;  %v226_v8 = vld [vmem:[%s2681_s26 + $0x180] sm:$0xff] }
  0x60   : > { %1736 = vst [vmem:[%s2724_s20 + $0xa0] sm:$0xff] %v1224_v15  ;;  %1737 = vst [vmem:[%s2724_s20 + $0xa8] sm:$0xff] %v1225_v16  ;;  %v718_v24 = vmul.f32 %v2694_v7, %v205_v4  ;;  %v719_v25 = vmul.f32 %v2694_v7, %v206_v11  ;;  %v720_v26 = vmul.f32 %v2694_v7, %v207_v12  ;;  %v227_v14 = vld [vmem:[%s2681_s26 + $0x188] sm:$0xff]  ;;  %v228_v15 = vld [vmem:[%s2681_s26 + $0x190] sm:$0xff] }
  0x61   : > { %1738 = vst [vmem:[%s2724_s20 + $0xb0] sm:$0xff] %v1226_v17  ;;  %v721_v27 = vmul.f32 %v2694_v7, %v208_v13  ;;  %1739 = vst [vmem:[%s2724_s20 + $0xb8] sm:$0xff] %v1227_v19  ;;  %v1228_v31 = vadd.f32 %v2698_v10, %v715_v20  ;;  %v1229_v32 = vadd.f32 %v2698_v10, %v716_v21  ;;  %v229_v16 = vld [vmem:[%s2681_s26 + $0x198] sm:$0xff]  ;;  %v230_v21 = vld [vmem:[%s2681_s26 + $0x1a0] sm:$0xff] }
  0x62   : > { %v1230_v33 = vadd.f32 %v2698_v10, %v717_v22  ;;  %v722_v34 = vmul.f32 %v2694_v7, %v209_v18  ;;  %v1231_v38 = vadd.f32 %v2698_v10, %v718_v24  ;;  %v1232_v39 = vadd.f32 %v2698_v10, %v719_v25  ;;  %v231_v22 = vld [vmem:[%s2681_s26 + $0x1a8] sm:$0xff] }
  0x63   : > { %v1233_v40 = vadd.f32 %v2698_v10, %v720_v26  ;;  %v1234_v41 = vadd.f32 %v2698_v10, %v721_v27  ;;  %1740 = vst [vmem:[%s2724_s20 + $0xc0] sm:$0xff] %v1228_v31  ;;  %1741 = vst [vmem:[%s2724_s20 + $0xc8] sm:$0xff] %v1229_v32  ;;  %v723_v44 = vmul.f32 %v2694_v7, %v210_v23  ;;  %v232_v23 = vld [vmem:[%s2681_s26 + $0x1b0] sm:$0xff] }
  0x64   : > { %1742 = vst [vmem:[%s2724_s20 + $0xd0] sm:$0xff] %v1230_v33  ;;  %v1235_v43 = vadd.f32 %v2698_v10, %v722_v34  ;;  %v724_v45 = vmul.f32 %v2694_v7, %v211_v28  ;;  %v725_v46 = vmul.f32 %v2694_v7, %v212_v29  ;;  %1743 = vst [vmem:[%s2724_s20 + $0xd8] sm:$0xff] %v1231_v38  ;;  %v233_v28 = vld [vmem:[%s2681_s26 + $0x1b8] sm:$0xff]  ;;  %v234_v33 = vld [vmem:[%s2681_s26 + $0x1c0] sm:$0xff] }
  0x65   : > { %1744 = vst [vmem:[%s2724_s20 + $0xe0] sm:$0xff] %v1232_v39  ;;  %1745 = vst [vmem:[%s2724_s20 + $0xe8] sm:$0xff] %v1233_v40  ;;  %v726_v48 = vmul.f32 %v2694_v7, %v213_v30  ;;  %v727_v49 = vmul.f32 %v2694_v7, %v214_v35  ;;  %v728_v50 = vmul.f32 %v2694_v7, %v215_v36  ;;  %v235_v38 = vld [vmem:[%s2681_s26 + $0x1c8] sm:$0xff]  ;;  %v236_v39 = vld [vmem:[%s2681_s26 + $0x1d0] sm:$0xff] }
  0x66   : > { %1746 = vst [vmem:[%s2724_s20 + $0xf0] sm:$0xff] %v1234_v41  ;;  %v729_v51 = vmul.f32 %v2694_v7, %v216_v37  ;;  %1747 = vst [vmem:[%s2724_s20 + $0xf8] sm:$0xff] %v1235_v43  ;;  %v1236_v55 = vadd.f32 %v2698_v10, %v723_v44  ;;  %v1237_v56 = vadd.f32 %v2698_v10, %v724_v45  ;;  %v237_v40 = vld [vmem:[%s2681_s26 + $0x1d8] sm:$0xff]  ;;  %v238_v45 = vld [vmem:[%s2681_s26 + $0x1e0] sm:$0xff] }
  0x67   : > { %v1238_v57 = vadd.f32 %v2698_v10, %v725_v46  ;;  %v730_v58 = vmul.f32 %v2694_v7, %v217_v42  ;;  %v1239_v62 = vadd.f32 %v2698_v10, %v726_v48  ;;  %v1240_v63 = vadd.f32 %v2698_v10, %v727_v49  ;;  %v239_v46 = vld [vmem:[%s2681_s26 + $0x1e8] sm:$0xff] }
  0x68   : > { %v1241_v0 = vadd.f32 %v2698_v10, %v728_v50  ;;  %v1242_v1 = vadd.f32 %v2698_v10, %v729_v51  ;;  %1748 = vst [vmem:[%s2724_s20 + $0x100] sm:$0xff] %v1236_v55  ;;  %1749 = vst [vmem:[%s2724_s20 + $0x108] sm:$0xff] %v1237_v56  ;;  %v731_v4 = vmul.f32 %v2694_v7, %v218_v47  ;;  %v240_v47 = vld [vmem:[%s2681_s26 + $0x1f0] sm:$0xff] }
  0x69   : > { %1750 = vst [vmem:[%s2724_s20 + $0x110] sm:$0xff] %v1238_v57  ;;  %v1243_v3 = vadd.f32 %v2698_v10, %v730_v58  ;;  %v732_v5 = vmul.f32 %v2694_v7, %v219_v52  ;;  %v733_v6 = vmul.f32 %v2694_v7, %v220_v53  ;;  %1751 = vst [vmem:[%s2724_s20 + $0x118] sm:$0xff] %v1239_v62  ;;  %v241_v52 = vld [vmem:[%s2681_s26 + $0x1f8] sm:$0xff]  ;;  %v242_v57 = vld [vmem:[%s2681_s26 + $0x200] sm:$0xff] }
  0x6a   : > { %1752 = vst [vmem:[%s2724_s20 + $0x120] sm:$0xff] %v1240_v63  ;;  %1753 = vst [vmem:[%s2724_s20 + $0x128] sm:$0xff] %v1241_v0  ;;  %v734_v9 = vmul.f32 %v2694_v7, %v221_v54  ;;  %v735_v11 = vmul.f32 %v2694_v7, %v222_v59  ;;  %v736_v12 = vmul.f32 %v2694_v7, %v223_v60  ;;  %v243_v62 = vld [vmem:[%s2681_s26 + $0x208] sm:$0xff]  ;;  %v244_v63 = vld [vmem:[%s2681_s26 + $0x210] sm:$0xff] }
  0x6b   : > { %1754 = vst [vmem:[%s2724_s20 + $0x130] sm:$0xff] %v1242_v1  ;;  %v737_v13 = vmul.f32 %v2694_v7, %v224_v61  ;;  %1755 = vst [vmem:[%s2724_s20 + $0x138] sm:$0xff] %v1243_v3  ;;  %v1244_v17 = vadd.f32 %v2698_v10, %v731_v4  ;;  %v1245_v18 = vadd.f32 %v2698_v10, %v732_v5  ;;  %v245_v0 = vld [vmem:[%s2681_s26 + $0x218] sm:$0xff]  ;;  %v246_v5 = vld [vmem:[%s2681_s26 + $0x220] sm:$0xff] }
  0x6c   : > { %v1246_v19 = vadd.f32 %v2698_v10, %v733_v6  ;;  %v738_v20 = vmul.f32 %v2694_v7, %v225_v2  ;;  %v1247_v24 = vadd.f32 %v2698_v10, %v734_v9  ;;  %v1248_v25 = vadd.f32 %v2698_v10, %v735_v11  ;;  %v247_v6 = vld [vmem:[%s2681_s26 + $0x228] sm:$0xff] }
  0x6d   : > { %v1249_v26 = vadd.f32 %v2698_v10, %v736_v12  ;;  %v1250_v27 = vadd.f32 %v2698_v10, %v737_v13  ;;  %1756 = vst [vmem:[%s2724_s20 + $0x140] sm:$0xff] %v1244_v17  ;;  %1757 = vst [vmem:[%s2724_s20 + $0x148] sm:$0xff] %v1245_v18  ;;  %v739_v30 = vmul.f32 %v2694_v7, %v226_v8  ;;  %v248_v8 = vld [vmem:[%s2681_s26 + $0x230] sm:$0xff] }
  0x6e   : > { %1758 = vst [vmem:[%s2724_s20 + $0x150] sm:$0xff] %v1246_v19  ;;  %v1251_v29 = vadd.f32 %v2698_v10, %v738_v20  ;;  %v740_v31 = vmul.f32 %v2694_v7, %v227_v14  ;;  %v741_v32 = vmul.f32 %v2694_v7, %v228_v15  ;;  %1759 = vst [vmem:[%s2724_s20 + $0x158] sm:$0xff] %v1247_v24  ;;  %v249_v14 = vld [vmem:[%s2681_s26 + $0x238] sm:$0xff]  ;;  %v250_v19 = vld [vmem:[%s2681_s26 + $0x240] sm:$0xff] }
  0x6f   : > { %1760 = vst [vmem:[%s2724_s20 + $0x160] sm:$0xff] %v1248_v25  ;;  %1761 = vst [vmem:[%s2724_s20 + $0x168] sm:$0xff] %v1249_v26  ;;  %v742_v34 = vmul.f32 %v2694_v7, %v229_v16  ;;  %v743_v35 = vmul.f32 %v2694_v7, %v230_v21  ;;  %v744_v36 = vmul.f32 %v2694_v7, %v231_v22  ;;  %v251_v24 = vld [vmem:[%s2681_s26 + $0x248] sm:$0xff]  ;;  %v252_v25 = vld [vmem:[%s2681_s26 + $0x250] sm:$0xff] }
  0x70   : > { %1762 = vst [vmem:[%s2724_s20 + $0x170] sm:$0xff] %v1250_v27  ;;  %v745_v37 = vmul.f32 %v2694_v7, %v232_v23  ;;  %1763 = vst [vmem:[%s2724_s20 + $0x178] sm:$0xff] %v1251_v29  ;;  %v1252_v41 = vadd.f32 %v2698_v10, %v739_v30  ;;  %v1253_v42 = vadd.f32 %v2698_v10, %v740_v31  ;;  %v253_v26 = vld [vmem:[%s2681_s26 + $0x258] sm:$0xff]  ;;  %v254_v31 = vld [vmem:[%s2681_s26 + $0x260] sm:$0xff] }
  0x71   : > { %v1254_v43 = vadd.f32 %v2698_v10, %v741_v32  ;;  %v746_v44 = vmul.f32 %v2694_v7, %v233_v28  ;;  %v1255_v48 = vadd.f32 %v2698_v10, %v742_v34  ;;  %v1256_v49 = vadd.f32 %v2698_v10, %v743_v35  ;;  %v255_v32 = vld [vmem:[%s2681_s26 + $0x268] sm:$0xff] }
  0x72   : > { %v1257_v50 = vadd.f32 %v2698_v10, %v744_v36  ;;  %v1258_v51 = vadd.f32 %v2698_v10, %v745_v37  ;;  %1764 = vst [vmem:[%s2724_s20 + $0x180] sm:$0xff] %v1252_v41  ;;  %1765 = vst [vmem:[%s2724_s20 + $0x188] sm:$0xff] %v1253_v42  ;;  %v747_v54 = vmul.f32 %v2694_v7, %v234_v33  ;;  %v256_v33 = vld [vmem:[%s2681_s26 + $0x270] sm:$0xff] }
  0x73   : > { %1766 = vst [vmem:[%s2724_s20 + $0x190] sm:$0xff] %v1254_v43  ;;  %v1259_v53 = vadd.f32 %v2698_v10, %v746_v44  ;;  %v748_v55 = vmul.f32 %v2694_v7, %v235_v38  ;;  %v749_v56 = vmul.f32 %v2694_v7, %v236_v39  ;;  %1767 = vst [vmem:[%s2724_s20 + $0x198] sm:$0xff] %v1255_v48  ;;  %v257_v38 = vld [vmem:[%s2681_s26 + $0x278] sm:$0xff]  ;;  %v258_v43 = vld [vmem:[%s2681_s26 + $0x280] sm:$0xff] }
  0x74   : > { %1768 = vst [vmem:[%s2724_s20 + $0x1a0] sm:$0xff] %v1256_v49  ;;  %1769 = vst [vmem:[%s2724_s20 + $0x1a8] sm:$0xff] %v1257_v50  ;;  %v750_v58 = vmul.f32 %v2694_v7, %v237_v40  ;;  %v751_v59 = vmul.f32 %v2694_v7, %v238_v45  ;;  %v752_v60 = vmul.f32 %v2694_v7, %v239_v46  ;;  %v259_v48 = vld [vmem:[%s2681_s26 + $0x288] sm:$0xff]  ;;  %v260_v49 = vld [vmem:[%s2681_s26 + $0x290] sm:$0xff] }
  0x75   : > { %1770 = vst [vmem:[%s2724_s20 + $0x1b0] sm:$0xff] %v1258_v51  ;;  %v753_v61 = vmul.f32 %v2694_v7, %v240_v47  ;;  %1771 = vst [vmem:[%s2724_s20 + $0x1b8] sm:$0xff] %v1259_v53  ;;  %v1260_v1 = vadd.f32 %v2698_v10, %v747_v54  ;;  %v1261_v2 = vadd.f32 %v2698_v10, %v748_v55  ;;  %v261_v50 = vld [vmem:[%s2681_s26 + $0x298] sm:$0xff]  ;;  %v262_v55 = vld [vmem:[%s2681_s26 + $0x2a0] sm:$0xff] }
  0x76   : > { %v1262_v3 = vadd.f32 %v2698_v10, %v749_v56  ;;  %v754_v4 = vmul.f32 %v2694_v7, %v241_v52  ;;  %v1263_v9 = vadd.f32 %v2698_v10, %v750_v58  ;;  %v1264_v11 = vadd.f32 %v2698_v10, %v751_v59  ;;  %v263_v56 = vld [vmem:[%s2681_s26 + $0x2a8] sm:$0xff] }
  0x77   : > { %v1265_v12 = vadd.f32 %v2698_v10, %v752_v60  ;;  %v1266_v13 = vadd.f32 %v2698_v10, %v753_v61  ;;  %1772 = vst [vmem:[%s2724_s20 + $0x1c0] sm:$0xff] %v1260_v1  ;;  %1773 = vst [vmem:[%s2724_s20 + $0x1c8] sm:$0xff] %v1261_v2  ;;  %v755_v16 = vmul.f32 %v2694_v7, %v242_v57  ;;  %v264_v57 = vld [vmem:[%s2681_s26 + $0x2b0] sm:$0xff] }
  0x78   : > { %1774 = vst [vmem:[%s2724_s20 + $0x1d0] sm:$0xff] %v1262_v3  ;;  %v1267_v15 = vadd.f32 %v2698_v10, %v754_v4  ;;  %v756_v17 = vmul.f32 %v2694_v7, %v243_v62  ;;  %v757_v18 = vmul.f32 %v2694_v7, %v244_v63  ;;  %1775 = vst [vmem:[%s2724_s20 + $0x1d8] sm:$0xff] %v1263_v9  ;;  %v265_v62 = vld [vmem:[%s2681_s26 + $0x2b8] sm:$0xff]  ;;  %v266_v3 = vld [vmem:[%s2681_s26 + $0x2c0] sm:$0xff] }
  0x79   : > { %1776 = vst [vmem:[%s2724_s20 + $0x1e0] sm:$0xff] %v1264_v11  ;;  %1777 = vst [vmem:[%s2724_s20 + $0x1e8] sm:$0xff] %v1265_v12  ;;  %v758_v20 = vmul.f32 %v2694_v7, %v245_v0  ;;  %v759_v21 = vmul.f32 %v2694_v7, %v246_v5  ;;  %v760_v22 = vmul.f32 %v2694_v7, %v247_v6  ;;  %v267_v9 = vld [vmem:[%s2681_s26 + $0x2c8] sm:$0xff]  ;;  %v268_v11 = vld [vmem:[%s2681_s26 + $0x2d0] sm:$0xff] }
  0x7a   : > { %1778 = vst [vmem:[%s2724_s20 + $0x1f0] sm:$0xff] %v1266_v13  ;;  %v761_v23 = vmul.f32 %v2694_v7, %v248_v8  ;;  %1779 = vst [vmem:[%s2724_s20 + $0x1f8] sm:$0xff] %v1267_v15  ;;  %v1268_v27 = vadd.f32 %v2698_v10, %v755_v16  ;;  %v1269_v28 = vadd.f32 %v2698_v10, %v756_v17  ;;  %v269_v12 = vld [vmem:[%s2681_s26 + $0x2d8] sm:$0xff]  ;;  %v270_v17 = vld [vmem:[%s2681_s26 + $0x2e0] sm:$0xff] }
  0x7b   : > { %v1270_v29 = vadd.f32 %v2698_v10, %v757_v18  ;;  %v762_v30 = vmul.f32 %v2694_v7, %v249_v14  ;;  %v1271_v34 = vadd.f32 %v2698_v10, %v758_v20  ;;  %v1272_v35 = vadd.f32 %v2698_v10, %v759_v21  ;;  %v271_v18 = vld [vmem:[%s2681_s26 + $0x2e8] sm:$0xff] }
  0x7c   : > { %v1273_v36 = vadd.f32 %v2698_v10, %v760_v22  ;;  %v1274_v37 = vadd.f32 %v2698_v10, %v761_v23  ;;  %1780 = vst [vmem:[%s2724_s20 + $0x200] sm:$0xff] %v1268_v27  ;;  %1781 = vst [vmem:[%s2724_s20 + $0x208] sm:$0xff] %v1269_v28  ;;  %v763_v40 = vmul.f32 %v2694_v7, %v250_v19  ;;  %v272_v19 = vld [vmem:[%s2681_s26 + $0x2f0] sm:$0xff] }
  0x7d   : > { %1782 = vst [vmem:[%s2724_s20 + $0x210] sm:$0xff] %v1270_v29  ;;  %v1275_v39 = vadd.f32 %v2698_v10, %v762_v30  ;;  %v764_v41 = vmul.f32 %v2694_v7, %v251_v24  ;;  %v765_v42 = vmul.f32 %v2694_v7, %v252_v25  ;;  %1783 = vst [vmem:[%s2724_s20 + $0x218] sm:$0xff] %v1271_v34  ;;  %v273_v24 = vld [vmem:[%s2681_s26 + $0x2f8] sm:$0xff]  ;;  %v274_v29 = vld [vmem:[%s2681_s26 + $0x300] sm:$0xff] }
  0x7e   : > { %1784 = vst [vmem:[%s2724_s20 + $0x220] sm:$0xff] %v1272_v35  ;;  %1785 = vst [vmem:[%s2724_s20 + $0x228] sm:$0xff] %v1273_v36  ;;  %v766_v44 = vmul.f32 %v2694_v7, %v253_v26  ;;  %v767_v45 = vmul.f32 %v2694_v7, %v254_v31  ;;  %v768_v46 = vmul.f32 %v2694_v7, %v255_v32  ;;  %v275_v34 = vld [vmem:[%s2681_s26 + $0x308] sm:$0xff]  ;;  %v276_v35 = vld [vmem:[%s2681_s26 + $0x310] sm:$0xff] }
  0x7f   : > { %1786 = vst [vmem:[%s2724_s20 + $0x230] sm:$0xff] %v1274_v37  ;;  %v769_v47 = vmul.f32 %v2694_v7, %v256_v33  ;;  %1787 = vst [vmem:[%s2724_s20 + $0x238] sm:$0xff] %v1275_v39  ;;  %v1276_v51 = vadd.f32 %v2698_v10, %v763_v40  ;;  %v1277_v52 = vadd.f32 %v2698_v10, %v764_v41  ;;  %v277_v36 = vld [vmem:[%s2681_s26 + $0x318] sm:$0xff]  ;;  %v278_v41 = vld [vmem:[%s2681_s26 + $0x320] sm:$0xff] }
  0x80   : > { %v1278_v53 = vadd.f32 %v2698_v10, %v765_v42  ;;  %v770_v54 = vmul.f32 %v2694_v7, %v257_v38  ;;  %v1279_v58 = vadd.f32 %v2698_v10, %v766_v44  ;;  %v1280_v59 = vadd.f32 %v2698_v10, %v767_v45  ;;  %v279_v42 = vld [vmem:[%s2681_s26 + $0x328] sm:$0xff] }
  0x81   : > { %v1281_v60 = vadd.f32 %v2698_v10, %v768_v46  ;;  %v1282_v61 = vadd.f32 %v2698_v10, %v769_v47  ;;  %1788 = vst [vmem:[%s2724_s20 + $0x240] sm:$0xff] %v1276_v51  ;;  %1789 = vst [vmem:[%s2724_s20 + $0x248] sm:$0xff] %v1277_v52  ;;  %v771_v0 = vmul.f32 %v2694_v7, %v258_v43  ;;  %v280_v43 = vld [vmem:[%s2681_s26 + $0x330] sm:$0xff] }
  0x82   : > { %1790 = vst [vmem:[%s2724_s20 + $0x250] sm:$0xff] %v1278_v53  ;;  %v1283_v63 = vadd.f32 %v2698_v10, %v770_v54  ;;  %v772_v1 = vmul.f32 %v2694_v7, %v259_v48  ;;  %v773_v2 = vmul.f32 %v2694_v7, %v260_v49  ;;  %1791 = vst [vmem:[%s2724_s20 + $0x258] sm:$0xff] %v1279_v58  ;;  %v281_v48 = vld [vmem:[%s2681_s26 + $0x338] sm:$0xff]  ;;  %v282_v53 = vld [vmem:[%s2681_s26 + $0x340] sm:$0xff] }
  0x83   : > { %1792 = vst [vmem:[%s2724_s20 + $0x260] sm:$0xff] %v1280_v59  ;;  %1793 = vst [vmem:[%s2724_s20 + $0x268] sm:$0xff] %v1281_v60  ;;  %v774_v4 = vmul.f32 %v2694_v7, %v261_v50  ;;  %v775_v5 = vmul.f32 %v2694_v7, %v262_v55  ;;  %v776_v6 = vmul.f32 %v2694_v7, %v263_v56  ;;  %v283_v58 = vld [vmem:[%s2681_s26 + $0x348] sm:$0xff]  ;;  %v284_v59 = vld [vmem:[%s2681_s26 + $0x350] sm:$0xff] }
  0x84   : > { %1794 = vst [vmem:[%s2724_s20 + $0x270] sm:$0xff] %v1282_v61  ;;  %v777_v8 = vmul.f32 %v2694_v7, %v264_v57  ;;  %1795 = vst [vmem:[%s2724_s20 + $0x278] sm:$0xff] %v1283_v63  ;;  %v1284_v13 = vadd.f32 %v2698_v10, %v771_v0  ;;  %v1285_v14 = vadd.f32 %v2698_v10, %v772_v1  ;;  %v285_v60 = vld [vmem:[%s2681_s26 + $0x358] sm:$0xff]  ;;  %v286_v1 = vld [vmem:[%s2681_s26 + $0x360] sm:$0xff] }
  0x85   : > { %v1286_v15 = vadd.f32 %v2698_v10, %v773_v2  ;;  %v778_v16 = vmul.f32 %v2694_v7, %v265_v62  ;;  %v1287_v20 = vadd.f32 %v2698_v10, %v774_v4  ;;  %v1288_v21 = vadd.f32 %v2698_v10, %v775_v5  ;;  %v287_v2 = vld [vmem:[%s2681_s26 + $0x368] sm:$0xff] }
  0x86   : > { %v1289_v22 = vadd.f32 %v2698_v10, %v776_v6  ;;  %v1290_v23 = vadd.f32 %v2698_v10, %v777_v8  ;;  %1796 = vst [vmem:[%s2724_s20 + $0x280] sm:$0xff] %v1284_v13  ;;  %1797 = vst [vmem:[%s2724_s20 + $0x288] sm:$0xff] %v1285_v14  ;;  %v779_v26 = vmul.f32 %v2694_v7, %v266_v3  ;;  %v288_v3 = vld [vmem:[%s2681_s26 + $0x370] sm:$0xff] }
  0x87   : > { %1798 = vst [vmem:[%s2724_s20 + $0x290] sm:$0xff] %v1286_v15  ;;  %v1291_v25 = vadd.f32 %v2698_v10, %v778_v16  ;;  %v780_v27 = vmul.f32 %v2694_v7, %v267_v9  ;;  %v781_v28 = vmul.f32 %v2694_v7, %v268_v11  ;;  %1799 = vst [vmem:[%s2724_s20 + $0x298] sm:$0xff] %v1287_v20  ;;  %v289_v9 = vld [vmem:[%s2681_s26 + $0x378] sm:$0xff]  ;;  %v290_v15 = vld [vmem:[%s2681_s26 + $0x380] sm:$0xff] }
  0x88   : > { %1800 = vst [vmem:[%s2724_s20 + $0x2a0] sm:$0xff] %v1288_v21  ;;  %1801 = vst [vmem:[%s2724_s20 + $0x2a8] sm:$0xff] %v1289_v22  ;;  %v782_v30 = vmul.f32 %v2694_v7, %v269_v12  ;;  %v783_v31 = vmul.f32 %v2694_v7, %v270_v17  ;;  %v784_v32 = vmul.f32 %v2694_v7, %v271_v18  ;;  %v291_v20 = vld [vmem:[%s2681_s26 + $0x388] sm:$0xff]  ;;  %v292_v21 = vld [vmem:[%s2681_s26 + $0x390] sm:$0xff] }
  0x89   : > { %1802 = vst [vmem:[%s2724_s20 + $0x2b0] sm:$0xff] %v1290_v23  ;;  %v785_v33 = vmul.f32 %v2694_v7, %v272_v19  ;;  %1803 = vst [vmem:[%s2724_s20 + $0x2b8] sm:$0xff] %v1291_v25  ;;  %v1292_v37 = vadd.f32 %v2698_v10, %v779_v26  ;;  %v1293_v38 = vadd.f32 %v2698_v10, %v780_v27  ;;  %v293_v22 = vld [vmem:[%s2681_s26 + $0x398] sm:$0xff]  ;;  %v294_v27 = vld [vmem:[%s2681_s26 + $0x3a0] sm:$0xff] }
  0x8a   : > { %v1294_v39 = vadd.f32 %v2698_v10, %v781_v28  ;;  %v786_v40 = vmul.f32 %v2694_v7, %v273_v24  ;;  %v1295_v44 = vadd.f32 %v2698_v10, %v782_v30  ;;  %v1296_v45 = vadd.f32 %v2698_v10, %v783_v31  ;;  %v295_v28 = vld [vmem:[%s2681_s26 + $0x3a8] sm:$0xff] }
  0x8b   : > { %v1297_v46 = vadd.f32 %v2698_v10, %v784_v32  ;;  %v1298_v47 = vadd.f32 %v2698_v10, %v785_v33  ;;  %1804 = vst [vmem:[%s2724_s20 + $0x2c0] sm:$0xff] %v1292_v37  ;;  %1805 = vst [vmem:[%s2724_s20 + $0x2c8] sm:$0xff] %v1293_v38  ;;  %v787_v50 = vmul.f32 %v2694_v7, %v274_v29  ;;  %v296_v29 = vld [vmem:[%s2681_s26 + $0x3b0] sm:$0xff] }
  0x8c   : > { %1806 = vst [vmem:[%s2724_s20 + $0x2d0] sm:$0xff] %v1294_v39  ;;  %v1299_v49 = vadd.f32 %v2698_v10, %v786_v40  ;;  %v788_v51 = vmul.f32 %v2694_v7, %v275_v34  ;;  %v789_v52 = vmul.f32 %v2694_v7, %v276_v35  ;;  %1807 = vst [vmem:[%s2724_s20 + $0x2d8] sm:$0xff] %v1295_v44  ;;  %v297_v34 = vld [vmem:[%s2681_s26 + $0x3b8] sm:$0xff]  ;;  %v298_v39 = vld [vmem:[%s2681_s26 + $0x3c0] sm:$0xff] }
  0x8d   : > { %1808 = vst [vmem:[%s2724_s20 + $0x2e0] sm:$0xff] %v1296_v45  ;;  %1809 = vst [vmem:[%s2724_s20 + $0x2e8] sm:$0xff] %v1297_v46  ;;  %v790_v54 = vmul.f32 %v2694_v7, %v277_v36  ;;  %v791_v55 = vmul.f32 %v2694_v7, %v278_v41  ;;  %v792_v56 = vmul.f32 %v2694_v7, %v279_v42  ;;  %v299_v44 = vld [vmem:[%s2681_s26 + $0x3c8] sm:$0xff]  ;;  %v300_v45 = vld [vmem:[%s2681_s26 + $0x3d0] sm:$0xff] }
  0x8e   : > { %1810 = vst [vmem:[%s2724_s20 + $0x2f0] sm:$0xff] %v1298_v47  ;;  %v793_v57 = vmul.f32 %v2694_v7, %v280_v43  ;;  %1811 = vst [vmem:[%s2724_s20 + $0x2f8] sm:$0xff] %v1299_v49  ;;  %v1300_v61 = vadd.f32 %v2698_v10, %v787_v50  ;;  %v1301_v62 = vadd.f32 %v2698_v10, %v788_v51  ;;  %v301_v46 = vld [vmem:[%s2681_s26 + $0x3d8] sm:$0xff]  ;;  %v302_v51 = vld [vmem:[%s2681_s26 + $0x3e0] sm:$0xff] }
  0x8f   : > { %v1302_v63 = vadd.f32 %v2698_v10, %v789_v52  ;;  %v794_v0 = vmul.f32 %v2694_v7, %v281_v48  ;;  %v1303_v4 = vadd.f32 %v2698_v10, %v790_v54  ;;  %v1304_v5 = vadd.f32 %v2698_v10, %v791_v55  ;;  %v303_v52 = vld [vmem:[%s2681_s26 + $0x3e8] sm:$0xff] }
  0x90   : > { %v1305_v6 = vadd.f32 %v2698_v10, %v792_v56  ;;  %v1306_v8 = vadd.f32 %v2698_v10, %v793_v57  ;;  %1812 = vst [vmem:[%s2724_s20 + $0x300] sm:$0xff] %v1300_v61  ;;  %1813 = vst [vmem:[%s2724_s20 + $0x308] sm:$0xff] %v1301_v62  ;;  %v795_v12 = vmul.f32 %v2694_v7, %v282_v53  ;;  %v304_v53 = vld [vmem:[%s2681_s26 + $0x3f0] sm:$0xff] }
  0x91   : > { %1814 = vst [vmem:[%s2724_s20 + $0x310] sm:$0xff] %v1302_v63  ;;  %v1307_v11 = vadd.f32 %v2698_v10, %v794_v0  ;;  %v796_v13 = vmul.f32 %v2694_v7, %v283_v58  ;;  %v797_v14 = vmul.f32 %v2694_v7, %v284_v59  ;;  %1815 = vst [vmem:[%s2724_s20 + $0x318] sm:$0xff] %v1303_v4  ;;  %v305_v58 = vld [vmem:[%s2681_s26 + $0x3f8] sm:$0xff]  ;;  %v306_v63 = vld [vmem:[%s2681_s26 + $0x400] sm:$0xff] }
  0x92   : > { %1816 = vst [vmem:[%s2724_s20 + $0x320] sm:$0xff] %v1304_v5  ;;  %1817 = vst [vmem:[%s2724_s20 + $0x328] sm:$0xff] %v1305_v6  ;;  %v798_v16 = vmul.f32 %v2694_v7, %v285_v60  ;;  %v799_v17 = vmul.f32 %v2694_v7, %v286_v1  ;;  %v800_v18 = vmul.f32 %v2694_v7, %v287_v2  ;;  %v307_v4 = vld [vmem:[%s2681_s26 + $0x408] sm:$0xff]  ;;  %v308_v5 = vld [vmem:[%s2681_s26 + $0x410] sm:$0xff] }
  0x93   : > { %1818 = vst [vmem:[%s2724_s20 + $0x330] sm:$0xff] %v1306_v8  ;;  %v801_v19 = vmul.f32 %v2694_v7, %v288_v3  ;;  %1819 = vst [vmem:[%s2724_s20 + $0x338] sm:$0xff] %v1307_v11  ;;  %v1308_v23 = vadd.f32 %v2698_v10, %v795_v12  ;;  %v1309_v24 = vadd.f32 %v2698_v10, %v796_v13  ;;  %v309_v6 = vld [vmem:[%s2681_s26 + $0x418] sm:$0xff]  ;;  %v310_v13 = vld [vmem:[%s2681_s26 + $0x420] sm:$0xff] }
  0x94   : > { %v1310_v25 = vadd.f32 %v2698_v10, %v797_v14  ;;  %v802_v26 = vmul.f32 %v2694_v7, %v289_v9  ;;  %v1311_v30 = vadd.f32 %v2698_v10, %v798_v16  ;;  %v1312_v31 = vadd.f32 %v2698_v10, %v799_v17  ;;  %v311_v14 = vld [vmem:[%s2681_s26 + $0x428] sm:$0xff] }
  0x95   : > { %v1313_v32 = vadd.f32 %v2698_v10, %v800_v18  ;;  %v1314_v33 = vadd.f32 %v2698_v10, %v801_v19  ;;  %1820 = vst [vmem:[%s2724_s20 + $0x340] sm:$0xff] %v1308_v23  ;;  %1821 = vst [vmem:[%s2724_s20 + $0x348] sm:$0xff] %v1309_v24  ;;  %v803_v36 = vmul.f32 %v2694_v7, %v290_v15  ;;  %v312_v15 = vld [vmem:[%s2681_s26 + $0x430] sm:$0xff] }
  0x96   : > { %1822 = vst [vmem:[%s2724_s20 + $0x350] sm:$0xff] %v1310_v25  ;;  %v1315_v35 = vadd.f32 %v2698_v10, %v802_v26  ;;  %v804_v37 = vmul.f32 %v2694_v7, %v291_v20  ;;  %v805_v38 = vmul.f32 %v2694_v7, %v292_v21  ;;  %1823 = vst [vmem:[%s2724_s20 + $0x358] sm:$0xff] %v1311_v30  ;;  %v313_v20 = vld [vmem:[%s2681_s26 + $0x438] sm:$0xff]  ;;  %v314_v25 = vld [vmem:[%s2681_s26 + $0x440] sm:$0xff] }
  0x97   : > { %1824 = vst [vmem:[%s2724_s20 + $0x360] sm:$0xff] %v1312_v31  ;;  %1825 = vst [vmem:[%s2724_s20 + $0x368] sm:$0xff] %v1313_v32  ;;  %v806_v40 = vmul.f32 %v2694_v7, %v293_v22  ;;  %v807_v41 = vmul.f32 %v2694_v7, %v294_v27  ;;  %v808_v42 = vmul.f32 %v2694_v7, %v295_v28  ;;  %v315_v30 = vld [vmem:[%s2681_s26 + $0x448] sm:$0xff]  ;;  %v316_v31 = vld [vmem:[%s2681_s26 + $0x450] sm:$0xff] }
  0x98   : > { %1826 = vst [vmem:[%s2724_s20 + $0x370] sm:$0xff] %v1314_v33  ;;  %v809_v43 = vmul.f32 %v2694_v7, %v296_v29  ;;  %1827 = vst [vmem:[%s2724_s20 + $0x378] sm:$0xff] %v1315_v35  ;;  %v1316_v47 = vadd.f32 %v2698_v10, %v803_v36  ;;  %v1317_v48 = vadd.f32 %v2698_v10, %v804_v37  ;;  %v317_v32 = vld [vmem:[%s2681_s26 + $0x458] sm:$0xff]  ;;  %v318_v37 = vld [vmem:[%s2681_s26 + $0x460] sm:$0xff] }
  0x99   : > { %v1318_v49 = vadd.f32 %v2698_v10, %v805_v38  ;;  %v810_v50 = vmul.f32 %v2694_v7, %v297_v34  ;;  %v1319_v54 = vadd.f32 %v2698_v10, %v806_v40  ;;  %v1320_v55 = vadd.f32 %v2698_v10, %v807_v41  ;;  %v319_v38 = vld [vmem:[%s2681_s26 + $0x468] sm:$0xff] }
  0x9a   : > { %v1321_v56 = vadd.f32 %v2698_v10, %v808_v42  ;;  %v1322_v57 = vadd.f32 %v2698_v10, %v809_v43  ;;  %1828 = vst [vmem:[%s2724_s20 + $0x380] sm:$0xff] %v1316_v47  ;;  %1829 = vst [vmem:[%s2724_s20 + $0x388] sm:$0xff] %v1317_v48  ;;  %v811_v60 = vmul.f32 %v2694_v7, %v298_v39  ;;  %v320_v39 = vld [vmem:[%s2681_s26 + $0x470] sm:$0xff] }
  0x9b   : > { %1830 = vst [vmem:[%s2724_s20 + $0x390] sm:$0xff] %v1318_v49  ;;  %v1323_v59 = vadd.f32 %v2698_v10, %v810_v50  ;;  %v812_v61 = vmul.f32 %v2694_v7, %v299_v44  ;;  %v813_v62 = vmul.f32 %v2694_v7, %v300_v45  ;;  %1831 = vst [vmem:[%s2724_s20 + $0x398] sm:$0xff] %v1319_v54  ;;  %v321_v44 = vld [vmem:[%s2681_s26 + $0x478] sm:$0xff]  ;;  %v322_v49 = vld [vmem:[%s2681_s26 + $0x480] sm:$0xff] }
  0x9c   : > { %1832 = vst [vmem:[%s2724_s20 + $0x3a0] sm:$0xff] %v1320_v55  ;;  %1833 = vst [vmem:[%s2724_s20 + $0x3a8] sm:$0xff] %v1321_v56  ;;  %v814_v0 = vmul.f32 %v2694_v7, %v301_v46  ;;  %v815_v1 = vmul.f32 %v2694_v7, %v302_v51  ;;  %v816_v2 = vmul.f32 %v2694_v7, %v303_v52  ;;  %v323_v54 = vld [vmem:[%s2681_s26 + $0x488] sm:$0xff]  ;;  %v324_v55 = vld [vmem:[%s2681_s26 + $0x490] sm:$0xff] }
  0x9d   : > { %1834 = vst [vmem:[%s2724_s20 + $0x3b0] sm:$0xff] %v1322_v57  ;;  %v817_v3 = vmul.f32 %v2694_v7, %v304_v53  ;;  %1835 = vst [vmem:[%s2724_s20 + $0x3b8] sm:$0xff] %v1323_v59  ;;  %v1324_v8 = vadd.f32 %v2698_v10, %v811_v60  ;;  %v1325_v9 = vadd.f32 %v2698_v10, %v812_v61  ;;  %v325_v56 = vld [vmem:[%s2681_s26 + $0x498] sm:$0xff]  ;;  %v326_v61 = vld [vmem:[%s2681_s26 + $0x4a0] sm:$0xff] }
  0x9e   : > { %v1326_v11 = vadd.f32 %v2698_v10, %v813_v62  ;;  %v818_v12 = vmul.f32 %v2694_v7, %v305_v58  ;;  %v1327_v16 = vadd.f32 %v2698_v10, %v814_v0  ;;  %v1328_v17 = vadd.f32 %v2698_v10, %v815_v1  ;;  %v327_v62 = vld [vmem:[%s2681_s26 + $0x4a8] sm:$0xff] }
  0x9f   : > { %v1329_v18 = vadd.f32 %v2698_v10, %v816_v2  ;;  %v1330_v19 = vadd.f32 %v2698_v10, %v817_v3  ;;  %1836 = vst [vmem:[%s2724_s20 + $0x3c0] sm:$0xff] %v1324_v8  ;;  %1837 = vst [vmem:[%s2724_s20 + $0x3c8] sm:$0xff] %v1325_v9  ;;  %v819_v22 = vmul.f32 %v2694_v7, %v306_v63  ;;  %v328_v63 = vld [vmem:[%s2681_s26 + $0x4b0] sm:$0xff] }
  0xa0   : > { %1838 = vst [vmem:[%s2724_s20 + $0x3d0] sm:$0xff] %v1326_v11  ;;  %v1331_v21 = vadd.f32 %v2698_v10, %v818_v12  ;;  %v820_v23 = vmul.f32 %v2694_v7, %v307_v4  ;;  %v821_v24 = vmul.f32 %v2694_v7, %v308_v5  ;;  %1839 = vst [vmem:[%s2724_s20 + $0x3d8] sm:$0xff] %v1327_v16  ;;  %v329_v4 = vld [vmem:[%s2681_s26 + $0x4b8] sm:$0xff]  ;;  %v330_v11 = vld [vmem:[%s2681_s26 + $0x4c0] sm:$0xff] }
  0xa1   : > { %1840 = vst [vmem:[%s2724_s20 + $0x3e0] sm:$0xff] %v1328_v17  ;;  %1841 = vst [vmem:[%s2724_s20 + $0x3e8] sm:$0xff] %v1329_v18  ;;  %v822_v26 = vmul.f32 %v2694_v7, %v309_v6  ;;  %v823_v27 = vmul.f32 %v2694_v7, %v310_v13  ;;  %v824_v28 = vmul.f32 %v2694_v7, %v311_v14  ;;  %v331_v16 = vld [vmem:[%s2681_s26 + $0x4c8] sm:$0xff]  ;;  %v332_v17 = vld [vmem:[%s2681_s26 + $0x4d0] sm:$0xff] }
  0xa2   : > { %1842 = vst [vmem:[%s2724_s20 + $0x3f0] sm:$0xff] %v1330_v19  ;;  %v825_v29 = vmul.f32 %v2694_v7, %v312_v15  ;;  %1843 = vst [vmem:[%s2724_s20 + $0x3f8] sm:$0xff] %v1331_v21  ;;  %v1332_v33 = vadd.f32 %v2698_v10, %v819_v22  ;;  %v1333_v34 = vadd.f32 %v2698_v10, %v820_v23  ;;  %v333_v18 = vld [vmem:[%s2681_s26 + $0x4d8] sm:$0xff]  ;;  %v334_v23 = vld [vmem:[%s2681_s26 + $0x4e0] sm:$0xff] }
  0xa3   : > { %v1334_v35 = vadd.f32 %v2698_v10, %v821_v24  ;;  %v826_v36 = vmul.f32 %v2694_v7, %v313_v20  ;;  %v1335_v40 = vadd.f32 %v2698_v10, %v822_v26  ;;  %v1336_v41 = vadd.f32 %v2698_v10, %v823_v27  ;;  %v335_v24 = vld [vmem:[%s2681_s26 + $0x4e8] sm:$0xff] }
  0xa4   : > { %v1337_v42 = vadd.f32 %v2698_v10, %v824_v28  ;;  %v1338_v43 = vadd.f32 %v2698_v10, %v825_v29  ;;  %1844 = vst [vmem:[%s2724_s20 + $0x400] sm:$0xff] %v1332_v33  ;;  %1845 = vst [vmem:[%s2724_s20 + $0x408] sm:$0xff] %v1333_v34  ;;  %v827_v46 = vmul.f32 %v2694_v7, %v314_v25  ;;  %v336_v25 = vld [vmem:[%s2681_s26 + $0x4f0] sm:$0xff] }
  0xa5   : > { %1846 = vst [vmem:[%s2724_s20 + $0x410] sm:$0xff] %v1334_v35  ;;  %v1339_v45 = vadd.f32 %v2698_v10, %v826_v36  ;;  %v828_v47 = vmul.f32 %v2694_v7, %v315_v30  ;;  %v829_v48 = vmul.f32 %v2694_v7, %v316_v31  ;;  %1847 = vst [vmem:[%s2724_s20 + $0x418] sm:$0xff] %v1335_v40  ;;  %v337_v30 = vld [vmem:[%s2681_s26 + $0x4f8] sm:$0xff]  ;;  %v338_v35 = vld [vmem:[%s2681_s26 + $0x500] sm:$0xff] }
  0xa6   : > { %1848 = vst [vmem:[%s2724_s20 + $0x420] sm:$0xff] %v1336_v41  ;;  %1849 = vst [vmem:[%s2724_s20 + $0x428] sm:$0xff] %v1337_v42  ;;  %v830_v50 = vmul.f32 %v2694_v7, %v317_v32  ;;  %v831_v51 = vmul.f32 %v2694_v7, %v318_v37  ;;  %v832_v52 = vmul.f32 %v2694_v7, %v319_v38  ;;  %v339_v40 = vld [vmem:[%s2681_s26 + $0x508] sm:$0xff]  ;;  %v340_v41 = vld [vmem:[%s2681_s26 + $0x510] sm:$0xff] }
  0xa7   : > { %1850 = vst [vmem:[%s2724_s20 + $0x430] sm:$0xff] %v1338_v43  ;;  %v833_v53 = vmul.f32 %v2694_v7, %v320_v39  ;;  %1851 = vst [vmem:[%s2724_s20 + $0x438] sm:$0xff] %v1339_v45  ;;  %v1340_v57 = vadd.f32 %v2698_v10, %v827_v46  ;;  %v1341_v58 = vadd.f32 %v2698_v10, %v828_v47  ;;  %v341_v42 = vld [vmem:[%s2681_s26 + $0x518] sm:$0xff]  ;;  %v342_v47 = vld [vmem:[%s2681_s26 + $0x520] sm:$0xff] }
  0xa8   : > { %v1342_v59 = vadd.f32 %v2698_v10, %v829_v48  ;;  %v834_v60 = vmul.f32 %v2694_v7, %v321_v44  ;;  %v1343_v0 = vadd.f32 %v2698_v10, %v830_v50  ;;  %v1344_v1 = vadd.f32 %v2698_v10, %v831_v51  ;;  %v343_v48 = vld [vmem:[%s2681_s26 + $0x528] sm:$0xff] }
  0xa9   : > { %v1345_v2 = vadd.f32 %v2698_v10, %v832_v52  ;;  %v1346_v3 = vadd.f32 %v2698_v10, %v833_v53  ;;  %1852 = vst [vmem:[%s2724_s20 + $0x440] sm:$0xff] %v1340_v57  ;;  %1853 = vst [vmem:[%s2724_s20 + $0x448] sm:$0xff] %v1341_v58  ;;  %v835_v6 = vmul.f32 %v2694_v7, %v322_v49  ;;  %v344_v49 = vld [vmem:[%s2681_s26 + $0x530] sm:$0xff] }
  0xaa   : > { %1854 = vst [vmem:[%s2724_s20 + $0x450] sm:$0xff] %v1342_v59  ;;  %v1347_v5 = vadd.f32 %v2698_v10, %v834_v60  ;;  %v836_v8 = vmul.f32 %v2694_v7, %v323_v54  ;;  %v837_v9 = vmul.f32 %v2694_v7, %v324_v55  ;;  %1855 = vst [vmem:[%s2724_s20 + $0x458] sm:$0xff] %v1343_v0  ;;  %v345_v54 = vld [vmem:[%s2681_s26 + $0x538] sm:$0xff]  ;;  %v346_v59 = vld [vmem:[%s2681_s26 + $0x540] sm:$0xff] }
  0xab   : > { %1856 = vst [vmem:[%s2724_s20 + $0x460] sm:$0xff] %v1344_v1  ;;  %1857 = vst [vmem:[%s2724_s20 + $0x468] sm:$0xff] %v1345_v2  ;;  %v838_v12 = vmul.f32 %v2694_v7, %v325_v56  ;;  %v839_v13 = vmul.f32 %v2694_v7, %v326_v61  ;;  %v840_v14 = vmul.f32 %v2694_v7, %v327_v62  ;;  %v347_v0 = vld [vmem:[%s2681_s26 + $0x548] sm:$0xff]  ;;  %v348_v1 = vld [vmem:[%s2681_s26 + $0x550] sm:$0xff] }
  0xac   : > { %1858 = vst [vmem:[%s2724_s20 + $0x470] sm:$0xff] %v1346_v3  ;;  %v841_v15 = vmul.f32 %v2694_v7, %v328_v63  ;;  %1859 = vst [vmem:[%s2724_s20 + $0x478] sm:$0xff] %v1347_v5  ;;  %v1348_v19 = vadd.f32 %v2698_v10, %v835_v6  ;;  %v1349_v20 = vadd.f32 %v2698_v10, %v836_v8  ;;  %v349_v2 = vld [vmem:[%s2681_s26 + $0x558] sm:$0xff]  ;;  %v350_v8 = vld [vmem:[%s2681_s26 + $0x560] sm:$0xff] }
  0xad   : > { %v1350_v21 = vadd.f32 %v2698_v10, %v837_v9  ;;  %v842_v22 = vmul.f32 %v2694_v7, %v329_v4  ;;  %v1351_v26 = vadd.f32 %v2698_v10, %v838_v12  ;;  %v1352_v27 = vadd.f32 %v2698_v10, %v839_v13  ;;  %v351_v9 = vld [vmem:[%s2681_s26 + $0x568] sm:$0xff] }
  0xae   : > { %v1353_v28 = vadd.f32 %v2698_v10, %v840_v14  ;;  %v1354_v29 = vadd.f32 %v2698_v10, %v841_v15  ;;  %1860 = vst [vmem:[%s2724_s20 + $0x480] sm:$0xff] %v1348_v19  ;;  %1861 = vst [vmem:[%s2724_s20 + $0x488] sm:$0xff] %v1349_v20  ;;  %v843_v32 = vmul.f32 %v2694_v7, %v330_v11  ;;  %v352_v11 = vld [vmem:[%s2681_s26 + $0x570] sm:$0xff] }
  0xaf   : > { %1862 = vst [vmem:[%s2724_s20 + $0x490] sm:$0xff] %v1350_v21  ;;  %v1355_v31 = vadd.f32 %v2698_v10, %v842_v22  ;;  %v844_v33 = vmul.f32 %v2694_v7, %v331_v16  ;;  %v845_v34 = vmul.f32 %v2694_v7, %v332_v17  ;;  %1863 = vst [vmem:[%s2724_s20 + $0x498] sm:$0xff] %v1351_v26  ;;  %v353_v16 = vld [vmem:[%s2681_s26 + $0x578] sm:$0xff]  ;;  %v354_v21 = vld [vmem:[%s2681_s26 + $0x580] sm:$0xff] }
  0xb0   : > { %1864 = vst [vmem:[%s2724_s20 + $0x4a0] sm:$0xff] %v1352_v27  ;;  %1865 = vst [vmem:[%s2724_s20 + $0x4a8] sm:$0xff] %v1353_v28  ;;  %v846_v36 = vmul.f32 %v2694_v7, %v333_v18  ;;  %v847_v37 = vmul.f32 %v2694_v7, %v334_v23  ;;  %v848_v38 = vmul.f32 %v2694_v7, %v335_v24  ;;  %v355_v26 = vld [vmem:[%s2681_s26 + $0x588] sm:$0xff]  ;;  %v356_v27 = vld [vmem:[%s2681_s26 + $0x590] sm:$0xff] }
  0xb1   : > { %1866 = vst [vmem:[%s2724_s20 + $0x4b0] sm:$0xff] %v1354_v29  ;;  %v849_v39 = vmul.f32 %v2694_v7, %v336_v25  ;;  %1867 = vst [vmem:[%s2724_s20 + $0x4b8] sm:$0xff] %v1355_v31  ;;  %v1356_v43 = vadd.f32 %v2698_v10, %v843_v32  ;;  %v1357_v44 = vadd.f32 %v2698_v10, %v844_v33  ;;  %v357_v28 = vld [vmem:[%s2681_s26 + $0x598] sm:$0xff]  ;;  %v358_v33 = vld [vmem:[%s2681_s26 + $0x5a0] sm:$0xff] }
  0xb2   : > { %v1358_v45 = vadd.f32 %v2698_v10, %v845_v34  ;;  %v850_v46 = vmul.f32 %v2694_v7, %v337_v30  ;;  %v1359_v50 = vadd.f32 %v2698_v10, %v846_v36  ;;  %v1360_v51 = vadd.f32 %v2698_v10, %v847_v37  ;;  %v359_v34 = vld [vmem:[%s2681_s26 + $0x5a8] sm:$0xff] }
  0xb3   : > { %v1361_v52 = vadd.f32 %v2698_v10, %v848_v38  ;;  %v1362_v53 = vadd.f32 %v2698_v10, %v849_v39  ;;  %1868 = vst [vmem:[%s2724_s20 + $0x4c0] sm:$0xff] %v1356_v43  ;;  %1869 = vst [vmem:[%s2724_s20 + $0x4c8] sm:$0xff] %v1357_v44  ;;  %v851_v56 = vmul.f32 %v2694_v7, %v338_v35  ;;  %v360_v35 = vld [vmem:[%s2681_s26 + $0x5b0] sm:$0xff] }
  0xb4   : > { %1870 = vst [vmem:[%s2724_s20 + $0x4d0] sm:$0xff] %v1358_v45  ;;  %v1363_v55 = vadd.f32 %v2698_v10, %v850_v46  ;;  %v852_v57 = vmul.f32 %v2694_v7, %v339_v40  ;;  %v853_v58 = vmul.f32 %v2694_v7, %v340_v41  ;;  %1871 = vst [vmem:[%s2724_s20 + $0x4d8] sm:$0xff] %v1359_v50  ;;  %v361_v40 = vld [vmem:[%s2681_s26 + $0x5b8] sm:$0xff]  ;;  %v362_v45 = vld [vmem:[%s2681_s26 + $0x5c0] sm:$0xff] }
  0xb5   : > { %1872 = vst [vmem:[%s2724_s20 + $0x4e0] sm:$0xff] %v1360_v51  ;;  %1873 = vst [vmem:[%s2724_s20 + $0x4e8] sm:$0xff] %v1361_v52  ;;  %v854_v60 = vmul.f32 %v2694_v7, %v341_v42  ;;  %v855_v61 = vmul.f32 %v2694_v7, %v342_v47  ;;  %v856_v62 = vmul.f32 %v2694_v7, %v343_v48  ;;  %v363_v50 = vld [vmem:[%s2681_s26 + $0x5c8] sm:$0xff]  ;;  %v364_v51 = vld [vmem:[%s2681_s26 + $0x5d0] sm:$0xff] }
  0xb6   : > { %1874 = vst [vmem:[%s2724_s20 + $0x4f0] sm:$0xff] %v1362_v53  ;;  %v857_v63 = vmul.f32 %v2694_v7, %v344_v49  ;;  %1875 = vst [vmem:[%s2724_s20 + $0x4f8] sm:$0xff] %v1363_v55  ;;  %v1364_v3 = vadd.f32 %v2698_v10, %v851_v56  ;;  %v1365_v4 = vadd.f32 %v2698_v10, %v852_v57  ;;  %v365_v52 = vld [vmem:[%s2681_s26 + $0x5d8] sm:$0xff]  ;;  %v366_v57 = vld [vmem:[%s2681_s26 + $0x5e0] sm:$0xff] }
  0xb7   : > { %v1366_v5 = vadd.f32 %v2698_v10, %v853_v58  ;;  %v858_v6 = vmul.f32 %v2694_v7, %v345_v54  ;;  %v1367_v12 = vadd.f32 %v2698_v10, %v854_v60  ;;  %v1368_v13 = vadd.f32 %v2698_v10, %v855_v61  ;;  %v367_v58 = vld [vmem:[%s2681_s26 + $0x5e8] sm:$0xff] }
  0xb8   : > { %v1369_v14 = vadd.f32 %v2698_v10, %v856_v62  ;;  %v1370_v15 = vadd.f32 %v2698_v10, %v857_v63  ;;  %1876 = vst [vmem:[%s2724_s20 + $0x500] sm:$0xff] %v1364_v3  ;;  %1877 = vst [vmem:[%s2724_s20 + $0x508] sm:$0xff] %v1365_v4  ;;  %v859_v18 = vmul.f32 %v2694_v7, %v346_v59  ;;  %v368_v59 = vld [vmem:[%s2681_s26 + $0x5f0] sm:$0xff] }
  0xb9   : > { %1878 = vst [vmem:[%s2724_s20 + $0x510] sm:$0xff] %v1366_v5  ;;  %v1371_v17 = vadd.f32 %v2698_v10, %v858_v6  ;;  %v860_v19 = vmul.f32 %v2694_v7, %v347_v0  ;;  %v861_v20 = vmul.f32 %v2694_v7, %v348_v1  ;;  %1879 = vst [vmem:[%s2724_s20 + $0x518] sm:$0xff] %v1367_v12  ;;  %v369_v0 = vld [vmem:[%s2681_s26 + $0x5f8] sm:$0xff]  ;;  %v370_v5 = vld [vmem:[%s2681_s26 + $0x600] sm:$0xff] }
  0xba   : > { %1880 = vst [vmem:[%s2724_s20 + $0x520] sm:$0xff] %v1368_v13  ;;  %1881 = vst [vmem:[%s2724_s20 + $0x528] sm:$0xff] %v1369_v14  ;;  %v862_v22 = vmul.f32 %v2694_v7, %v349_v2  ;;  %v863_v23 = vmul.f32 %v2694_v7, %v350_v8  ;;  %v864_v24 = vmul.f32 %v2694_v7, %v351_v9  ;;  %v371_v12 = vld [vmem:[%s2681_s26 + $0x608] sm:$0xff]  ;;  %v372_v13 = vld [vmem:[%s2681_s26 + $0x610] sm:$0xff] }
  0xbb   : > { %1882 = vst [vmem:[%s2724_s20 + $0x530] sm:$0xff] %v1370_v15  ;;  %v865_v25 = vmul.f32 %v2694_v7, %v352_v11  ;;  %1883 = vst [vmem:[%s2724_s20 + $0x538] sm:$0xff] %v1371_v17  ;;  %v1372_v29 = vadd.f32 %v2698_v10, %v859_v18  ;;  %v1373_v30 = vadd.f32 %v2698_v10, %v860_v19  ;;  %v373_v14 = vld [vmem:[%s2681_s26 + $0x618] sm:$0xff]  ;;  %v374_v19 = vld [vmem:[%s2681_s26 + $0x620] sm:$0xff] }
  0xbc   : > { %v1374_v31 = vadd.f32 %v2698_v10, %v861_v20  ;;  %v866_v32 = vmul.f32 %v2694_v7, %v353_v16  ;;  %v1375_v36 = vadd.f32 %v2698_v10, %v862_v22  ;;  %v1376_v37 = vadd.f32 %v2698_v10, %v863_v23  ;;  %v375_v20 = vld [vmem:[%s2681_s26 + $0x628] sm:$0xff] }
  0xbd   : > { %v1377_v38 = vadd.f32 %v2698_v10, %v864_v24  ;;  %v1378_v39 = vadd.f32 %v2698_v10, %v865_v25  ;;  %1884 = vst [vmem:[%s2724_s20 + $0x540] sm:$0xff] %v1372_v29  ;;  %1885 = vst [vmem:[%s2724_s20 + $0x548] sm:$0xff] %v1373_v30  ;;  %v867_v42 = vmul.f32 %v2694_v7, %v354_v21  ;;  %v376_v21 = vld [vmem:[%s2681_s26 + $0x630] sm:$0xff] }
  0xbe   : > { %1886 = vst [vmem:[%s2724_s20 + $0x550] sm:$0xff] %v1374_v31  ;;  %v1379_v41 = vadd.f32 %v2698_v10, %v866_v32  ;;  %v868_v43 = vmul.f32 %v2694_v7, %v355_v26  ;;  %v869_v44 = vmul.f32 %v2694_v7, %v356_v27  ;;  %1887 = vst [vmem:[%s2724_s20 + $0x558] sm:$0xff] %v1375_v36  ;;  %v377_v26 = vld [vmem:[%s2681_s26 + $0x638] sm:$0xff]  ;;  %v378_v31 = vld [vmem:[%s2681_s26 + $0x640] sm:$0xff] }
  0xbf   : > { %1888 = vst [vmem:[%s2724_s20 + $0x560] sm:$0xff] %v1376_v37  ;;  %1889 = vst [vmem:[%s2724_s20 + $0x568] sm:$0xff] %v1377_v38  ;;  %v870_v46 = vmul.f32 %v2694_v7, %v357_v28  ;;  %v871_v47 = vmul.f32 %v2694_v7, %v358_v33  ;;  %v872_v48 = vmul.f32 %v2694_v7, %v359_v34  ;;  %v379_v36 = vld [vmem:[%s2681_s26 + $0x648] sm:$0xff]  ;;  %v380_v37 = vld [vmem:[%s2681_s26 + $0x650] sm:$0xff] }
  0xc0   : > { %1890 = vst [vmem:[%s2724_s20 + $0x570] sm:$0xff] %v1378_v39  ;;  %v873_v49 = vmul.f32 %v2694_v7, %v360_v35  ;;  %1891 = vst [vmem:[%s2724_s20 + $0x578] sm:$0xff] %v1379_v41  ;;  %v1380_v53 = vadd.f32 %v2698_v10, %v867_v42  ;;  %v1381_v54 = vadd.f32 %v2698_v10, %v868_v43  ;;  %v381_v38 = vld [vmem:[%s2681_s26 + $0x658] sm:$0xff]  ;;  %v382_v43 = vld [vmem:[%s2681_s26 + $0x660] sm:$0xff] }
  0xc1   : > { %v1382_v55 = vadd.f32 %v2698_v10, %v869_v44  ;;  %v874_v56 = vmul.f32 %v2694_v7, %v361_v40  ;;  %v1383_v60 = vadd.f32 %v2698_v10, %v870_v46  ;;  %v1384_v61 = vadd.f32 %v2698_v10, %v871_v47  ;;  %v383_v44 = vld [vmem:[%s2681_s26 + $0x668] sm:$0xff] }
  0xc2   : > { %v1385_v62 = vadd.f32 %v2698_v10, %v872_v48  ;;  %v1386_v63 = vadd.f32 %v2698_v10, %v873_v49  ;;  %1892 = vst [vmem:[%s2724_s20 + $0x580] sm:$0xff] %v1380_v53  ;;  %1893 = vst [vmem:[%s2724_s20 + $0x588] sm:$0xff] %v1381_v54  ;;  %v875_v2 = vmul.f32 %v2694_v7, %v362_v45  ;;  %v384_v45 = vld [vmem:[%s2681_s26 + $0x670] sm:$0xff] }
  0xc3   : > { %1894 = vst [vmem:[%s2724_s20 + $0x590] sm:$0xff] %v1382_v55  ;;  %v1387_v1 = vadd.f32 %v2698_v10, %v874_v56  ;;  %v876_v3 = vmul.f32 %v2694_v7, %v363_v50  ;;  %v877_v4 = vmul.f32 %v2694_v7, %v364_v51  ;;  %1895 = vst [vmem:[%s2724_s20 + $0x598] sm:$0xff] %v1383_v60  ;;  %v385_v50 = vld [vmem:[%s2681_s26 + $0x678] sm:$0xff]  ;;  %v386_v55 = vld [vmem:[%s2681_s26 + $0x680] sm:$0xff] }
  0xc4   : > { %1896 = vst [vmem:[%s2724_s20 + $0x5a0] sm:$0xff] %v1384_v61  ;;  %1897 = vst [vmem:[%s2724_s20 + $0x5a8] sm:$0xff] %v1385_v62  ;;  %v878_v6 = vmul.f32 %v2694_v7, %v365_v52  ;;  %v879_v8 = vmul.f32 %v2694_v7, %v366_v57  ;;  %v880_v9 = vmul.f32 %v2694_v7, %v367_v58  ;;  %v387_v60 = vld [vmem:[%s2681_s26 + $0x688] sm:$0xff]  ;;  %v388_v61 = vld [vmem:[%s2681_s26 + $0x690] sm:$0xff] }
  0xc5   : > { %1898 = vst [vmem:[%s2724_s20 + $0x5b0] sm:$0xff] %v1386_v63  ;;  %v881_v11 = vmul.f32 %v2694_v7, %v368_v59  ;;  %1899 = vst [vmem:[%s2724_s20 + $0x5b8] sm:$0xff] %v1387_v1  ;;  %v1388_v15 = vadd.f32 %v2698_v10, %v875_v2  ;;  %v1389_v16 = vadd.f32 %v2698_v10, %v876_v3  ;;  %v389_v62 = vld [vmem:[%s2681_s26 + $0x698] sm:$0xff]  ;;  %v390_v3 = vld [vmem:[%s2681_s26 + $0x6a0] sm:$0xff] }
  0xc6   : > { %v1390_v17 = vadd.f32 %v2698_v10, %v877_v4  ;;  %v882_v18 = vmul.f32 %v2694_v7, %v369_v0  ;;  %v1391_v22 = vadd.f32 %v2698_v10, %v878_v6  ;;  %v1392_v23 = vadd.f32 %v2698_v10, %v879_v8  ;;  %v391_v4 = vld [vmem:[%s2681_s26 + $0x6a8] sm:$0xff] }
  0xc7   : > { %v1393_v24 = vadd.f32 %v2698_v10, %v880_v9  ;;  %v1394_v25 = vadd.f32 %v2698_v10, %v881_v11  ;;  %1900 = vst [vmem:[%s2724_s20 + $0x5c0] sm:$0xff] %v1388_v15  ;;  %1901 = vst [vmem:[%s2724_s20 + $0x5c8] sm:$0xff] %v1389_v16  ;;  %v883_v28 = vmul.f32 %v2694_v7, %v370_v5  ;;  %v392_v5 = vld [vmem:[%s2681_s26 + $0x6b0] sm:$0xff] }
  0xc8   : > { %1902 = vst [vmem:[%s2724_s20 + $0x5d0] sm:$0xff] %v1390_v17  ;;  %v1395_v27 = vadd.f32 %v2698_v10, %v882_v18  ;;  %v884_v29 = vmul.f32 %v2694_v7, %v371_v12  ;;  %v885_v30 = vmul.f32 %v2694_v7, %v372_v13  ;;  %1903 = vst [vmem:[%s2724_s20 + $0x5d8] sm:$0xff] %v1391_v22  ;;  %v393_v12 = vld [vmem:[%s2681_s26 + $0x6b8] sm:$0xff]  ;;  %v394_v17 = vld [vmem:[%s2681_s26 + $0x6c0] sm:$0xff] }
  0xc9   : > { %1904 = vst [vmem:[%s2724_s20 + $0x5e0] sm:$0xff] %v1392_v23  ;;  %1905 = vst [vmem:[%s2724_s20 + $0x5e8] sm:$0xff] %v1393_v24  ;;  %v886_v32 = vmul.f32 %v2694_v7, %v373_v14  ;;  %v887_v33 = vmul.f32 %v2694_v7, %v374_v19  ;;  %v888_v34 = vmul.f32 %v2694_v7, %v375_v20  ;;  %v395_v22 = vld [vmem:[%s2681_s26 + $0x6c8] sm:$0xff]  ;;  %v396_v23 = vld [vmem:[%s2681_s26 + $0x6d0] sm:$0xff] }
  0xca   : > { %1906 = vst [vmem:[%s2724_s20 + $0x5f0] sm:$0xff] %v1394_v25  ;;  %v889_v35 = vmul.f32 %v2694_v7, %v376_v21  ;;  %1907 = vst [vmem:[%s2724_s20 + $0x5f8] sm:$0xff] %v1395_v27  ;;  %v1396_v39 = vadd.f32 %v2698_v10, %v883_v28  ;;  %v1397_v40 = vadd.f32 %v2698_v10, %v884_v29  ;;  %v397_v24 = vld [vmem:[%s2681_s26 + $0x6d8] sm:$0xff]  ;;  %v398_v29 = vld [vmem:[%s2681_s26 + $0x6e0] sm:$0xff] }
  0xcb   : > { %v1398_v41 = vadd.f32 %v2698_v10, %v885_v30  ;;  %v890_v42 = vmul.f32 %v2694_v7, %v377_v26  ;;  %v1399_v46 = vadd.f32 %v2698_v10, %v886_v32  ;;  %v1400_v47 = vadd.f32 %v2698_v10, %v887_v33  ;;  %v399_v30 = vld [vmem:[%s2681_s26 + $0x6e8] sm:$0xff] }
  0xcc   : > { %v1401_v48 = vadd.f32 %v2698_v10, %v888_v34  ;;  %v1402_v49 = vadd.f32 %v2698_v10, %v889_v35  ;;  %1908 = vst [vmem:[%s2724_s20 + $0x600] sm:$0xff] %v1396_v39  ;;  %1909 = vst [vmem:[%s2724_s20 + $0x608] sm:$0xff] %v1397_v40  ;;  %v891_v52 = vmul.f32 %v2694_v7, %v378_v31  ;;  %v400_v31 = vld [vmem:[%s2681_s26 + $0x6f0] sm:$0xff] }
  0xcd   : > { %1910 = vst [vmem:[%s2724_s20 + $0x610] sm:$0xff] %v1398_v41  ;;  %v1403_v51 = vadd.f32 %v2698_v10, %v890_v42  ;;  %v892_v53 = vmul.f32 %v2694_v7, %v379_v36  ;;  %v893_v54 = vmul.f32 %v2694_v7, %v380_v37  ;;  %1911 = vst [vmem:[%s2724_s20 + $0x618] sm:$0xff] %v1399_v46  ;;  %v401_v36 = vld [vmem:[%s2681_s26 + $0x6f8] sm:$0xff]  ;;  %v402_v41 = vld [vmem:[%s2681_s26 + $0x700] sm:$0xff] }
  0xce   : > { %1912 = vst [vmem:[%s2724_s20 + $0x620] sm:$0xff] %v1400_v47  ;;  %1913 = vst [vmem:[%s2724_s20 + $0x628] sm:$0xff] %v1401_v48  ;;  %v894_v56 = vmul.f32 %v2694_v7, %v381_v38  ;;  %v895_v57 = vmul.f32 %v2694_v7, %v382_v43  ;;  %v896_v58 = vmul.f32 %v2694_v7, %v383_v44  ;;  %v403_v46 = vld [vmem:[%s2681_s26 + $0x708] sm:$0xff]  ;;  %v404_v47 = vld [vmem:[%s2681_s26 + $0x710] sm:$0xff] }
  0xcf   : > { %1914 = vst [vmem:[%s2724_s20 + $0x630] sm:$0xff] %v1402_v49  ;;  %v897_v59 = vmul.f32 %v2694_v7, %v384_v45  ;;  %1915 = vst [vmem:[%s2724_s20 + $0x638] sm:$0xff] %v1403_v51  ;;  %v1404_v63 = vadd.f32 %v2698_v10, %v891_v52  ;;  %v1405_v0 = vadd.f32 %v2698_v10, %v892_v53  ;;  %v405_v48 = vld [vmem:[%s2681_s26 + $0x718] sm:$0xff]  ;;  %v406_v53 = vld [vmem:[%s2681_s26 + $0x720] sm:$0xff] }
  0xd0   : > { %v1406_v1 = vadd.f32 %v2698_v10, %v893_v54  ;;  %v898_v2 = vmul.f32 %v2694_v7, %v385_v50  ;;  %v1407_v6 = vadd.f32 %v2698_v10, %v894_v56  ;;  %v1408_v8 = vadd.f32 %v2698_v10, %v895_v57  ;;  %v407_v54 = vld [vmem:[%s2681_s26 + $0x728] sm:$0xff] }
  0xd1   : > { %v1409_v9 = vadd.f32 %v2698_v10, %v896_v58  ;;  %v1410_v11 = vadd.f32 %v2698_v10, %v897_v59  ;;  %1916 = vst [vmem:[%s2724_s20 + $0x640] sm:$0xff] %v1404_v63  ;;  %1917 = vst [vmem:[%s2724_s20 + $0x648] sm:$0xff] %v1405_v0  ;;  %v899_v14 = vmul.f32 %v2694_v7, %v386_v55  ;;  %v408_v55 = vld [vmem:[%s2681_s26 + $0x730] sm:$0xff] }
  0xd2   : > { %1918 = vst [vmem:[%s2724_s20 + $0x650] sm:$0xff] %v1406_v1  ;;  %v1411_v13 = vadd.f32 %v2698_v10, %v898_v2  ;;  %v900_v15 = vmul.f32 %v2694_v7, %v387_v60  ;;  %v901_v16 = vmul.f32 %v2694_v7, %v388_v61  ;;  %1919 = vst [vmem:[%s2724_s20 + $0x658] sm:$0xff] %v1407_v6  ;;  %v409_v60 = vld [vmem:[%s2681_s26 + $0x738] sm:$0xff]  ;;  %v410_v1 = vld [vmem:[%s2681_s26 + $0x740] sm:$0xff] }
  0xd3   : > { %1920 = vst [vmem:[%s2724_s20 + $0x660] sm:$0xff] %v1408_v8  ;;  %1921 = vst [vmem:[%s2724_s20 + $0x668] sm:$0xff] %v1409_v9  ;;  %v902_v18 = vmul.f32 %v2694_v7, %v389_v62  ;;  %v903_v19 = vmul.f32 %v2694_v7, %v390_v3  ;;  %v904_v20 = vmul.f32 %v2694_v7, %v391_v4  ;;  %v411_v6 = vld [vmem:[%s2681_s26 + $0x748] sm:$0xff]  ;;  %v412_v8 = vld [vmem:[%s2681_s26 + $0x750] sm:$0xff] }
  0xd4   : > { %1922 = vst [vmem:[%s2724_s20 + $0x670] sm:$0xff] %v1410_v11  ;;  %v905_v21 = vmul.f32 %v2694_v7, %v392_v5  ;;  %1923 = vst [vmem:[%s2724_s20 + $0x678] sm:$0xff] %v1411_v13  ;;  %v1412_v25 = vadd.f32 %v2698_v10, %v899_v14  ;;  %v1413_v26 = vadd.f32 %v2698_v10, %v900_v15  ;;  %v413_v9 = vld [vmem:[%s2681_s26 + $0x758] sm:$0xff]  ;;  %v414_v15 = vld [vmem:[%s2681_s26 + $0x760] sm:$0xff] }
  0xd5   : > { %v1414_v27 = vadd.f32 %v2698_v10, %v901_v16  ;;  %v906_v28 = vmul.f32 %v2694_v7, %v393_v12  ;;  %v1415_v32 = vadd.f32 %v2698_v10, %v902_v18  ;;  %v1416_v33 = vadd.f32 %v2698_v10, %v903_v19  ;;  %v415_v16 = vld [vmem:[%s2681_s26 + $0x768] sm:$0xff] }
  0xd6   : > { %v1417_v34 = vadd.f32 %v2698_v10, %v904_v20  ;;  %v1418_v35 = vadd.f32 %v2698_v10, %v905_v21  ;;  %1924 = vst [vmem:[%s2724_s20 + $0x680] sm:$0xff] %v1412_v25  ;;  %1925 = vst [vmem:[%s2724_s20 + $0x688] sm:$0xff] %v1413_v26  ;;  %v907_v38 = vmul.f32 %v2694_v7, %v394_v17  ;;  %v416_v17 = vld [vmem:[%s2681_s26 + $0x770] sm:$0xff] }
  0xd7   : > { %1926 = vst [vmem:[%s2724_s20 + $0x690] sm:$0xff] %v1414_v27  ;;  %v1419_v37 = vadd.f32 %v2698_v10, %v906_v28  ;;  %v908_v39 = vmul.f32 %v2694_v7, %v395_v22  ;;  %v909_v40 = vmul.f32 %v2694_v7, %v396_v23  ;;  %1927 = vst [vmem:[%s2724_s20 + $0x698] sm:$0xff] %v1415_v32  ;;  %v417_v22 = vld [vmem:[%s2681_s26 + $0x778] sm:$0xff]  ;;  %v418_v27 = vld [vmem:[%s2681_s26 + $0x780] sm:$0xff] }
  0xd8   : > { %1928 = vst [vmem:[%s2724_s20 + $0x6a0] sm:$0xff] %v1416_v33  ;;  %1929 = vst [vmem:[%s2724_s20 + $0x6a8] sm:$0xff] %v1417_v34  ;;  %v910_v42 = vmul.f32 %v2694_v7, %v397_v24  ;;  %v911_v43 = vmul.f32 %v2694_v7, %v398_v29  ;;  %v912_v44 = vmul.f32 %v2694_v7, %v399_v30  ;;  %v419_v32 = vld [vmem:[%s2681_s26 + $0x788] sm:$0xff]  ;;  %v420_v33 = vld [vmem:[%s2681_s26 + $0x790] sm:$0xff] }
  0xd9   : > { %1930 = vst [vmem:[%s2724_s20 + $0x6b0] sm:$0xff] %v1418_v35  ;;  %v913_v45 = vmul.f32 %v2694_v7, %v400_v31  ;;  %1931 = vst [vmem:[%s2724_s20 + $0x6b8] sm:$0xff] %v1419_v37  ;;  %v1420_v49 = vadd.f32 %v2698_v10, %v907_v38  ;;  %v1421_v50 = vadd.f32 %v2698_v10, %v908_v39  ;;  %v421_v34 = vld [vmem:[%s2681_s26 + $0x798] sm:$0xff]  ;;  %v422_v39 = vld [vmem:[%s2681_s26 + $0x7a0] sm:$0xff] }
  0xda   : > { %v1422_v51 = vadd.f32 %v2698_v10, %v909_v40  ;;  %v914_v52 = vmul.f32 %v2694_v7, %v401_v36  ;;  %v1423_v56 = vadd.f32 %v2698_v10, %v910_v42  ;;  %v1424_v57 = vadd.f32 %v2698_v10, %v911_v43  ;;  %v423_v40 = vld [vmem:[%s2681_s26 + $0x7a8] sm:$0xff] }
  0xdb   : > { %v1425_v58 = vadd.f32 %v2698_v10, %v912_v44  ;;  %v1426_v59 = vadd.f32 %v2698_v10, %v913_v45  ;;  %1932 = vst [vmem:[%s2724_s20 + $0x6c0] sm:$0xff] %v1420_v49  ;;  %1933 = vst [vmem:[%s2724_s20 + $0x6c8] sm:$0xff] %v1421_v50  ;;  %v915_v62 = vmul.f32 %v2694_v7, %v402_v41  ;;  %v424_v41 = vld [vmem:[%s2681_s26 + $0x7b0] sm:$0xff] }
  0xdc   : > { %1934 = vst [vmem:[%s2724_s20 + $0x6d0] sm:$0xff] %v1422_v51  ;;  %v1427_v61 = vadd.f32 %v2698_v10, %v914_v52  ;;  %v916_v63 = vmul.f32 %v2694_v7, %v403_v46  ;;  %v917_v0 = vmul.f32 %v2694_v7, %v404_v47  ;;  %1935 = vst [vmem:[%s2724_s20 + $0x6d8] sm:$0xff] %v1423_v56  ;;  %v425_v46 = vld [vmem:[%s2681_s26 + $0x7b8] sm:$0xff]  ;;  %v426_v51 = vld [vmem:[%s2681_s26 + $0x7c0] sm:$0xff] }
  0xdd   : > { %1936 = vst [vmem:[%s2724_s20 + $0x6e0] sm:$0xff] %v1424_v57  ;;  %1937 = vst [vmem:[%s2724_s20 + $0x6e8] sm:$0xff] %v1425_v58  ;;  %v918_v2 = vmul.f32 %v2694_v7, %v405_v48  ;;  %v919_v3 = vmul.f32 %v2694_v7, %v406_v53  ;;  %v920_v4 = vmul.f32 %v2694_v7, %v407_v54  ;;  %v427_v56 = vld [vmem:[%s2681_s26 + $0x7c8] sm:$0xff]  ;;  %v428_v57 = vld [vmem:[%s2681_s26 + $0x7d0] sm:$0xff] }
  0xde   : > { %1938 = vst [vmem:[%s2724_s20 + $0x6f0] sm:$0xff] %v1426_v59  ;;  %v921_v5 = vmul.f32 %v2694_v7, %v408_v55  ;;  %1939 = vst [vmem:[%s2724_s20 + $0x6f8] sm:$0xff] %v1427_v61  ;;  %v1428_v11 = vadd.f32 %v2698_v10, %v915_v62  ;;  %v1429_v12 = vadd.f32 %v2698_v10, %v916_v63  ;;  %v429_v58 = vld [vmem:[%s2681_s26 + $0x7d8] sm:$0xff]  ;;  %v430_v63 = vld [vmem:[%s2681_s26 + $0x7e0] sm:$0xff] }
  0xdf   : > { %v1430_v13 = vadd.f32 %v2698_v10, %v917_v0  ;;  %v922_v14 = vmul.f32 %v2694_v7, %v409_v60  ;;  %v1431_v18 = vadd.f32 %v2698_v10, %v918_v2  ;;  %v1432_v19 = vadd.f32 %v2698_v10, %v919_v3  ;;  %v431_v0 = vld [vmem:[%s2681_s26 + $0x7e8] sm:$0xff] }
  0xe0   : > { %v1433_v20 = vadd.f32 %v2698_v10, %v920_v4  ;;  %v1434_v21 = vadd.f32 %v2698_v10, %v921_v5  ;;  %1940 = vst [vmem:[%s2724_s20 + $0x700] sm:$0xff] %v1428_v11  ;;  %1941 = vst [vmem:[%s2724_s20 + $0x708] sm:$0xff] %v1429_v12  ;;  %v923_v24 = vmul.f32 %v2694_v7, %v410_v1  ;;  %v432_v1 = vld [vmem:[%s2681_s26 + $0x7f0] sm:$0xff] }
  0xe1   : > { %1942 = vst [vmem:[%s2724_s20 + $0x710] sm:$0xff] %v1430_v13  ;;  %v1435_v23 = vadd.f32 %v2698_v10, %v922_v14  ;;  %v924_v25 = vmul.f32 %v2694_v7, %v411_v6  ;;  %v925_v26 = vmul.f32 %v2694_v7, %v412_v8  ;;  %1943 = vst [vmem:[%s2724_s20 + $0x718] sm:$0xff] %v1431_v18  ;;  %v433_v6 = vld [vmem:[%s2681_s26 + $0x7f8] sm:$0xff]  ;;  %v434_v13 = vld [vmem:[%s2681_s26 + $0x800] sm:$0xff] }
  0xe2   : > { %1944 = vst [vmem:[%s2724_s20 + $0x720] sm:$0xff] %v1432_v19  ;;  %1945 = vst [vmem:[%s2724_s20 + $0x728] sm:$0xff] %v1433_v20  ;;  %v926_v28 = vmul.f32 %v2694_v7, %v413_v9  ;;  %v927_v29 = vmul.f32 %v2694_v7, %v414_v15  ;;  %v928_v30 = vmul.f32 %v2694_v7, %v415_v16  ;;  %v435_v18 = vld [vmem:[%s2681_s26 + $0x808] sm:$0xff]  ;;  %v436_v19 = vld [vmem:[%s2681_s26 + $0x810] sm:$0xff] }
  0xe3   : > { %1946 = vst [vmem:[%s2724_s20 + $0x730] sm:$0xff] %v1434_v21  ;;  %v929_v31 = vmul.f32 %v2694_v7, %v416_v17  ;;  %1947 = vst [vmem:[%s2724_s20 + $0x738] sm:$0xff] %v1435_v23  ;;  %v1436_v35 = vadd.f32 %v2698_v10, %v923_v24  ;;  %v1437_v36 = vadd.f32 %v2698_v10, %v924_v25  ;;  %v437_v20 = vld [vmem:[%s2681_s26 + $0x818] sm:$0xff]  ;;  %v438_v25 = vld [vmem:[%s2681_s26 + $0x820] sm:$0xff] }
  0xe4   : > { %v1438_v37 = vadd.f32 %v2698_v10, %v925_v26  ;;  %v930_v38 = vmul.f32 %v2694_v7, %v417_v22  ;;  %v1439_v42 = vadd.f32 %v2698_v10, %v926_v28  ;;  %v1440_v43 = vadd.f32 %v2698_v10, %v927_v29  ;;  %v439_v26 = vld [vmem:[%s2681_s26 + $0x828] sm:$0xff] }
  0xe5   : > { %v1441_v44 = vadd.f32 %v2698_v10, %v928_v30  ;;  %v1442_v45 = vadd.f32 %v2698_v10, %v929_v31  ;;  %1948 = vst [vmem:[%s2724_s20 + $0x740] sm:$0xff] %v1436_v35  ;;  %1949 = vst [vmem:[%s2724_s20 + $0x748] sm:$0xff] %v1437_v36  ;;  %v931_v48 = vmul.f32 %v2694_v7, %v418_v27  ;;  %v440_v27 = vld [vmem:[%s2681_s26 + $0x830] sm:$0xff] }
  0xe6   : > { %1950 = vst [vmem:[%s2724_s20 + $0x750] sm:$0xff] %v1438_v37  ;;  %v1443_v47 = vadd.f32 %v2698_v10, %v930_v38  ;;  %v932_v49 = vmul.f32 %v2694_v7, %v419_v32  ;;  %v933_v50 = vmul.f32 %v2694_v7, %v420_v33  ;;  %1951 = vst [vmem:[%s2724_s20 + $0x758] sm:$0xff] %v1439_v42  ;;  %v441_v32 = vld [vmem:[%s2681_s26 + $0x838] sm:$0xff]  ;;  %v442_v37 = vld [vmem:[%s2681_s26 + $0x840] sm:$0xff] }
  0xe7   : > { %1952 = vst [vmem:[%s2724_s20 + $0x760] sm:$0xff] %v1440_v43  ;;  %1953 = vst [vmem:[%s2724_s20 + $0x768] sm:$0xff] %v1441_v44  ;;  %v934_v52 = vmul.f32 %v2694_v7, %v421_v34  ;;  %v935_v53 = vmul.f32 %v2694_v7, %v422_v39  ;;  %v936_v54 = vmul.f32 %v2694_v7, %v423_v40  ;;  %v443_v42 = vld [vmem:[%s2681_s26 + $0x848] sm:$0xff]  ;;  %v444_v43 = vld [vmem:[%s2681_s26 + $0x850] sm:$0xff] }
  0xe8   : > { %1954 = vst [vmem:[%s2724_s20 + $0x770] sm:$0xff] %v1442_v45  ;;  %v937_v55 = vmul.f32 %v2694_v7, %v424_v41  ;;  %1955 = vst [vmem:[%s2724_s20 + $0x778] sm:$0xff] %v1443_v47  ;;  %v1444_v59 = vadd.f32 %v2698_v10, %v931_v48  ;;  %v1445_v60 = vadd.f32 %v2698_v10, %v932_v49  ;;  %v445_v44 = vld [vmem:[%s2681_s26 + $0x858] sm:$0xff]  ;;  %v446_v49 = vld [vmem:[%s2681_s26 + $0x860] sm:$0xff] }
  0xe9   : > { %v1446_v61 = vadd.f32 %v2698_v10, %v933_v50  ;;  %v938_v62 = vmul.f32 %v2694_v7, %v425_v46  ;;  %v1447_v2 = vadd.f32 %v2698_v10, %v934_v52  ;;  %v1448_v3 = vadd.f32 %v2698_v10, %v935_v53  ;;  %v447_v50 = vld [vmem:[%s2681_s26 + $0x868] sm:$0xff] }
  0xea   : > { %v1449_v4 = vadd.f32 %v2698_v10, %v936_v54  ;;  %v1450_v5 = vadd.f32 %v2698_v10, %v937_v55  ;;  %1956 = vst [vmem:[%s2724_s20 + $0x780] sm:$0xff] %v1444_v59  ;;  %1957 = vst [vmem:[%s2724_s20 + $0x788] sm:$0xff] %v1445_v60  ;;  %v939_v9 = vmul.f32 %v2694_v7, %v426_v51  ;;  %v448_v51 = vld [vmem:[%s2681_s26 + $0x870] sm:$0xff] }
  0xeb   : > { %1958 = vst [vmem:[%s2724_s20 + $0x790] sm:$0xff] %v1446_v61  ;;  %v1451_v8 = vadd.f32 %v2698_v10, %v938_v62  ;;  %v940_v11 = vmul.f32 %v2694_v7, %v427_v56  ;;  %v941_v12 = vmul.f32 %v2694_v7, %v428_v57  ;;  %1959 = vst [vmem:[%s2724_s20 + $0x798] sm:$0xff] %v1447_v2  ;;  %v449_v56 = vld [vmem:[%s2681_s26 + $0x878] sm:$0xff]  ;;  %v450_v61 = vld [vmem:[%s2681_s26 + $0x880] sm:$0xff] }
  0xec   : > { %1960 = vst [vmem:[%s2724_s20 + $0x7a0] sm:$0xff] %v1448_v3  ;;  %1961 = vst [vmem:[%s2724_s20 + $0x7a8] sm:$0xff] %v1449_v4  ;;  %v942_v14 = vmul.f32 %v2694_v7, %v429_v58  ;;  %v943_v15 = vmul.f32 %v2694_v7, %v430_v63  ;;  %v944_v16 = vmul.f32 %v2694_v7, %v431_v0  ;;  %v451_v2 = vld [vmem:[%s2681_s26 + $0x888] sm:$0xff]  ;;  %v452_v3 = vld [vmem:[%s2681_s26 + $0x890] sm:$0xff] }
  0xed   : > { %1962 = vst [vmem:[%s2724_s20 + $0x7b0] sm:$0xff] %v1450_v5  ;;  %v945_v17 = vmul.f32 %v2694_v7, %v432_v1  ;;  %1963 = vst [vmem:[%s2724_s20 + $0x7b8] sm:$0xff] %v1451_v8  ;;  %v1452_v21 = vadd.f32 %v2698_v10, %v939_v9  ;;  %v1453_v22 = vadd.f32 %v2698_v10, %v940_v11  ;;  %v453_v4 = vld [vmem:[%s2681_s26 + $0x898] sm:$0xff]  ;;  %v454_v11 = vld [vmem:[%s2681_s26 + $0x8a0] sm:$0xff] }
  0xee   : > { %v1454_v23 = vadd.f32 %v2698_v10, %v941_v12  ;;  %v946_v24 = vmul.f32 %v2694_v7, %v433_v6  ;;  %v1455_v28 = vadd.f32 %v2698_v10, %v942_v14  ;;  %v1456_v29 = vadd.f32 %v2698_v10, %v943_v15  ;;  %v455_v12 = vld [vmem:[%s2681_s26 + $0x8a8] sm:$0xff] }
  0xef   : > { %v1457_v30 = vadd.f32 %v2698_v10, %v944_v16  ;;  %v1458_v31 = vadd.f32 %v2698_v10, %v945_v17  ;;  %1964 = vst [vmem:[%s2724_s20 + $0x7c0] sm:$0xff] %v1452_v21  ;;  %1965 = vst [vmem:[%s2724_s20 + $0x7c8] sm:$0xff] %v1453_v22  ;;  %v947_v34 = vmul.f32 %v2694_v7, %v434_v13  ;;  %v456_v13 = vld [vmem:[%s2681_s26 + $0x8b0] sm:$0xff] }
  0xf0   : > { %1966 = vst [vmem:[%s2724_s20 + $0x7d0] sm:$0xff] %v1454_v23  ;;  %v1459_v33 = vadd.f32 %v2698_v10, %v946_v24  ;;  %v948_v35 = vmul.f32 %v2694_v7, %v435_v18  ;;  %v949_v36 = vmul.f32 %v2694_v7, %v436_v19  ;;  %1967 = vst [vmem:[%s2724_s20 + $0x7d8] sm:$0xff] %v1455_v28  ;;  %v457_v18 = vld [vmem:[%s2681_s26 + $0x8b8] sm:$0xff]  ;;  %v458_v23 = vld [vmem:[%s2681_s26 + $0x8c0] sm:$0xff] }
  0xf1   : > { %1968 = vst [vmem:[%s2724_s20 + $0x7e0] sm:$0xff] %v1456_v29  ;;  %1969 = vst [vmem:[%s2724_s20 + $0x7e8] sm:$0xff] %v1457_v30  ;;  %v950_v38 = vmul.f32 %v2694_v7, %v437_v20  ;;  %v951_v39 = vmul.f32 %v2694_v7, %v438_v25  ;;  %v952_v40 = vmul.f32 %v2694_v7, %v439_v26  ;;  %v459_v28 = vld [vmem:[%s2681_s26 + $0x8c8] sm:$0xff]  ;;  %v460_v29 = vld [vmem:[%s2681_s26 + $0x8d0] sm:$0xff] }
  0xf2   : > { %1970 = vst [vmem:[%s2724_s20 + $0x7f0] sm:$0xff] %v1458_v31  ;;  %v953_v41 = vmul.f32 %v2694_v7, %v440_v27  ;;  %1971 = vst [vmem:[%s2724_s20 + $0x7f8] sm:$0xff] %v1459_v33  ;;  %v1460_v45 = vadd.f32 %v2698_v10, %v947_v34  ;;  %v1461_v46 = vadd.f32 %v2698_v10, %v948_v35  ;;  %v461_v30 = vld [vmem:[%s2681_s26 + $0x8d8] sm:$0xff]  ;;  %v462_v35 = vld [vmem:[%s2681_s26 + $0x8e0] sm:$0xff] }
  0xf3   : > { %v1462_v47 = vadd.f32 %v2698_v10, %v949_v36  ;;  %v954_v48 = vmul.f32 %v2694_v7, %v441_v32  ;;  %v1463_v52 = vadd.f32 %v2698_v10, %v950_v38  ;;  %v1464_v53 = vadd.f32 %v2698_v10, %v951_v39  ;;  %v463_v36 = vld [vmem:[%s2681_s26 + $0x8e8] sm:$0xff] }
  0xf4   : > { %v1465_v54 = vadd.f32 %v2698_v10, %v952_v40  ;;  %v1466_v55 = vadd.f32 %v2698_v10, %v953_v41  ;;  %1972 = vst [vmem:[%s2724_s20 + $0x800] sm:$0xff] %v1460_v45  ;;  %1973 = vst [vmem:[%s2724_s20 + $0x808] sm:$0xff] %v1461_v46  ;;  %v955_v58 = vmul.f32 %v2694_v7, %v442_v37  ;;  %v464_v37 = vld [vmem:[%s2681_s26 + $0x8f0] sm:$0xff] }
  0xf5   : > { %1974 = vst [vmem:[%s2724_s20 + $0x810] sm:$0xff] %v1462_v47  ;;  %v1467_v57 = vadd.f32 %v2698_v10, %v954_v48  ;;  %v956_v59 = vmul.f32 %v2694_v7, %v443_v42  ;;  %v957_v60 = vmul.f32 %v2694_v7, %v444_v43  ;;  %1975 = vst [vmem:[%s2724_s20 + $0x818] sm:$0xff] %v1463_v52  ;;  %v465_v42 = vld [vmem:[%s2681_s26 + $0x8f8] sm:$0xff]  ;;  %v466_v47 = vld [vmem:[%s2681_s26 + $0x900] sm:$0xff] }
  0xf6   : > { %1976 = vst [vmem:[%s2724_s20 + $0x820] sm:$0xff] %v1464_v53  ;;  %1977 = vst [vmem:[%s2724_s20 + $0x828] sm:$0xff] %v1465_v54  ;;  %v958_v62 = vmul.f32 %v2694_v7, %v445_v44  ;;  %v959_v63 = vmul.f32 %v2694_v7, %v446_v49  ;;  %v960_v0 = vmul.f32 %v2694_v7, %v447_v50  ;;  %v467_v52 = vld [vmem:[%s2681_s26 + $0x908] sm:$0xff]  ;;  %v468_v53 = vld [vmem:[%s2681_s26 + $0x910] sm:$0xff] }
  0xf7   : > { %1978 = vst [vmem:[%s2724_s20 + $0x830] sm:$0xff] %v1466_v55  ;;  %v961_v1 = vmul.f32 %v2694_v7, %v448_v51  ;;  %1979 = vst [vmem:[%s2724_s20 + $0x838] sm:$0xff] %v1467_v57  ;;  %v1468_v5 = vadd.f32 %v2698_v10, %v955_v58  ;;  %v1469_v6 = vadd.f32 %v2698_v10, %v956_v59  ;;  %v469_v54 = vld [vmem:[%s2681_s26 + $0x918] sm:$0xff]  ;;  %v470_v59 = vld [vmem:[%s2681_s26 + $0x920] sm:$0xff] }
  0xf8   : > { %v1470_v8 = vadd.f32 %v2698_v10, %v957_v60  ;;  %v962_v9 = vmul.f32 %v2694_v7, %v449_v56  ;;  %v1471_v14 = vadd.f32 %v2698_v10, %v958_v62  ;;  %v1472_v15 = vadd.f32 %v2698_v10, %v959_v63  ;;  %v471_v60 = vld [vmem:[%s2681_s26 + $0x928] sm:$0xff] }
  0xf9   : > { %v1473_v16 = vadd.f32 %v2698_v10, %v960_v0  ;;  %v1474_v17 = vadd.f32 %v2698_v10, %v961_v1  ;;  %1980 = vst [vmem:[%s2724_s20 + $0x840] sm:$0xff] %v1468_v5  ;;  %1981 = vst [vmem:[%s2724_s20 + $0x848] sm:$0xff] %v1469_v6  ;;  %v963_v20 = vmul.f32 %v2694_v7, %v450_v61  ;;  %v472_v61 = vld [vmem:[%s2681_s26 + $0x930] sm:$0xff] }
  0xfa   : > { %1982 = vst [vmem:[%s2724_s20 + $0x850] sm:$0xff] %v1470_v8  ;;  %v1475_v19 = vadd.f32 %v2698_v10, %v962_v9  ;;  %v964_v21 = vmul.f32 %v2694_v7, %v451_v2  ;;  %v965_v22 = vmul.f32 %v2694_v7, %v452_v3  ;;  %1983 = vst [vmem:[%s2724_s20 + $0x858] sm:$0xff] %v1471_v14  ;;  %v473_v2 = vld [vmem:[%s2681_s26 + $0x938] sm:$0xff]  ;;  %v474_v8 = vld [vmem:[%s2681_s26 + $0x940] sm:$0xff] }
  0xfb   : > { %1984 = vst [vmem:[%s2724_s20 + $0x860] sm:$0xff] %v1472_v15  ;;  %1985 = vst [vmem:[%s2724_s20 + $0x868] sm:$0xff] %v1473_v16  ;;  %v966_v24 = vmul.f32 %v2694_v7, %v453_v4  ;;  %v967_v25 = vmul.f32 %v2694_v7, %v454_v11  ;;  %v968_v26 = vmul.f32 %v2694_v7, %v455_v12  ;;  %v475_v14 = vld [vmem:[%s2681_s26 + $0x948] sm:$0xff]  ;;  %v476_v15 = vld [vmem:[%s2681_s26 + $0x950] sm:$0xff] }
  0xfc   : > { %1986 = vst [vmem:[%s2724_s20 + $0x870] sm:$0xff] %v1474_v17  ;;  %v969_v27 = vmul.f32 %v2694_v7, %v456_v13  ;;  %1987 = vst [vmem:[%s2724_s20 + $0x878] sm:$0xff] %v1475_v19  ;;  %v1476_v31 = vadd.f32 %v2698_v10, %v963_v20  ;;  %v1477_v32 = vadd.f32 %v2698_v10, %v964_v21  ;;  %v477_v16 = vld [vmem:[%s2681_s26 + $0x958] sm:$0xff]  ;;  %v478_v21 = vld [vmem:[%s2681_s26 + $0x960] sm:$0xff] }
  0xfd   : > { %v1478_v33 = vadd.f32 %v2698_v10, %v965_v22  ;;  %v970_v34 = vmul.f32 %v2694_v7, %v457_v18  ;;  %v1479_v38 = vadd.f32 %v2698_v10, %v966_v24  ;;  %v1480_v39 = vadd.f32 %v2698_v10, %v967_v25  ;;  %v479_v22 = vld [vmem:[%s2681_s26 + $0x968] sm:$0xff] }
  0xfe   : > { %v1481_v40 = vadd.f32 %v2698_v10, %v968_v26  ;;  %v1482_v41 = vadd.f32 %v2698_v10, %v969_v27  ;;  %1988 = vst [vmem:[%s2724_s20 + $0x880] sm:$0xff] %v1476_v31  ;;  %1989 = vst [vmem:[%s2724_s20 + $0x888] sm:$0xff] %v1477_v32  ;;  %v971_v44 = vmul.f32 %v2694_v7, %v458_v23  ;;  %v480_v23 = vld [vmem:[%s2681_s26 + $0x970] sm:$0xff] }
  0xff   : > { %1990 = vst [vmem:[%s2724_s20 + $0x890] sm:$0xff] %v1478_v33  ;;  %v1483_v43 = vadd.f32 %v2698_v10, %v970_v34  ;;  %v972_v45 = vmul.f32 %v2694_v7, %v459_v28  ;;  %v973_v46 = vmul.f32 %v2694_v7, %v460_v29  ;;  %1991 = vst [vmem:[%s2724_s20 + $0x898] sm:$0xff] %v1479_v38  ;;  %v481_v28 = vld [vmem:[%s2681_s26 + $0x978] sm:$0xff]  ;;  %v482_v33 = vld [vmem:[%s2681_s26 + $0x980] sm:$0xff] }
 0x100   : > { %1992 = vst [vmem:[%s2724_s20 + $0x8a0] sm:$0xff] %v1480_v39  ;;  %1993 = vst [vmem:[%s2724_s20 + $0x8a8] sm:$0xff] %v1481_v40  ;;  %v974_v48 = vmul.f32 %v2694_v7, %v461_v30  ;;  %v975_v49 = vmul.f32 %v2694_v7, %v462_v35  ;;  %v976_v50 = vmul.f32 %v2694_v7, %v463_v36  ;;  %v483_v38 = vld [vmem:[%s2681_s26 + $0x988] sm:$0xff]  ;;  %v484_v39 = vld [vmem:[%s2681_s26 + $0x990] sm:$0xff] }
 0x101   : > { %1994 = vst [vmem:[%s2724_s20 + $0x8b0] sm:$0xff] %v1482_v41  ;;  %v977_v51 = vmul.f32 %v2694_v7, %v464_v37  ;;  %1995 = vst [vmem:[%s2724_s20 + $0x8b8] sm:$0xff] %v1483_v43  ;;  %v1484_v55 = vadd.f32 %v2698_v10, %v971_v44  ;;  %v1485_v56 = vadd.f32 %v2698_v10, %v972_v45  ;;  %v485_v40 = vld [vmem:[%s2681_s26 + $0x998] sm:$0xff]  ;;  %v486_v45 = vld [vmem:[%s2681_s26 + $0x9a0] sm:$0xff] }
 0x102   : > { %v1486_v57 = vadd.f32 %v2698_v10, %v973_v46  ;;  %v978_v58 = vmul.f32 %v2694_v7, %v465_v42  ;;  %v1487_v62 = vadd.f32 %v2698_v10, %v974_v48  ;;  %v1488_v63 = vadd.f32 %v2698_v10, %v975_v49  ;;  %v487_v46 = vld [vmem:[%s2681_s26 + $0x9a8] sm:$0xff] }
 0x103   : > { %v1489_v0 = vadd.f32 %v2698_v10, %v976_v50  ;;  %v1490_v1 = vadd.f32 %v2698_v10, %v977_v51  ;;  %1996 = vst [vmem:[%s2724_s20 + $0x8c0] sm:$0xff] %v1484_v55  ;;  %1997 = vst [vmem:[%s2724_s20 + $0x8c8] sm:$0xff] %v1485_v56  ;;  %v979_v4 = vmul.f32 %v2694_v7, %v466_v47  ;;  %v488_v47 = vld [vmem:[%s2681_s26 + $0x9b0] sm:$0xff] }
 0x104   : > { %1998 = vst [vmem:[%s2724_s20 + $0x8d0] sm:$0xff] %v1486_v57  ;;  %v1491_v3 = vadd.f32 %v2698_v10, %v978_v58  ;;  %v980_v5 = vmul.f32 %v2694_v7, %v467_v52  ;;  %v981_v6 = vmul.f32 %v2694_v7, %v468_v53  ;;  %1999 = vst [vmem:[%s2724_s20 + $0x8d8] sm:$0xff] %v1487_v62  ;;  %v489_v52 = vld [vmem:[%s2681_s26 + $0x9b8] sm:$0xff]  ;;  %v490_v57 = vld [vmem:[%s2681_s26 + $0x9c0] sm:$0xff] }
 0x105   : > { %2000 = vst [vmem:[%s2724_s20 + $0x8e0] sm:$0xff] %v1488_v63  ;;  %2001 = vst [vmem:[%s2724_s20 + $0x8e8] sm:$0xff] %v1489_v0  ;;  %v982_v9 = vmul.f32 %v2694_v7, %v469_v54  ;;  %v983_v11 = vmul.f32 %v2694_v7, %v470_v59  ;;  %v984_v12 = vmul.f32 %v2694_v7, %v471_v60  ;;  %v491_v62 = vld [vmem:[%s2681_s26 + $0x9c8] sm:$0xff]  ;;  %v492_v63 = vld [vmem:[%s2681_s26 + $0x9d0] sm:$0xff] }
 0x106   : > { %2002 = vst [vmem:[%s2724_s20 + $0x8f0] sm:$0xff] %v1490_v1  ;;  %v985_v13 = vmul.f32 %v2694_v7, %v472_v61  ;;  %2003 = vst [vmem:[%s2724_s20 + $0x8f8] sm:$0xff] %v1491_v3  ;;  %v1492_v17 = vadd.f32 %v2698_v10, %v979_v4  ;;  %v1493_v18 = vadd.f32 %v2698_v10, %v980_v5  ;;  %v493_v0 = vld [vmem:[%s2681_s26 + $0x9d8] sm:$0xff]  ;;  %v494_v5 = vld [vmem:[%s2681_s26 + $0x9e0] sm:$0xff] }
 0x107   : > { %v1494_v19 = vadd.f32 %v2698_v10, %v981_v6  ;;  %v986_v20 = vmul.f32 %v2694_v7, %v473_v2  ;;  %v1495_v24 = vadd.f32 %v2698_v10, %v982_v9  ;;  %v1496_v25 = vadd.f32 %v2698_v10, %v983_v11  ;;  %v495_v6 = vld [vmem:[%s2681_s26 + $0x9e8] sm:$0xff] }
 0x108   : > { %v1497_v26 = vadd.f32 %v2698_v10, %v984_v12  ;;  %v1498_v27 = vadd.f32 %v2698_v10, %v985_v13  ;;  %2004 = vst [vmem:[%s2724_s20 + $0x900] sm:$0xff] %v1492_v17  ;;  %2005 = vst [vmem:[%s2724_s20 + $0x908] sm:$0xff] %v1493_v18  ;;  %v987_v30 = vmul.f32 %v2694_v7, %v474_v8  ;;  %v496_v8 = vld [vmem:[%s2681_s26 + $0x9f0] sm:$0xff] }
 0x109   : > { %2006 = vst [vmem:[%s2724_s20 + $0x910] sm:$0xff] %v1494_v19  ;;  %v1499_v29 = vadd.f32 %v2698_v10, %v986_v20  ;;  %v988_v31 = vmul.f32 %v2694_v7, %v475_v14  ;;  %v989_v32 = vmul.f32 %v2694_v7, %v476_v15  ;;  %2007 = vst [vmem:[%s2724_s20 + $0x918] sm:$0xff] %v1495_v24  ;;  %v497_v14 = vld [vmem:[%s2681_s26 + $0x9f8] sm:$0xff]  ;;  %v498_v19 = vld [vmem:[%s2681_s26 + $0xa00] sm:$0xff] }
 0x10a   : > { %2008 = vst [vmem:[%s2724_s20 + $0x920] sm:$0xff] %v1496_v25  ;;  %2009 = vst [vmem:[%s2724_s20 + $0x928] sm:$0xff] %v1497_v26  ;;  %v990_v34 = vmul.f32 %v2694_v7, %v477_v16  ;;  %v991_v35 = vmul.f32 %v2694_v7, %v478_v21  ;;  %v992_v36 = vmul.f32 %v2694_v7, %v479_v22  ;;  %v499_v24 = vld [vmem:[%s2681_s26 + $0xa08] sm:$0xff]  ;;  %v500_v25 = vld [vmem:[%s2681_s26 + $0xa10] sm:$0xff] }
 0x10b   : > { %2010 = vst [vmem:[%s2724_s20 + $0x930] sm:$0xff] %v1498_v27  ;;  %v993_v37 = vmul.f32 %v2694_v7, %v480_v23  ;;  %2011 = vst [vmem:[%s2724_s20 + $0x938] sm:$0xff] %v1499_v29  ;;  %v1500_v41 = vadd.f32 %v2698_v10, %v987_v30  ;;  %v1501_v42 = vadd.f32 %v2698_v10, %v988_v31  ;;  %v501_v26 = vld [vmem:[%s2681_s26 + $0xa18] sm:$0xff]  ;;  %v502_v31 = vld [vmem:[%s2681_s26 + $0xa20] sm:$0xff] }
 0x10c   : > { %v1502_v43 = vadd.f32 %v2698_v10, %v989_v32  ;;  %v994_v44 = vmul.f32 %v2694_v7, %v481_v28  ;;  %v1503_v48 = vadd.f32 %v2698_v10, %v990_v34  ;;  %v1504_v49 = vadd.f32 %v2698_v10, %v991_v35  ;;  %v503_v32 = vld [vmem:[%s2681_s26 + $0xa28] sm:$0xff] }
 0x10d   : > { %v1505_v50 = vadd.f32 %v2698_v10, %v992_v36  ;;  %v1506_v51 = vadd.f32 %v2698_v10, %v993_v37  ;;  %2012 = vst [vmem:[%s2724_s20 + $0x940] sm:$0xff] %v1500_v41  ;;  %2013 = vst [vmem:[%s2724_s20 + $0x948] sm:$0xff] %v1501_v42  ;;  %v995_v54 = vmul.f32 %v2694_v7, %v482_v33  ;;  %v504_v33 = vld [vmem:[%s2681_s26 + $0xa30] sm:$0xff] }
 0x10e   : > { %2014 = vst [vmem:[%s2724_s20 + $0x950] sm:$0xff] %v1502_v43  ;;  %v1507_v53 = vadd.f32 %v2698_v10, %v994_v44  ;;  %v996_v55 = vmul.f32 %v2694_v7, %v483_v38  ;;  %v997_v56 = vmul.f32 %v2694_v7, %v484_v39  ;;  %2015 = vst [vmem:[%s2724_s20 + $0x958] sm:$0xff] %v1503_v48  ;;  %v505_v38 = vld [vmem:[%s2681_s26 + $0xa38] sm:$0xff]  ;;  %v506_v43 = vld [vmem:[%s2681_s26 + $0xa40] sm:$0xff] }
 0x10f   : > { %2016 = vst [vmem:[%s2724_s20 + $0x960] sm:$0xff] %v1504_v49  ;;  %2017 = vst [vmem:[%s2724_s20 + $0x968] sm:$0xff] %v1505_v50  ;;  %v998_v58 = vmul.f32 %v2694_v7, %v485_v40  ;;  %v999_v59 = vmul.f32 %v2694_v7, %v486_v45  ;;  %v1000_v60 = vmul.f32 %v2694_v7, %v487_v46  ;;  %v507_v48 = vld [vmem:[%s2681_s26 + $0xa48] sm:$0xff]  ;;  %v508_v49 = vld [vmem:[%s2681_s26 + $0xa50] sm:$0xff] }
 0x110   : > { %2018 = vst [vmem:[%s2724_s20 + $0x970] sm:$0xff] %v1506_v51  ;;  %v1001_v61 = vmul.f32 %v2694_v7, %v488_v47  ;;  %2019 = vst [vmem:[%s2724_s20 + $0x978] sm:$0xff] %v1507_v53  ;;  %v1508_v1 = vadd.f32 %v2698_v10, %v995_v54  ;;  %v1509_v2 = vadd.f32 %v2698_v10, %v996_v55  ;;  %v509_v50 = vld [vmem:[%s2681_s26 + $0xa58] sm:$0xff]  ;;  %v510_v55 = vld [vmem:[%s2681_s26 + $0xa60] sm:$0xff] }
 0x111   : > { %v1510_v3 = vadd.f32 %v2698_v10, %v997_v56  ;;  %v1002_v4 = vmul.f32 %v2694_v7, %v489_v52  ;;  %v1511_v9 = vadd.f32 %v2698_v10, %v998_v58  ;;  %v1512_v11 = vadd.f32 %v2698_v10, %v999_v59  ;;  %v511_v56 = vld [vmem:[%s2681_s26 + $0xa68] sm:$0xff] }
 0x112   : > { %v1513_v12 = vadd.f32 %v2698_v10, %v1000_v60  ;;  %v1514_v13 = vadd.f32 %v2698_v10, %v1001_v61  ;;  %2020 = vst [vmem:[%s2724_s20 + $0x980] sm:$0xff] %v1508_v1  ;;  %2021 = vst [vmem:[%s2724_s20 + $0x988] sm:$0xff] %v1509_v2  ;;  %v1003_v16 = vmul.f32 %v2694_v7, %v490_v57  ;;  %v512_v57 = vld [vmem:[%s2681_s26 + $0xa70] sm:$0xff] }
 0x113   : > { %2022 = vst [vmem:[%s2724_s20 + $0x990] sm:$0xff] %v1510_v3  ;;  %v1515_v15 = vadd.f32 %v2698_v10, %v1002_v4  ;;  %v1004_v17 = vmul.f32 %v2694_v7, %v491_v62  ;;  %v1005_v18 = vmul.f32 %v2694_v7, %v492_v63  ;;  %2023 = vst [vmem:[%s2724_s20 + $0x998] sm:$0xff] %v1511_v9  ;;  %v513_v62 = vld [vmem:[%s2681_s26 + $0xa78] sm:$0xff]  ;;  %v514_v3 = vld [vmem:[%s2681_s26 + $0xa80] sm:$0xff] }
 0x114   : > { %2024 = vst [vmem:[%s2724_s20 + $0x9a0] sm:$0xff] %v1512_v11  ;;  %2025 = vst [vmem:[%s2724_s20 + $0x9a8] sm:$0xff] %v1513_v12  ;;  %v1006_v20 = vmul.f32 %v2694_v7, %v493_v0  ;;  %v1007_v21 = vmul.f32 %v2694_v7, %v494_v5  ;;  %v1008_v22 = vmul.f32 %v2694_v7, %v495_v6  ;;  %v515_v9 = vld [vmem:[%s2681_s26 + $0xa88] sm:$0xff]  ;;  %v516_v11 = vld [vmem:[%s2681_s26 + $0xa90] sm:$0xff] }
 0x115   : > { %2026 = vst [vmem:[%s2724_s20 + $0x9b0] sm:$0xff] %v1514_v13  ;;  %v1009_v23 = vmul.f32 %v2694_v7, %v496_v8  ;;  %2027 = vst [vmem:[%s2724_s20 + $0x9b8] sm:$0xff] %v1515_v15  ;;  %v1516_v27 = vadd.f32 %v2698_v10, %v1003_v16  ;;  %v1517_v28 = vadd.f32 %v2698_v10, %v1004_v17  ;;  %v517_v12 = vld [vmem:[%s2681_s26 + $0xa98] sm:$0xff]  ;;  %v518_v17 = vld [vmem:[%s2681_s26 + $0xaa0] sm:$0xff] }
 0x116   : > { %v1518_v29 = vadd.f32 %v2698_v10, %v1005_v18  ;;  %v1010_v30 = vmul.f32 %v2694_v7, %v497_v14  ;;  %v1519_v34 = vadd.f32 %v2698_v10, %v1006_v20  ;;  %v1520_v35 = vadd.f32 %v2698_v10, %v1007_v21  ;;  %v519_v18 = vld [vmem:[%s2681_s26 + $0xaa8] sm:$0xff] }
 0x117   : > { %v1521_v36 = vadd.f32 %v2698_v10, %v1008_v22  ;;  %v1522_v37 = vadd.f32 %v2698_v10, %v1009_v23  ;;  %2028 = vst [vmem:[%s2724_s20 + $0x9c0] sm:$0xff] %v1516_v27  ;;  %2029 = vst [vmem:[%s2724_s20 + $0x9c8] sm:$0xff] %v1517_v28  ;;  %v1011_v40 = vmul.f32 %v2694_v7, %v498_v19  ;;  %v520_v19 = vld [vmem:[%s2681_s26 + $0xab0] sm:$0xff] }
 0x118   : > { %2030 = vst [vmem:[%s2724_s20 + $0x9d0] sm:$0xff] %v1518_v29  ;;  %v1523_v39 = vadd.f32 %v2698_v10, %v1010_v30  ;;  %v1012_v41 = vmul.f32 %v2694_v7, %v499_v24  ;;  %v1013_v42 = vmul.f32 %v2694_v7, %v500_v25  ;;  %2031 = vst [vmem:[%s2724_s20 + $0x9d8] sm:$0xff] %v1519_v34  ;;  %v521_v24 = vld [vmem:[%s2681_s26 + $0xab8] sm:$0xff]  ;;  %v522_v29 = vld [vmem:[%s2681_s26 + $0xac0] sm:$0xff] }
 0x119   : > { %2032 = vst [vmem:[%s2724_s20 + $0x9e0] sm:$0xff] %v1520_v35  ;;  %2033 = vst [vmem:[%s2724_s20 + $0x9e8] sm:$0xff] %v1521_v36  ;;  %v1014_v44 = vmul.f32 %v2694_v7, %v501_v26  ;;  %v1015_v45 = vmul.f32 %v2694_v7, %v502_v31  ;;  %v1016_v46 = vmul.f32 %v2694_v7, %v503_v32  ;;  %v523_v34 = vld [vmem:[%s2681_s26 + $0xac8] sm:$0xff]  ;;  %v524_v35 = vld [vmem:[%s2681_s26 + $0xad0] sm:$0xff] }
 0x11a   : > { %2034 = vst [vmem:[%s2724_s20 + $0x9f0] sm:$0xff] %v1522_v37  ;;  %v1017_v47 = vmul.f32 %v2694_v7, %v504_v33  ;;  %2035 = vst [vmem:[%s2724_s20 + $0x9f8] sm:$0xff] %v1523_v39  ;;  %v1524_v51 = vadd.f32 %v2698_v10, %v1011_v40  ;;  %v1525_v52 = vadd.f32 %v2698_v10, %v1012_v41  ;;  %v525_v36 = vld [vmem:[%s2681_s26 + $0xad8] sm:$0xff]  ;;  %v526_v41 = vld [vmem:[%s2681_s26 + $0xae0] sm:$0xff] }
 0x11b   : > { %v1526_v53 = vadd.f32 %v2698_v10, %v1013_v42  ;;  %v1018_v54 = vmul.f32 %v2694_v7, %v505_v38  ;;  %v1527_v58 = vadd.f32 %v2698_v10, %v1014_v44  ;;  %v1528_v59 = vadd.f32 %v2698_v10, %v1015_v45  ;;  %v527_v42 = vld [vmem:[%s2681_s26 + $0xae8] sm:$0xff] }
 0x11c   : > { %v1529_v60 = vadd.f32 %v2698_v10, %v1016_v46  ;;  %v1530_v61 = vadd.f32 %v2698_v10, %v1017_v47  ;;  %2036 = vst [vmem:[%s2724_s20 + $0xa00] sm:$0xff] %v1524_v51  ;;  %2037 = vst [vmem:[%s2724_s20 + $0xa08] sm:$0xff] %v1525_v52  ;;  %v1019_v0 = vmul.f32 %v2694_v7, %v506_v43  ;;  %v528_v43 = vld [vmem:[%s2681_s26 + $0xaf0] sm:$0xff] }
 0x11d   : > { %2038 = vst [vmem:[%s2724_s20 + $0xa10] sm:$0xff] %v1526_v53  ;;  %v1531_v63 = vadd.f32 %v2698_v10, %v1018_v54  ;;  %v1020_v1 = vmul.f32 %v2694_v7, %v507_v48  ;;  %v1021_v2 = vmul.f32 %v2694_v7, %v508_v49  ;;  %2039 = vst [vmem:[%s2724_s20 + $0xa18] sm:$0xff] %v1527_v58  ;;  %v529_v48 = vld [vmem:[%s2681_s26 + $0xaf8] sm:$0xff]  ;;  %v530_v53 = vld [vmem:[%s2681_s26 + $0xb00] sm:$0xff] }
 0x11e   : > { %2040 = vst [vmem:[%s2724_s20 + $0xa20] sm:$0xff] %v1528_v59  ;;  %2041 = vst [vmem:[%s2724_s20 + $0xa28] sm:$0xff] %v1529_v60  ;;  %v1022_v4 = vmul.f32 %v2694_v7, %v509_v50  ;;  %v1023_v5 = vmul.f32 %v2694_v7, %v510_v55  ;;  %v1024_v6 = vmul.f32 %v2694_v7, %v511_v56  ;;  %v531_v58 = vld [vmem:[%s2681_s26 + $0xb08] sm:$0xff]  ;;  %v532_v59 = vld [vmem:[%s2681_s26 + $0xb10] sm:$0xff] }
 0x11f   : > { %2042 = vst [vmem:[%s2724_s20 + $0xa30] sm:$0xff] %v1530_v61  ;;  %v1025_v8 = vmul.f32 %v2694_v7, %v512_v57  ;;  %2043 = vst [vmem:[%s2724_s20 + $0xa38] sm:$0xff] %v1531_v63  ;;  %v1532_v13 = vadd.f32 %v2698_v10, %v1019_v0  ;;  %v1533_v14 = vadd.f32 %v2698_v10, %v1020_v1  ;;  %v533_v60 = vld [vmem:[%s2681_s26 + $0xb18] sm:$0xff]  ;;  %v534_v1 = vld [vmem:[%s2681_s26 + $0xb20] sm:$0xff] }
 0x120   : > { %v1534_v15 = vadd.f32 %v2698_v10, %v1021_v2  ;;  %v1026_v16 = vmul.f32 %v2694_v7, %v513_v62  ;;  %v1535_v20 = vadd.f32 %v2698_v10, %v1022_v4  ;;  %v1536_v21 = vadd.f32 %v2698_v10, %v1023_v5  ;;  %v535_v2 = vld [vmem:[%s2681_s26 + $0xb28] sm:$0xff] }
 0x121   : > { %v1537_v22 = vadd.f32 %v2698_v10, %v1024_v6  ;;  %v1538_v23 = vadd.f32 %v2698_v10, %v1025_v8  ;;  %2044 = vst [vmem:[%s2724_s20 + $0xa40] sm:$0xff] %v1532_v13  ;;  %2045 = vst [vmem:[%s2724_s20 + $0xa48] sm:$0xff] %v1533_v14  ;;  %v1027_v26 = vmul.f32 %v2694_v7, %v514_v3  ;;  %v536_v3 = vld [vmem:[%s2681_s26 + $0xb30] sm:$0xff] }
 0x122   : > { %2046 = vst [vmem:[%s2724_s20 + $0xa50] sm:$0xff] %v1534_v15  ;;  %v1539_v25 = vadd.f32 %v2698_v10, %v1026_v16  ;;  %v1028_v27 = vmul.f32 %v2694_v7, %v515_v9  ;;  %v1029_v28 = vmul.f32 %v2694_v7, %v516_v11  ;;  %2047 = vst [vmem:[%s2724_s20 + $0xa58] sm:$0xff] %v1535_v20  ;;  %v537_v9 = vld [vmem:[%s2681_s26 + $0xb38] sm:$0xff]  ;;  %v538_v15 = vld [vmem:[%s2681_s26 + $0xb40] sm:$0xff] }
 0x123   : > { %2048 = vst [vmem:[%s2724_s20 + $0xa60] sm:$0xff] %v1536_v21  ;;  %2049 = vst [vmem:[%s2724_s20 + $0xa68] sm:$0xff] %v1537_v22  ;;  %v1030_v30 = vmul.f32 %v2694_v7, %v517_v12  ;;  %v1031_v31 = vmul.f32 %v2694_v7, %v518_v17  ;;  %v1032_v32 = vmul.f32 %v2694_v7, %v519_v18  ;;  %v539_v20 = vld [vmem:[%s2681_s26 + $0xb48] sm:$0xff]  ;;  %v540_v21 = vld [vmem:[%s2681_s26 + $0xb50] sm:$0xff] }
 0x124   : > { %2050 = vst [vmem:[%s2724_s20 + $0xa70] sm:$0xff] %v1538_v23  ;;  %v1033_v33 = vmul.f32 %v2694_v7, %v520_v19  ;;  %2051 = vst [vmem:[%s2724_s20 + $0xa78] sm:$0xff] %v1539_v25  ;;  %v1540_v37 = vadd.f32 %v2698_v10, %v1027_v26  ;;  %v1541_v38 = vadd.f32 %v2698_v10, %v1028_v27  ;;  %v541_v22 = vld [vmem:[%s2681_s26 + $0xb58] sm:$0xff]  ;;  %v542_v27 = vld [vmem:[%s2681_s26 + $0xb60] sm:$0xff] }
 0x125   : > { %v1542_v39 = vadd.f32 %v2698_v10, %v1029_v28  ;;  %v1034_v40 = vmul.f32 %v2694_v7, %v521_v24  ;;  %v1543_v44 = vadd.f32 %v2698_v10, %v1030_v30  ;;  %v1544_v45 = vadd.f32 %v2698_v10, %v1031_v31  ;;  %v543_v28 = vld [vmem:[%s2681_s26 + $0xb68] sm:$0xff] }
 0x126   : > { %v1545_v46 = vadd.f32 %v2698_v10, %v1032_v32  ;;  %v1546_v47 = vadd.f32 %v2698_v10, %v1033_v33  ;;  %2052 = vst [vmem:[%s2724_s20 + $0xa80] sm:$0xff] %v1540_v37  ;;  %2053 = vst [vmem:[%s2724_s20 + $0xa88] sm:$0xff] %v1541_v38  ;;  %v1035_v50 = vmul.f32 %v2694_v7, %v522_v29  ;;  %v544_v29 = vld [vmem:[%s2681_s26 + $0xb70] sm:$0xff] }
 0x127   : > { %2054 = vst [vmem:[%s2724_s20 + $0xa90] sm:$0xff] %v1542_v39  ;;  %v1547_v49 = vadd.f32 %v2698_v10, %v1034_v40  ;;  %v1036_v51 = vmul.f32 %v2694_v7, %v523_v34  ;;  %v1037_v52 = vmul.f32 %v2694_v7, %v524_v35  ;;  %2055 = vst [vmem:[%s2724_s20 + $0xa98] sm:$0xff] %v1543_v44  ;;  %v545_v34 = vld [vmem:[%s2681_s26 + $0xb78] sm:$0xff]  ;;  %v546_v39 = vld [vmem:[%s2681_s26 + $0xb80] sm:$0xff] }
 0x128   : > { %2056 = vst [vmem:[%s2724_s20 + $0xaa0] sm:$0xff] %v1544_v45  ;;  %2057 = vst [vmem:[%s2724_s20 + $0xaa8] sm:$0xff] %v1545_v46  ;;  %v1038_v54 = vmul.f32 %v2694_v7, %v525_v36  ;;  %v1039_v55 = vmul.f32 %v2694_v7, %v526_v41  ;;  %v1040_v56 = vmul.f32 %v2694_v7, %v527_v42  ;;  %v547_v44 = vld [vmem:[%s2681_s26 + $0xb88] sm:$0xff]  ;;  %v548_v45 = vld [vmem:[%s2681_s26 + $0xb90] sm:$0xff] }
 0x129   : > { %2058 = vst [vmem:[%s2724_s20 + $0xab0] sm:$0xff] %v1546_v47  ;;  %v1041_v57 = vmul.f32 %v2694_v7, %v528_v43  ;;  %2059 = vst [vmem:[%s2724_s20 + $0xab8] sm:$0xff] %v1547_v49  ;;  %v1548_v61 = vadd.f32 %v2698_v10, %v1035_v50  ;;  %v1549_v62 = vadd.f32 %v2698_v10, %v1036_v51  ;;  %v549_v46 = vld [vmem:[%s2681_s26 + $0xb98] sm:$0xff]  ;;  %v550_v51 = vld [vmem:[%s2681_s26 + $0xba0] sm:$0xff] }
 0x12a   : > { %v1550_v63 = vadd.f32 %v2698_v10, %v1037_v52  ;;  %v1042_v0 = vmul.f32 %v2694_v7, %v529_v48  ;;  %v1551_v4 = vadd.f32 %v2698_v10, %v1038_v54  ;;  %v1552_v5 = vadd.f32 %v2698_v10, %v1039_v55  ;;  %v551_v52 = vld [vmem:[%s2681_s26 + $0xba8] sm:$0xff] }
 0x12b   : > { %v1553_v6 = vadd.f32 %v2698_v10, %v1040_v56  ;;  %v1554_v8 = vadd.f32 %v2698_v10, %v1041_v57  ;;  %2060 = vst [vmem:[%s2724_s20 + $0xac0] sm:$0xff] %v1548_v61  ;;  %2061 = vst [vmem:[%s2724_s20 + $0xac8] sm:$0xff] %v1549_v62  ;;  %v1043_v12 = vmul.f32 %v2694_v7, %v530_v53  ;;  %v552_v53 = vld [vmem:[%s2681_s26 + $0xbb0] sm:$0xff] }
 0x12c   : > { %2062 = vst [vmem:[%s2724_s20 + $0xad0] sm:$0xff] %v1550_v63  ;;  %v1555_v11 = vadd.f32 %v2698_v10, %v1042_v0  ;;  %v1044_v13 = vmul.f32 %v2694_v7, %v531_v58  ;;  %v1045_v14 = vmul.f32 %v2694_v7, %v532_v59  ;;  %2063 = vst [vmem:[%s2724_s20 + $0xad8] sm:$0xff] %v1551_v4  ;;  %v553_v58 = vld [vmem:[%s2681_s26 + $0xbb8] sm:$0xff]  ;;  %v554_v63 = vld [vmem:[%s2681_s26 + $0xbc0] sm:$0xff] }
 0x12d   : > { %2064 = vst [vmem:[%s2724_s20 + $0xae0] sm:$0xff] %v1552_v5  ;;  %2065 = vst [vmem:[%s2724_s20 + $0xae8] sm:$0xff] %v1553_v6  ;;  %v1046_v16 = vmul.f32 %v2694_v7, %v533_v60  ;;  %v1047_v17 = vmul.f32 %v2694_v7, %v534_v1  ;;  %v1048_v18 = vmul.f32 %v2694_v7, %v535_v2  ;;  %v555_v4 = vld [vmem:[%s2681_s26 + $0xbc8] sm:$0xff]  ;;  %v556_v5 = vld [vmem:[%s2681_s26 + $0xbd0] sm:$0xff] }
 0x12e   : > { %2066 = vst [vmem:[%s2724_s20 + $0xaf0] sm:$0xff] %v1554_v8  ;;  %v1049_v19 = vmul.f32 %v2694_v7, %v536_v3  ;;  %2067 = vst [vmem:[%s2724_s20 + $0xaf8] sm:$0xff] %v1555_v11  ;;  %v1556_v23 = vadd.f32 %v2698_v10, %v1043_v12  ;;  %v1557_v24 = vadd.f32 %v2698_v10, %v1044_v13  ;;  %v557_v6 = vld [vmem:[%s2681_s26 + $0xbd8] sm:$0xff]  ;;  %v558_v13 = vld [vmem:[%s2681_s26 + $0xbe0] sm:$0xff] }
 0x12f   : > { %v1558_v25 = vadd.f32 %v2698_v10, %v1045_v14  ;;  %v1050_v26 = vmul.f32 %v2694_v7, %v537_v9  ;;  %v1559_v30 = vadd.f32 %v2698_v10, %v1046_v16  ;;  %v1560_v31 = vadd.f32 %v2698_v10, %v1047_v17  ;;  %v559_v14 = vld [vmem:[%s2681_s26 + $0xbe8] sm:$0xff] }
 0x130   : > { %v1561_v32 = vadd.f32 %v2698_v10, %v1048_v18  ;;  %v1562_v33 = vadd.f32 %v2698_v10, %v1049_v19  ;;  %2068 = vst [vmem:[%s2724_s20 + $0xb00] sm:$0xff] %v1556_v23  ;;  %2069 = vst [vmem:[%s2724_s20 + $0xb08] sm:$0xff] %v1557_v24  ;;  %v1051_v36 = vmul.f32 %v2694_v7, %v538_v15  ;;  %v560_v15 = vld [vmem:[%s2681_s26 + $0xbf0] sm:$0xff] }
 0x131   : > { %2070 = vst [vmem:[%s2724_s20 + $0xb10] sm:$0xff] %v1558_v25  ;;  %v1563_v35 = vadd.f32 %v2698_v10, %v1050_v26  ;;  %v1052_v37 = vmul.f32 %v2694_v7, %v539_v20  ;;  %v1053_v38 = vmul.f32 %v2694_v7, %v540_v21  ;;  %2071 = vst [vmem:[%s2724_s20 + $0xb18] sm:$0xff] %v1559_v30  ;;  %v561_v20 = vld [vmem:[%s2681_s26 + $0xbf8] sm:$0xff]  ;;  %v562_v25 = vld [vmem:[%s2681_s26 + $0xc00] sm:$0xff] }
 0x132   : > { %2072 = vst [vmem:[%s2724_s20 + $0xb20] sm:$0xff] %v1560_v31  ;;  %2073 = vst [vmem:[%s2724_s20 + $0xb28] sm:$0xff] %v1561_v32  ;;  %v1054_v40 = vmul.f32 %v2694_v7, %v541_v22  ;;  %v1055_v41 = vmul.f32 %v2694_v7, %v542_v27  ;;  %v1056_v42 = vmul.f32 %v2694_v7, %v543_v28  ;;  %v563_v30 = vld [vmem:[%s2681_s26 + $0xc08] sm:$0xff]  ;;  %v564_v31 = vld [vmem:[%s2681_s26 + $0xc10] sm:$0xff] }
 0x133   : > { %2074 = vst [vmem:[%s2724_s20 + $0xb30] sm:$0xff] %v1562_v33  ;;  %v1057_v43 = vmul.f32 %v2694_v7, %v544_v29  ;;  %2075 = vst [vmem:[%s2724_s20 + $0xb38] sm:$0xff] %v1563_v35  ;;  %v1564_v47 = vadd.f32 %v2698_v10, %v1051_v36  ;;  %v1565_v48 = vadd.f32 %v2698_v10, %v1052_v37  ;;  %v565_v32 = vld [vmem:[%s2681_s26 + $0xc18] sm:$0xff]  ;;  %v566_v37 = vld [vmem:[%s2681_s26 + $0xc20] sm:$0xff] }
 0x134   : > { %v1566_v49 = vadd.f32 %v2698_v10, %v1053_v38  ;;  %v1058_v50 = vmul.f32 %v2694_v7, %v545_v34  ;;  %v1567_v54 = vadd.f32 %v2698_v10, %v1054_v40  ;;  %v1568_v55 = vadd.f32 %v2698_v10, %v1055_v41  ;;  %v567_v38 = vld [vmem:[%s2681_s26 + $0xc28] sm:$0xff] }
 0x135   : > { %v1569_v56 = vadd.f32 %v2698_v10, %v1056_v42  ;;  %v1570_v57 = vadd.f32 %v2698_v10, %v1057_v43  ;;  %2076 = vst [vmem:[%s2724_s20 + $0xb40] sm:$0xff] %v1564_v47  ;;  %2077 = vst [vmem:[%s2724_s20 + $0xb48] sm:$0xff] %v1565_v48  ;;  %v1059_v60 = vmul.f32 %v2694_v7, %v546_v39  ;;  %v568_v39 = vld [vmem:[%s2681_s26 + $0xc30] sm:$0xff] }
 0x136   : > { %2078 = vst [vmem:[%s2724_s20 + $0xb50] sm:$0xff] %v1566_v49  ;;  %v1571_v59 = vadd.f32 %v2698_v10, %v1058_v50  ;;  %v1060_v61 = vmul.f32 %v2694_v7, %v547_v44  ;;  %v1061_v62 = vmul.f32 %v2694_v7, %v548_v45  ;;  %2079 = vst [vmem:[%s2724_s20 + $0xb58] sm:$0xff] %v1567_v54  ;;  %v569_v44 = vld [vmem:[%s2681_s26 + $0xc38] sm:$0xff]  ;;  %v570_v49 = vld [vmem:[%s2681_s26 + $0xc40] sm:$0xff] }
 0x137   : > { %2080 = vst [vmem:[%s2724_s20 + $0xb60] sm:$0xff] %v1568_v55  ;;  %2081 = vst [vmem:[%s2724_s20 + $0xb68] sm:$0xff] %v1569_v56  ;;  %v1062_v0 = vmul.f32 %v2694_v7, %v549_v46  ;;  %v1063_v1 = vmul.f32 %v2694_v7, %v550_v51  ;;  %v1064_v2 = vmul.f32 %v2694_v7, %v551_v52  ;;  %v571_v54 = vld [vmem:[%s2681_s26 + $0xc48] sm:$0xff]  ;;  %v572_v55 = vld [vmem:[%s2681_s26 + $0xc50] sm:$0xff] }
 0x138   : > { %2082 = vst [vmem:[%s2724_s20 + $0xb70] sm:$0xff] %v1570_v57  ;;  %v1065_v3 = vmul.f32 %v2694_v7, %v552_v53  ;;  %2083 = vst [vmem:[%s2724_s20 + $0xb78] sm:$0xff] %v1571_v59  ;;  %v1572_v8 = vadd.f32 %v2698_v10, %v1059_v60  ;;  %v1573_v9 = vadd.f32 %v2698_v10, %v1060_v61  ;;  %v573_v56 = vld [vmem:[%s2681_s26 + $0xc58] sm:$0xff]  ;;  %v574_v61 = vld [vmem:[%s2681_s26 + $0xc60] sm:$0xff] }
 0x139   : > { %v1574_v11 = vadd.f32 %v2698_v10, %v1061_v62  ;;  %v1066_v12 = vmul.f32 %v2694_v7, %v553_v58  ;;  %v1575_v16 = vadd.f32 %v2698_v10, %v1062_v0  ;;  %v1576_v17 = vadd.f32 %v2698_v10, %v1063_v1  ;;  %v575_v62 = vld [vmem:[%s2681_s26 + $0xc68] sm:$0xff] }
 0x13a   : > { %v1577_v18 = vadd.f32 %v2698_v10, %v1064_v2  ;;  %v1578_v19 = vadd.f32 %v2698_v10, %v1065_v3  ;;  %2084 = vst [vmem:[%s2724_s20 + $0xb80] sm:$0xff] %v1572_v8  ;;  %2085 = vst [vmem:[%s2724_s20 + $0xb88] sm:$0xff] %v1573_v9  ;;  %v1067_v22 = vmul.f32 %v2694_v7, %v554_v63  ;;  %v576_v63 = vld [vmem:[%s2681_s26 + $0xc70] sm:$0xff] }
 0x13b   : > { %2086 = vst [vmem:[%s2724_s20 + $0xb90] sm:$0xff] %v1574_v11  ;;  %v1579_v21 = vadd.f32 %v2698_v10, %v1066_v12  ;;  %v1068_v23 = vmul.f32 %v2694_v7, %v555_v4  ;;  %v1069_v24 = vmul.f32 %v2694_v7, %v556_v5  ;;  %2087 = vst [vmem:[%s2724_s20 + $0xb98] sm:$0xff] %v1575_v16  ;;  %v577_v4 = vld [vmem:[%s2681_s26 + $0xc78] sm:$0xff]  ;;  %v578_v11 = vld [vmem:[%s2681_s26 + $0xc80] sm:$0xff] }
 0x13c   : > { %2088 = vst [vmem:[%s2724_s20 + $0xba0] sm:$0xff] %v1576_v17  ;;  %2089 = vst [vmem:[%s2724_s20 + $0xba8] sm:$0xff] %v1577_v18  ;;  %v1070_v26 = vmul.f32 %v2694_v7, %v557_v6  ;;  %v1071_v27 = vmul.f32 %v2694_v7, %v558_v13  ;;  %v1072_v28 = vmul.f32 %v2694_v7, %v559_v14  ;;  %v579_v16 = vld [vmem:[%s2681_s26 + $0xc88] sm:$0xff]  ;;  %v580_v17 = vld [vmem:[%s2681_s26 + $0xc90] sm:$0xff] }
 0x13d   : > { %2090 = vst [vmem:[%s2724_s20 + $0xbb0] sm:$0xff] %v1578_v19  ;;  %v1073_v29 = vmul.f32 %v2694_v7, %v560_v15  ;;  %2091 = vst [vmem:[%s2724_s20 + $0xbb8] sm:$0xff] %v1579_v21  ;;  %v1580_v33 = vadd.f32 %v2698_v10, %v1067_v22  ;;  %v1581_v34 = vadd.f32 %v2698_v10, %v1068_v23  ;;  %v581_v18 = vld [vmem:[%s2681_s26 + $0xc98] sm:$0xff]  ;;  %v582_v23 = vld [vmem:[%s2681_s26 + $0xca0] sm:$0xff] }
 0x13e   : > { %v1582_v35 = vadd.f32 %v2698_v10, %v1069_v24  ;;  %v1074_v36 = vmul.f32 %v2694_v7, %v561_v20  ;;  %v1583_v40 = vadd.f32 %v2698_v10, %v1070_v26  ;;  %v1584_v41 = vadd.f32 %v2698_v10, %v1071_v27  ;;  %v583_v24 = vld [vmem:[%s2681_s26 + $0xca8] sm:$0xff] }
 0x13f   : > { %v1585_v42 = vadd.f32 %v2698_v10, %v1072_v28  ;;  %v1586_v43 = vadd.f32 %v2698_v10, %v1073_v29  ;;  %2092 = vst [vmem:[%s2724_s20 + $0xbc0] sm:$0xff] %v1580_v33  ;;  %2093 = vst [vmem:[%s2724_s20 + $0xbc8] sm:$0xff] %v1581_v34  ;;  %v1075_v46 = vmul.f32 %v2694_v7, %v562_v25  ;;  %v584_v25 = vld [vmem:[%s2681_s26 + $0xcb0] sm:$0xff] }
 0x140   : > { %2094 = vst [vmem:[%s2724_s20 + $0xbd0] sm:$0xff] %v1582_v35  ;;  %v1587_v45 = vadd.f32 %v2698_v10, %v1074_v36  ;;  %v1076_v47 = vmul.f32 %v2694_v7, %v563_v30  ;;  %v1077_v48 = vmul.f32 %v2694_v7, %v564_v31  ;;  %2095 = vst [vmem:[%s2724_s20 + $0xbd8] sm:$0xff] %v1583_v40  ;;  %v585_v30 = vld [vmem:[%s2681_s26 + $0xcb8] sm:$0xff]  ;;  %v586_v35 = vld [vmem:[%s2681_s26 + $0xcc0] sm:$0xff] }
 0x141   : > { %2096 = vst [vmem:[%s2724_s20 + $0xbe0] sm:$0xff] %v1584_v41  ;;  %2097 = vst [vmem:[%s2724_s20 + $0xbe8] sm:$0xff] %v1585_v42  ;;  %v1078_v50 = vmul.f32 %v2694_v7, %v565_v32  ;;  %v1079_v51 = vmul.f32 %v2694_v7, %v566_v37  ;;  %v1080_v52 = vmul.f32 %v2694_v7, %v567_v38  ;;  %v587_v40 = vld [vmem:[%s2681_s26 + $0xcc8] sm:$0xff]  ;;  %v588_v41 = vld [vmem:[%s2681_s26 + $0xcd0] sm:$0xff] }
 0x142   : > { %2098 = vst [vmem:[%s2724_s20 + $0xbf0] sm:$0xff] %v1586_v43  ;;  %v1081_v53 = vmul.f32 %v2694_v7, %v568_v39  ;;  %2099 = vst [vmem:[%s2724_s20 + $0xbf8] sm:$0xff] %v1587_v45  ;;  %v1588_v57 = vadd.f32 %v2698_v10, %v1075_v46  ;;  %v1589_v58 = vadd.f32 %v2698_v10, %v1076_v47  ;;  %v589_v42 = vld [vmem:[%s2681_s26 + $0xcd8] sm:$0xff]  ;;  %v590_v47 = vld [vmem:[%s2681_s26 + $0xce0] sm:$0xff] }
 0x143   : > { %v1590_v59 = vadd.f32 %v2698_v10, %v1077_v48  ;;  %v1082_v60 = vmul.f32 %v2694_v7, %v569_v44  ;;  %v1591_v0 = vadd.f32 %v2698_v10, %v1078_v50  ;;  %v1592_v1 = vadd.f32 %v2698_v10, %v1079_v51  ;;  %v591_v48 = vld [vmem:[%s2681_s26 + $0xce8] sm:$0xff] }
 0x144   : > { %v1593_v2 = vadd.f32 %v2698_v10, %v1080_v52  ;;  %v1594_v3 = vadd.f32 %v2698_v10, %v1081_v53  ;;  %2100 = vst [vmem:[%s2724_s20 + $0xc00] sm:$0xff] %v1588_v57  ;;  %2101 = vst [vmem:[%s2724_s20 + $0xc08] sm:$0xff] %v1589_v58  ;;  %v1083_v6 = vmul.f32 %v2694_v7, %v570_v49  ;;  %v592_v49 = vld [vmem:[%s2681_s26 + $0xcf0] sm:$0xff] }
 0x145   : > { %2102 = vst [vmem:[%s2724_s20 + $0xc10] sm:$0xff] %v1590_v59  ;;  %v1595_v5 = vadd.f32 %v2698_v10, %v1082_v60  ;;  %v1084_v8 = vmul.f32 %v2694_v7, %v571_v54  ;;  %v1085_v9 = vmul.f32 %v2694_v7, %v572_v55  ;;  %2103 = vst [vmem:[%s2724_s20 + $0xc18] sm:$0xff] %v1591_v0  ;;  %v593_v54 = vld [vmem:[%s2681_s26 + $0xcf8] sm:$0xff]  ;;  %v594_v59 = vld [vmem:[%s2681_s26 + $0xd00] sm:$0xff] }
 0x146   : > { %2104 = vst [vmem:[%s2724_s20 + $0xc20] sm:$0xff] %v1592_v1  ;;  %2105 = vst [vmem:[%s2724_s20 + $0xc28] sm:$0xff] %v1593_v2  ;;  %v1086_v12 = vmul.f32 %v2694_v7, %v573_v56  ;;  %v1087_v13 = vmul.f32 %v2694_v7, %v574_v61  ;;  %v1088_v14 = vmul.f32 %v2694_v7, %v575_v62  ;;  %v595_v0 = vld [vmem:[%s2681_s26 + $0xd08] sm:$0xff]  ;;  %v596_v1 = vld [vmem:[%s2681_s26 + $0xd10] sm:$0xff] }
 0x147   : > { %2106 = vst [vmem:[%s2724_s20 + $0xc30] sm:$0xff] %v1594_v3  ;;  %v1089_v15 = vmul.f32 %v2694_v7, %v576_v63  ;;  %2107 = vst [vmem:[%s2724_s20 + $0xc38] sm:$0xff] %v1595_v5  ;;  %v1596_v19 = vadd.f32 %v2698_v10, %v1083_v6  ;;  %v1597_v20 = vadd.f32 %v2698_v10, %v1084_v8  ;;  %v597_v2 = vld [vmem:[%s2681_s26 + $0xd18] sm:$0xff]  ;;  %v598_v8 = vld [vmem:[%s2681_s26 + $0xd20] sm:$0xff] }
 0x148   : > { %v1598_v21 = vadd.f32 %v2698_v10, %v1085_v9  ;;  %v1090_v22 = vmul.f32 %v2694_v7, %v577_v4  ;;  %v1599_v26 = vadd.f32 %v2698_v10, %v1086_v12  ;;  %v1600_v27 = vadd.f32 %v2698_v10, %v1087_v13  ;;  %v599_v9 = vld [vmem:[%s2681_s26 + $0xd28] sm:$0xff] }
 0x149   : > { %v1601_v28 = vadd.f32 %v2698_v10, %v1088_v14  ;;  %v1602_v29 = vadd.f32 %v2698_v10, %v1089_v15  ;;  %2108 = vst [vmem:[%s2724_s20 + $0xc40] sm:$0xff] %v1596_v19  ;;  %2109 = vst [vmem:[%s2724_s20 + $0xc48] sm:$0xff] %v1597_v20  ;;  %v1091_v32 = vmul.f32 %v2694_v7, %v578_v11  ;;  %v600_v11 = vld [vmem:[%s2681_s26 + $0xd30] sm:$0xff] }
 0x14a   : > { %2110 = vst [vmem:[%s2724_s20 + $0xc50] sm:$0xff] %v1598_v21  ;;  %v1603_v31 = vadd.f32 %v2698_v10, %v1090_v22  ;;  %v1092_v33 = vmul.f32 %v2694_v7, %v579_v16  ;;  %v1093_v34 = vmul.f32 %v2694_v7, %v580_v17  ;;  %2111 = vst [vmem:[%s2724_s20 + $0xc58] sm:$0xff] %v1599_v26  ;;  %v601_v16 = vld [vmem:[%s2681_s26 + $0xd38] sm:$0xff]  ;;  %v602_v21 = vld [vmem:[%s2681_s26 + $0xd40] sm:$0xff] }
 0x14b   : > { %2112 = vst [vmem:[%s2724_s20 + $0xc60] sm:$0xff] %v1600_v27  ;;  %2113 = vst [vmem:[%s2724_s20 + $0xc68] sm:$0xff] %v1601_v28  ;;  %v1094_v36 = vmul.f32 %v2694_v7, %v581_v18  ;;  %v1095_v37 = vmul.f32 %v2694_v7, %v582_v23  ;;  %v1096_v38 = vmul.f32 %v2694_v7, %v583_v24  ;;  %v603_v26 = vld [vmem:[%s2681_s26 + $0xd48] sm:$0xff]  ;;  %v604_v27 = vld [vmem:[%s2681_s26 + $0xd50] sm:$0xff] }
 0x14c   : > { %2114 = vst [vmem:[%s2724_s20 + $0xc70] sm:$0xff] %v1602_v29  ;;  %v1097_v39 = vmul.f32 %v2694_v7, %v584_v25  ;;  %2115 = vst [vmem:[%s2724_s20 + $0xc78] sm:$0xff] %v1603_v31  ;;  %v1604_v43 = vadd.f32 %v2698_v10, %v1091_v32  ;;  %v1605_v44 = vadd.f32 %v2698_v10, %v1092_v33  ;;  %v605_v28 = vld [vmem:[%s2681_s26 + $0xd58] sm:$0xff]  ;;  %v606_v33 = vld [vmem:[%s2681_s26 + $0xd60] sm:$0xff] }
 0x14d   : > { %v1606_v45 = vadd.f32 %v2698_v10, %v1093_v34  ;;  %v1098_v46 = vmul.f32 %v2694_v7, %v585_v30  ;;  %v1607_v50 = vadd.f32 %v2698_v10, %v1094_v36  ;;  %v1608_v51 = vadd.f32 %v2698_v10, %v1095_v37  ;;  %v607_v34 = vld [vmem:[%s2681_s26 + $0xd68] sm:$0xff] }
 0x14e   : > { %v1609_v52 = vadd.f32 %v2698_v10, %v1096_v38  ;;  %v1610_v53 = vadd.f32 %v2698_v10, %v1097_v39  ;;  %2116 = vst [vmem:[%s2724_s20 + $0xc80] sm:$0xff] %v1604_v43  ;;  %2117 = vst [vmem:[%s2724_s20 + $0xc88] sm:$0xff] %v1605_v44  ;;  %v1099_v56 = vmul.f32 %v2694_v7, %v586_v35  ;;  %v608_v35 = vld [vmem:[%s2681_s26 + $0xd70] sm:$0xff] }
 0x14f   : > { %2118 = vst [vmem:[%s2724_s20 + $0xc90] sm:$0xff] %v1606_v45  ;;  %v1611_v55 = vadd.f32 %v2698_v10, %v1098_v46  ;;  %v1100_v57 = vmul.f32 %v2694_v7, %v587_v40  ;;  %v1101_v58 = vmul.f32 %v2694_v7, %v588_v41  ;;  %2119 = vst [vmem:[%s2724_s20 + $0xc98] sm:$0xff] %v1607_v50  ;;  %v609_v40 = vld [vmem:[%s2681_s26 + $0xd78] sm:$0xff]  ;;  %v610_v45 = vld [vmem:[%s2681_s26 + $0xd80] sm:$0xff] }
 0x150   : > { %2120 = vst [vmem:[%s2724_s20 + $0xca0] sm:$0xff] %v1608_v51  ;;  %2121 = vst [vmem:[%s2724_s20 + $0xca8] sm:$0xff] %v1609_v52  ;;  %v1102_v60 = vmul.f32 %v2694_v7, %v589_v42  ;;  %v1103_v61 = vmul.f32 %v2694_v7, %v590_v47  ;;  %v1104_v62 = vmul.f32 %v2694_v7, %v591_v48  ;;  %v611_v50 = vld [vmem:[%s2681_s26 + $0xd88] sm:$0xff]  ;;  %v612_v51 = vld [vmem:[%s2681_s26 + $0xd90] sm:$0xff] }
 0x151   : > { %2122 = vst [vmem:[%s2724_s20 + $0xcb0] sm:$0xff] %v1610_v53  ;;  %v1105_v63 = vmul.f32 %v2694_v7, %v592_v49  ;;  %2123 = vst [vmem:[%s2724_s20 + $0xcb8] sm:$0xff] %v1611_v55  ;;  %v1612_v3 = vadd.f32 %v2698_v10, %v1099_v56  ;;  %v1613_v4 = vadd.f32 %v2698_v10, %v1100_v57  ;;  %v613_v52 = vld [vmem:[%s2681_s26 + $0xd98] sm:$0xff]  ;;  %v614_v57 = vld [vmem:[%s2681_s26 + $0xda0] sm:$0xff] }
 0x152   : > { %v1614_v5 = vadd.f32 %v2698_v10, %v1101_v58  ;;  %v1106_v6 = vmul.f32 %v2694_v7, %v593_v54  ;;  %v1615_v12 = vadd.f32 %v2698_v10, %v1102_v60  ;;  %v1616_v13 = vadd.f32 %v2698_v10, %v1103_v61  ;;  %v615_v58 = vld [vmem:[%s2681_s26 + $0xda8] sm:$0xff] }
 0x153   : > { %v1617_v14 = vadd.f32 %v2698_v10, %v1104_v62  ;;  %v1618_v15 = vadd.f32 %v2698_v10, %v1105_v63  ;;  %2124 = vst [vmem:[%s2724_s20 + $0xcc0] sm:$0xff] %v1612_v3  ;;  %2125 = vst [vmem:[%s2724_s20 + $0xcc8] sm:$0xff] %v1613_v4  ;;  %v1107_v18 = vmul.f32 %v2694_v7, %v594_v59  ;;  %v616_v59 = vld [vmem:[%s2681_s26 + $0xdb0] sm:$0xff] }
 0x154   : > { %2126 = vst [vmem:[%s2724_s20 + $0xcd0] sm:$0xff] %v1614_v5  ;;  %v1619_v17 = vadd.f32 %v2698_v10, %v1106_v6  ;;  %v1108_v19 = vmul.f32 %v2694_v7, %v595_v0  ;;  %v1109_v20 = vmul.f32 %v2694_v7, %v596_v1  ;;  %2127 = vst [vmem:[%s2724_s20 + $0xcd8] sm:$0xff] %v1615_v12  ;;  %v617_v0 = vld [vmem:[%s2681_s26 + $0xdb8] sm:$0xff]  ;;  %v618_v5 = vld [vmem:[%s2681_s26 + $0xdc0] sm:$0xff] }
 0x155   : > { %2128 = vst [vmem:[%s2724_s20 + $0xce0] sm:$0xff] %v1616_v13  ;;  %2129 = vst [vmem:[%s2724_s20 + $0xce8] sm:$0xff] %v1617_v14  ;;  %v1110_v22 = vmul.f32 %v2694_v7, %v597_v2  ;;  %v1111_v23 = vmul.f32 %v2694_v7, %v598_v8  ;;  %v1112_v24 = vmul.f32 %v2694_v7, %v599_v9  ;;  %v619_v12 = vld [vmem:[%s2681_s26 + $0xdc8] sm:$0xff]  ;;  %v620_v13 = vld [vmem:[%s2681_s26 + $0xdd0] sm:$0xff] }
 0x156   : > { %2130 = vst [vmem:[%s2724_s20 + $0xcf0] sm:$0xff] %v1618_v15  ;;  %v1113_v25 = vmul.f32 %v2694_v7, %v600_v11  ;;  %2131 = vst [vmem:[%s2724_s20 + $0xcf8] sm:$0xff] %v1619_v17  ;;  %v1620_v29 = vadd.f32 %v2698_v10, %v1107_v18  ;;  %v1621_v30 = vadd.f32 %v2698_v10, %v1108_v19  ;;  %v621_v14 = vld [vmem:[%s2681_s26 + $0xdd8] sm:$0xff]  ;;  %v622_v19 = vld [vmem:[%s2681_s26 + $0xde0] sm:$0xff] }
 0x157   : > { %v1622_v31 = vadd.f32 %v2698_v10, %v1109_v20  ;;  %v1114_v32 = vmul.f32 %v2694_v7, %v601_v16  ;;  %v1623_v36 = vadd.f32 %v2698_v10, %v1110_v22  ;;  %v1624_v37 = vadd.f32 %v2698_v10, %v1111_v23  ;;  %v623_v20 = vld [vmem:[%s2681_s26 + $0xde8] sm:$0xff] }
 0x158   : > { %v1625_v38 = vadd.f32 %v2698_v10, %v1112_v24  ;;  %v1626_v39 = vadd.f32 %v2698_v10, %v1113_v25  ;;  %2132 = vst [vmem:[%s2724_s20 + $0xd00] sm:$0xff] %v1620_v29  ;;  %2133 = vst [vmem:[%s2724_s20 + $0xd08] sm:$0xff] %v1621_v30  ;;  %v1115_v42 = vmul.f32 %v2694_v7, %v602_v21  ;;  %v624_v21 = vld [vmem:[%s2681_s26 + $0xdf0] sm:$0xff] }
 0x159   : > { %2134 = vst [vmem:[%s2724_s20 + $0xd10] sm:$0xff] %v1622_v31  ;;  %v1627_v41 = vadd.f32 %v2698_v10, %v1114_v32  ;;  %v1116_v43 = vmul.f32 %v2694_v7, %v603_v26  ;;  %v1117_v44 = vmul.f32 %v2694_v7, %v604_v27  ;;  %2135 = vst [vmem:[%s2724_s20 + $0xd18] sm:$0xff] %v1623_v36  ;;  %v625_v26 = vld [vmem:[%s2681_s26 + $0xdf8] sm:$0xff]  ;;  %v626_v31 = vld [vmem:[%s2681_s26 + $0xe00] sm:$0xff] }
 0x15a   : > { %2136 = vst [vmem:[%s2724_s20 + $0xd20] sm:$0xff] %v1624_v37  ;;  %2137 = vst [vmem:[%s2724_s20 + $0xd28] sm:$0xff] %v1625_v38  ;;  %v1118_v46 = vmul.f32 %v2694_v7, %v605_v28  ;;  %v1119_v47 = vmul.f32 %v2694_v7, %v606_v33  ;;  %v1120_v48 = vmul.f32 %v2694_v7, %v607_v34  ;;  %v627_v36 = vld [vmem:[%s2681_s26 + $0xe08] sm:$0xff]  ;;  %v628_v37 = vld [vmem:[%s2681_s26 + $0xe10] sm:$0xff] }
 0x15b   : > { %2138 = vst [vmem:[%s2724_s20 + $0xd30] sm:$0xff] %v1626_v39  ;;  %v1121_v49 = vmul.f32 %v2694_v7, %v608_v35  ;;  %2139 = vst [vmem:[%s2724_s20 + $0xd38] sm:$0xff] %v1627_v41  ;;  %v1628_v53 = vadd.f32 %v2698_v10, %v1115_v42  ;;  %v1629_v54 = vadd.f32 %v2698_v10, %v1116_v43  ;;  %v629_v38 = vld [vmem:[%s2681_s26 + $0xe18] sm:$0xff]  ;;  %v630_v43 = vld [vmem:[%s2681_s26 + $0xe20] sm:$0xff] }
 0x15c   : > { %v1630_v55 = vadd.f32 %v2698_v10, %v1117_v44  ;;  %v1122_v56 = vmul.f32 %v2694_v7, %v609_v40  ;;  %v1631_v60 = vadd.f32 %v2698_v10, %v1118_v46  ;;  %v1632_v61 = vadd.f32 %v2698_v10, %v1119_v47  ;;  %v631_v44 = vld [vmem:[%s2681_s26 + $0xe28] sm:$0xff] }
 0x15d   : > { %v1633_v62 = vadd.f32 %v2698_v10, %v1120_v48  ;;  %v1634_v63 = vadd.f32 %v2698_v10, %v1121_v49  ;;  %2140 = vst [vmem:[%s2724_s20 + $0xd40] sm:$0xff] %v1628_v53  ;;  %2141 = vst [vmem:[%s2724_s20 + $0xd48] sm:$0xff] %v1629_v54  ;;  %v1123_v2 = vmul.f32 %v2694_v7, %v610_v45  ;;  %v632_v45 = vld [vmem:[%s2681_s26 + $0xe30] sm:$0xff] }
 0x15e   : > { %2142 = vst [vmem:[%s2724_s20 + $0xd50] sm:$0xff] %v1630_v55  ;;  %v1635_v1 = vadd.f32 %v2698_v10, %v1122_v56  ;;  %v1124_v3 = vmul.f32 %v2694_v7, %v611_v50  ;;  %v1125_v4 = vmul.f32 %v2694_v7, %v612_v51  ;;  %2143 = vst [vmem:[%s2724_s20 + $0xd58] sm:$0xff] %v1631_v60  ;;  %v633_v50 = vld [vmem:[%s2681_s26 + $0xe38] sm:$0xff]  ;;  %v634_v55 = vld [vmem:[%s2681_s26 + $0xe40] sm:$0xff] }
 0x15f   : > { %2144 = vst [vmem:[%s2724_s20 + $0xd60] sm:$0xff] %v1632_v61  ;;  %2145 = vst [vmem:[%s2724_s20 + $0xd68] sm:$0xff] %v1633_v62  ;;  %v1126_v6 = vmul.f32 %v2694_v7, %v613_v52  ;;  %v1127_v8 = vmul.f32 %v2694_v7, %v614_v57  ;;  %v1128_v9 = vmul.f32 %v2694_v7, %v615_v58  ;;  %v635_v60 = vld [vmem:[%s2681_s26 + $0xe48] sm:$0xff]  ;;  %v636_v61 = vld [vmem:[%s2681_s26 + $0xe50] sm:$0xff] }
 0x160   : > { %2146 = vst [vmem:[%s2724_s20 + $0xd70] sm:$0xff] %v1634_v63  ;;  %v1129_v11 = vmul.f32 %v2694_v7, %v616_v59  ;;  %2147 = vst [vmem:[%s2724_s20 + $0xd78] sm:$0xff] %v1635_v1  ;;  %v1636_v15 = vadd.f32 %v2698_v10, %v1123_v2  ;;  %v1637_v16 = vadd.f32 %v2698_v10, %v1124_v3  ;;  %v637_v62 = vld [vmem:[%s2681_s26 + $0xe58] sm:$0xff]  ;;  %v638_v3 = vld [vmem:[%s2681_s26 + $0xe60] sm:$0xff] }
 0x161   : > { %v1638_v17 = vadd.f32 %v2698_v10, %v1125_v4  ;;  %v1130_v18 = vmul.f32 %v2694_v7, %v617_v0  ;;  %v1639_v22 = vadd.f32 %v2698_v10, %v1126_v6  ;;  %v1640_v23 = vadd.f32 %v2698_v10, %v1127_v8  ;;  %v639_v4 = vld [vmem:[%s2681_s26 + $0xe68] sm:$0xff] }
 0x162   : > { %v1641_v24 = vadd.f32 %v2698_v10, %v1128_v9  ;;  %v1642_v25 = vadd.f32 %v2698_v10, %v1129_v11  ;;  %2148 = vst [vmem:[%s2724_s20 + $0xd80] sm:$0xff] %v1636_v15  ;;  %2149 = vst [vmem:[%s2724_s20 + $0xd88] sm:$0xff] %v1637_v16  ;;  %v1131_v28 = vmul.f32 %v2694_v7, %v618_v5  ;;  %v640_v5 = vld [vmem:[%s2681_s26 + $0xe70] sm:$0xff] }
 0x163   : > { %2150 = vst [vmem:[%s2724_s20 + $0xd90] sm:$0xff] %v1638_v17  ;;  %v1643_v27 = vadd.f32 %v2698_v10, %v1130_v18  ;;  %v1132_v29 = vmul.f32 %v2694_v7, %v619_v12  ;;  %v1133_v30 = vmul.f32 %v2694_v7, %v620_v13  ;;  %2151 = vst [vmem:[%s2724_s20 + $0xd98] sm:$0xff] %v1639_v22  ;;  %v641_v12 = vld [vmem:[%s2681_s26 + $0xe78] sm:$0xff]  ;;  %v642_v17 = vld [vmem:[%s2681_s26 + $0xe80] sm:$0xff] }
 0x164   : > { %2152 = vst [vmem:[%s2724_s20 + $0xda0] sm:$0xff] %v1640_v23  ;;  %2153 = vst [vmem:[%s2724_s20 + $0xda8] sm:$0xff] %v1641_v24  ;;  %v1134_v32 = vmul.f32 %v2694_v7, %v621_v14  ;;  %v1135_v33 = vmul.f32 %v2694_v7, %v622_v19  ;;  %v1136_v34 = vmul.f32 %v2694_v7, %v623_v20  ;;  %v643_v22 = vld [vmem:[%s2681_s26 + $0xe88] sm:$0xff]  ;;  %v644_v23 = vld [vmem:[%s2681_s26 + $0xe90] sm:$0xff] }
 0x165   : > { %2154 = vst [vmem:[%s2724_s20 + $0xdb0] sm:$0xff] %v1642_v25  ;;  %v1137_v35 = vmul.f32 %v2694_v7, %v624_v21  ;;  %2155 = vst [vmem:[%s2724_s20 + $0xdb8] sm:$0xff] %v1643_v27  ;;  %v1644_v39 = vadd.f32 %v2698_v10, %v1131_v28  ;;  %v1645_v40 = vadd.f32 %v2698_v10, %v1132_v29  ;;  %v645_v24 = vld [vmem:[%s2681_s26 + $0xe98] sm:$0xff]  ;;  %v646_v29 = vld [vmem:[%s2681_s26 + $0xea0] sm:$0xff] }
 0x166   : > { %v1646_v41 = vadd.f32 %v2698_v10, %v1133_v30  ;;  %v1138_v42 = vmul.f32 %v2694_v7, %v625_v26  ;;  %v1647_v46 = vadd.f32 %v2698_v10, %v1134_v32  ;;  %v1648_v47 = vadd.f32 %v2698_v10, %v1135_v33  ;;  %v647_v30 = vld [vmem:[%s2681_s26 + $0xea8] sm:$0xff] }
 0x167   : > { %v1649_v48 = vadd.f32 %v2698_v10, %v1136_v34  ;;  %v1650_v49 = vadd.f32 %v2698_v10, %v1137_v35  ;;  %2156 = vst [vmem:[%s2724_s20 + $0xdc0] sm:$0xff] %v1644_v39  ;;  %2157 = vst [vmem:[%s2724_s20 + $0xdc8] sm:$0xff] %v1645_v40  ;;  %v1139_v52 = vmul.f32 %v2694_v7, %v626_v31  ;;  %v648_v31 = vld [vmem:[%s2681_s26 + $0xeb0] sm:$0xff] }
 0x168   : > { %2158 = vst [vmem:[%s2724_s20 + $0xdd0] sm:$0xff] %v1646_v41  ;;  %v1651_v51 = vadd.f32 %v2698_v10, %v1138_v42  ;;  %v1140_v53 = vmul.f32 %v2694_v7, %v627_v36  ;;  %v1141_v54 = vmul.f32 %v2694_v7, %v628_v37  ;;  %2159 = vst [vmem:[%s2724_s20 + $0xdd8] sm:$0xff] %v1647_v46  ;;  %v649_v36 = vld [vmem:[%s2681_s26 + $0xeb8] sm:$0xff]  ;;  %v650_v41 = vld [vmem:[%s2681_s26 + $0xec0] sm:$0xff] }
 0x169   : > { %2160 = vst [vmem:[%s2724_s20 + $0xde0] sm:$0xff] %v1648_v47  ;;  %2161 = vst [vmem:[%s2724_s20 + $0xde8] sm:$0xff] %v1649_v48  ;;  %v1142_v56 = vmul.f32 %v2694_v7, %v629_v38  ;;  %v1143_v57 = vmul.f32 %v2694_v7, %v630_v43  ;;  %v1144_v58 = vmul.f32 %v2694_v7, %v631_v44  ;;  %v651_v46 = vld [vmem:[%s2681_s26 + $0xec8] sm:$0xff]  ;;  %v652_v47 = vld [vmem:[%s2681_s26 + $0xed0] sm:$0xff] }
 0x16a   : > { %2162 = vst [vmem:[%s2724_s20 + $0xdf0] sm:$0xff] %v1650_v49  ;;  %v1145_v59 = vmul.f32 %v2694_v7, %v632_v45  ;;  %2163 = vst [vmem:[%s2724_s20 + $0xdf8] sm:$0xff] %v1651_v51  ;;  %v1652_v63 = vadd.f32 %v2698_v10, %v1139_v52  ;;  %v1653_v0 = vadd.f32 %v2698_v10, %v1140_v53  ;;  %v653_v48 = vld [vmem:[%s2681_s26 + $0xed8] sm:$0xff]  ;;  %v654_v53 = vld [vmem:[%s2681_s26 + $0xee0] sm:$0xff] }
 0x16b   : > { %v1654_v1 = vadd.f32 %v2698_v10, %v1141_v54  ;;  %v1146_v2 = vmul.f32 %v2694_v7, %v633_v50  ;;  %v1655_v6 = vadd.f32 %v2698_v10, %v1142_v56  ;;  %v1656_v8 = vadd.f32 %v2698_v10, %v1143_v57  ;;  %v655_v54 = vld [vmem:[%s2681_s26 + $0xee8] sm:$0xff] }
 0x16c   : > { %v1657_v9 = vadd.f32 %v2698_v10, %v1144_v58  ;;  %v1658_v11 = vadd.f32 %v2698_v10, %v1145_v59  ;;  %2164 = vst [vmem:[%s2724_s20 + $0xe00] sm:$0xff] %v1652_v63  ;;  %2165 = vst [vmem:[%s2724_s20 + $0xe08] sm:$0xff] %v1653_v0  ;;  %v1147_v14 = vmul.f32 %v2694_v7, %v634_v55  ;;  %v656_v55 = vld [vmem:[%s2681_s26 + $0xef0] sm:$0xff] }
 0x16d   : > { %2166 = vst [vmem:[%s2724_s20 + $0xe10] sm:$0xff] %v1654_v1  ;;  %v1659_v13 = vadd.f32 %v2698_v10, %v1146_v2  ;;  %v1148_v15 = vmul.f32 %v2694_v7, %v635_v60  ;;  %v1149_v16 = vmul.f32 %v2694_v7, %v636_v61  ;;  %2167 = vst [vmem:[%s2724_s20 + $0xe18] sm:$0xff] %v1655_v6  ;;  %v657_v60 = vld [vmem:[%s2681_s26 + $0xef8] sm:$0xff]  ;;  %v658_v1 = vld [vmem:[%s2681_s26 + $0xf00] sm:$0xff] }
 0x16e   : > { %2168 = vst [vmem:[%s2724_s20 + $0xe20] sm:$0xff] %v1656_v8  ;;  %2169 = vst [vmem:[%s2724_s20 + $0xe28] sm:$0xff] %v1657_v9  ;;  %v1150_v18 = vmul.f32 %v2694_v7, %v637_v62  ;;  %v1151_v19 = vmul.f32 %v2694_v7, %v638_v3  ;;  %v1152_v20 = vmul.f32 %v2694_v7, %v639_v4  ;;  %v659_v6 = vld [vmem:[%s2681_s26 + $0xf08] sm:$0xff]  ;;  %v660_v8 = vld [vmem:[%s2681_s26 + $0xf10] sm:$0xff] }
 0x16f   : > { %2170 = vst [vmem:[%s2724_s20 + $0xe30] sm:$0xff] %v1658_v11  ;;  %v1153_v21 = vmul.f32 %v2694_v7, %v640_v5  ;;  %2171 = vst [vmem:[%s2724_s20 + $0xe38] sm:$0xff] %v1659_v13  ;;  %v1660_v25 = vadd.f32 %v2698_v10, %v1147_v14  ;;  %v1661_v26 = vadd.f32 %v2698_v10, %v1148_v15  ;;  %v661_v9 = vld [vmem:[%s2681_s26 + $0xf18] sm:$0xff]  ;;  %v662_v15 = vld [vmem:[%s2681_s26 + $0xf20] sm:$0xff] }
 0x170   : > { %v1662_v27 = vadd.f32 %v2698_v10, %v1149_v16  ;;  %v1154_v28 = vmul.f32 %v2694_v7, %v641_v12  ;;  %v1663_v32 = vadd.f32 %v2698_v10, %v1150_v18  ;;  %v1664_v33 = vadd.f32 %v2698_v10, %v1151_v19  ;;  %v663_v16 = vld [vmem:[%s2681_s26 + $0xf28] sm:$0xff] }
 0x171   : > { %v1665_v34 = vadd.f32 %v2698_v10, %v1152_v20  ;;  %v1666_v35 = vadd.f32 %v2698_v10, %v1153_v21  ;;  %2172 = vst [vmem:[%s2724_s20 + $0xe40] sm:$0xff] %v1660_v25  ;;  %2173 = vst [vmem:[%s2724_s20 + $0xe48] sm:$0xff] %v1661_v26  ;;  %v1155_v38 = vmul.f32 %v2694_v7, %v642_v17  ;;  %v664_v17 = vld [vmem:[%s2681_s26 + $0xf30] sm:$0xff] }
 0x172   : > { %2174 = vst [vmem:[%s2724_s20 + $0xe50] sm:$0xff] %v1662_v27  ;;  %v1667_v37 = vadd.f32 %v2698_v10, %v1154_v28  ;;  %v1156_v39 = vmul.f32 %v2694_v7, %v643_v22  ;;  %v1157_v40 = vmul.f32 %v2694_v7, %v644_v23  ;;  %2175 = vst [vmem:[%s2724_s20 + $0xe58] sm:$0xff] %v1663_v32  ;;  %v665_v22 = vld [vmem:[%s2681_s26 + $0xf38] sm:$0xff]  ;;  %v666_v27 = vld [vmem:[%s2681_s26 + $0xf40] sm:$0xff] }
 0x173   : > { %2176 = vst [vmem:[%s2724_s20 + $0xe60] sm:$0xff] %v1664_v33  ;;  %2177 = vst [vmem:[%s2724_s20 + $0xe68] sm:$0xff] %v1665_v34  ;;  %v1158_v42 = vmul.f32 %v2694_v7, %v645_v24  ;;  %v1159_v43 = vmul.f32 %v2694_v7, %v646_v29  ;;  %v1160_v44 = vmul.f32 %v2694_v7, %v647_v30  ;;  %v667_v32 = vld [vmem:[%s2681_s26 + $0xf48] sm:$0xff]  ;;  %v668_v33 = vld [vmem:[%s2681_s26 + $0xf50] sm:$0xff] }
 0x174   : > { %2178 = vst [vmem:[%s2724_s20 + $0xe70] sm:$0xff] %v1666_v35  ;;  %v1161_v45 = vmul.f32 %v2694_v7, %v648_v31  ;;  %2179 = vst [vmem:[%s2724_s20 + $0xe78] sm:$0xff] %v1667_v37  ;;  %v1668_v49 = vadd.f32 %v2698_v10, %v1155_v38  ;;  %v1669_v50 = vadd.f32 %v2698_v10, %v1156_v39  ;;  %v669_v34 = vld [vmem:[%s2681_s26 + $0xf58] sm:$0xff]  ;;  %v670_v39 = vld [vmem:[%s2681_s26 + $0xf60] sm:$0xff] }
 0x175   : > { %v1670_v51 = vadd.f32 %v2698_v10, %v1157_v40  ;;  %v1162_v52 = vmul.f32 %v2694_v7, %v649_v36  ;;  %v1671_v56 = vadd.f32 %v2698_v10, %v1158_v42  ;;  %v1672_v57 = vadd.f32 %v2698_v10, %v1159_v43  ;;  %v671_v40 = vld [vmem:[%s2681_s26 + $0xf68] sm:$0xff] }
 0x176   : > { %v1673_v58 = vadd.f32 %v2698_v10, %v1160_v44  ;;  %v1674_v59 = vadd.f32 %v2698_v10, %v1161_v45  ;;  %2180 = vst [vmem:[%s2724_s20 + $0xe80] sm:$0xff] %v1668_v49  ;;  %2181 = vst [vmem:[%s2724_s20 + $0xe88] sm:$0xff] %v1669_v50  ;;  %v1163_v62 = vmul.f32 %v2694_v7, %v650_v41  ;;  %v672_v41 = vld [vmem:[%s2681_s26 + $0xf70] sm:$0xff] }
 0x177   : > { %2182 = vst [vmem:[%s2724_s20 + $0xe90] sm:$0xff] %v1670_v51  ;;  %v1675_v61 = vadd.f32 %v2698_v10, %v1162_v52  ;;  %v1164_v63 = vmul.f32 %v2694_v7, %v651_v46  ;;  %v1165_v0 = vmul.f32 %v2694_v7, %v652_v47  ;;  %2183 = vst [vmem:[%s2724_s20 + $0xe98] sm:$0xff] %v1671_v56  ;;  %v673_v46 = vld [vmem:[%s2681_s26 + $0xf78] sm:$0xff]  ;;  %v674_v51 = vld [vmem:[%s2681_s26 + $0xf80] sm:$0xff] }
 0x178   : > { %2184 = vst [vmem:[%s2724_s20 + $0xea0] sm:$0xff] %v1672_v57  ;;  %2185 = vst [vmem:[%s2724_s20 + $0xea8] sm:$0xff] %v1673_v58  ;;  %v1166_v2 = vmul.f32 %v2694_v7, %v653_v48  ;;  %v1167_v3 = vmul.f32 %v2694_v7, %v654_v53  ;;  %v1168_v4 = vmul.f32 %v2694_v7, %v655_v54  ;;  %v675_v56 = vld [vmem:[%s2681_s26 + $0xf88] sm:$0xff]  ;;  %v676_v57 = vld [vmem:[%s2681_s26 + $0xf90] sm:$0xff] }
 0x179   : > { %2186 = vst [vmem:[%s2724_s20 + $0xeb0] sm:$0xff] %v1674_v59  ;;  %v1169_v5 = vmul.f32 %v2694_v7, %v656_v55  ;;  %2187 = vst [vmem:[%s2724_s20 + $0xeb8] sm:$0xff] %v1675_v61  ;;  %v1676_v11 = vadd.f32 %v2698_v10, %v1163_v62  ;;  %v1677_v12 = vadd.f32 %v2698_v10, %v1164_v63  ;;  %v677_v58 = vld [vmem:[%s2681_s26 + $0xf98] sm:$0xff]  ;;  %v678_v63 = vld [vmem:[%s2681_s26 + $0xfa0] sm:$0xff] }
 0x17a   : > { %v1678_v13 = vadd.f32 %v2698_v10, %v1165_v0  ;;  %v1170_v14 = vmul.f32 %v2694_v7, %v657_v60  ;;  %v1679_v18 = vadd.f32 %v2698_v10, %v1166_v2  ;;  %v1680_v19 = vadd.f32 %v2698_v10, %v1167_v3  ;;  %v679_v0 = vld [vmem:[%s2681_s26 + $0xfa8] sm:$0xff] }
 0x17b   : > { %v1681_v20 = vadd.f32 %v2698_v10, %v1168_v4  ;;  %v1682_v21 = vadd.f32 %v2698_v10, %v1169_v5  ;;  %2188 = vst [vmem:[%s2724_s20 + $0xec0] sm:$0xff] %v1676_v11  ;;  %2189 = vst [vmem:[%s2724_s20 + $0xec8] sm:$0xff] %v1677_v12  ;;  %v1171_v24 = vmul.f32 %v2694_v7, %v658_v1  ;;  %v680_v1 = vld [vmem:[%s2681_s26 + $0xfb0] sm:$0xff] }
 0x17c   : > { %2190 = vst [vmem:[%s2724_s20 + $0xed0] sm:$0xff] %v1678_v13  ;;  %v1683_v23 = vadd.f32 %v2698_v10, %v1170_v14  ;;  %v1172_v25 = vmul.f32 %v2694_v7, %v659_v6  ;;  %v1173_v26 = vmul.f32 %v2694_v7, %v660_v8  ;;  %2191 = vst [vmem:[%s2724_s20 + $0xed8] sm:$0xff] %v1679_v18  ;;  %v681_v6 = vld [vmem:[%s2681_s26 + $0xfb8] sm:$0xff]  ;;  %v682_v13 = vld [vmem:[%s2681_s26 + $0xfc0] sm:$0xff] }
 0x17d   : > { %2192 = vst [vmem:[%s2724_s20 + $0xee0] sm:$0xff] %v1680_v19  ;;  %2193 = vst [vmem:[%s2724_s20 + $0xee8] sm:$0xff] %v1681_v20  ;;  %v1174_v28 = vmul.f32 %v2694_v7, %v661_v9  ;;  %v1175_v29 = vmul.f32 %v2694_v7, %v662_v15  ;;  %v1176_v30 = vmul.f32 %v2694_v7, %v663_v16  ;;  %v683_v18 = vld [vmem:[%s2681_s26 + $0xfc8] sm:$0xff]  ;;  %v684_v19 = vld [vmem:[%s2681_s26 + $0xfd0] sm:$0xff] }
 0x17e   : > { %2194 = vst [vmem:[%s2724_s20 + $0xef0] sm:$0xff] %v1682_v21  ;;  %v1177_v31 = vmul.f32 %v2694_v7, %v664_v17  ;;  %2195 = vst [vmem:[%s2724_s20 + $0xef8] sm:$0xff] %v1683_v23  ;;  %v1684_v35 = vadd.f32 %v2698_v10, %v1171_v24  ;;  %v1685_v36 = vadd.f32 %v2698_v10, %v1172_v25  ;;  %v685_v20 = vld [vmem:[%s2681_s26 + $0xfd8] sm:$0xff]  ;;  %v686_v25 = vld [vmem:[%s2681_s26 + $0xfe0] sm:$0xff] }
 0x17f   : > { %v1686_v37 = vadd.f32 %v2698_v10, %v1173_v26  ;;  %v1178_v38 = vmul.f32 %v2694_v7, %v665_v22  ;;  %v1687_v42 = vadd.f32 %v2698_v10, %v1174_v28  ;;  %v1688_v43 = vadd.f32 %v2698_v10, %v1175_v29  ;;  %v687_v26 = vld [vmem:[%s2681_s26 + $0xfe8] sm:$0xff] }
 0x180   : > { %v1689_v44 = vadd.f32 %v2698_v10, %v1176_v30  ;;  %v1690_v45 = vadd.f32 %v2698_v10, %v1177_v31  ;;  %2196 = vst [vmem:[%s2724_s20 + $0xf00] sm:$0xff] %v1684_v35  ;;  %2197 = vst [vmem:[%s2724_s20 + $0xf08] sm:$0xff] %v1685_v36  ;;  %v1179_v48 = vmul.f32 %v2694_v7, %v666_v27  ;;  %v688_v27 = vld [vmem:[%s2681_s26 + $0xff0] sm:$0xff] }
 0x181   : > { %2198 = vst [vmem:[%s2724_s20 + $0xf10] sm:$0xff] %v1686_v37  ;;  %v1691_v47 = vadd.f32 %v2698_v10, %v1178_v38  ;;  %v1180_v49 = vmul.f32 %v2694_v7, %v667_v32  ;;  %v1181_v50 = vmul.f32 %v2694_v7, %v668_v33  ;;  %2199 = vst [vmem:[%s2724_s20 + $0xf18] sm:$0xff] %v1687_v42  ;;  %v689_v32 = vld [vmem:[%s2681_s26 + $0xff8] sm:$0xff] }
 0x182   : > { %2200 = vst [vmem:[%s2724_s20 + $0xf20] sm:$0xff] %v1688_v43  ;;  %2201 = vst [vmem:[%s2724_s20 + $0xf28] sm:$0xff] %v1689_v44  ;;  %v1182_v52 = vmul.f32 %v2694_v7, %v669_v34  ;;  %v1183_v53 = vmul.f32 %v2694_v7, %v670_v39  ;;  %v1184_v54 = vmul.f32 %v2694_v7, %v671_v40 }
 0x183   : > { %2202 = vst [vmem:[%s2724_s20 + $0xf30] sm:$0xff] %v1690_v45  ;;  %v1185_v55 = vmul.f32 %v2694_v7, %v672_v41  ;;  %2203 = vst [vmem:[%s2724_s20 + $0xf38] sm:$0xff] %v1691_v47  ;;  %v1692_v59 = vadd.f32 %v2698_v10, %v1179_v48  ;;  %v1693_v60 = vadd.f32 %v2698_v10, %v1180_v49 }
 0x184   : > { %v1694_v61 = vadd.f32 %v2698_v10, %v1181_v50  ;;  %v1186_v62 = vmul.f32 %v2694_v7, %v673_v46  ;;  %v1695_v2 = vadd.f32 %v2698_v10, %v1182_v52  ;;  %v1696_v3 = vadd.f32 %v2698_v10, %v1183_v53 }
 0x185   : > { %v1697_v4 = vadd.f32 %v2698_v10, %v1184_v54  ;;  %v1698_v5 = vadd.f32 %v2698_v10, %v1185_v55  ;;  %2204 = vst [vmem:[%s2724_s20 + $0xf40] sm:$0xff] %v1692_v59  ;;  %2205 = vst [vmem:[%s2724_s20 + $0xf48] sm:$0xff] %v1693_v60  ;;  %v1187_v9 = vmul.f32 %v2694_v7, %v674_v51 }
 0x186   : > { %2206 = vst [vmem:[%s2724_s20 + $0xf50] sm:$0xff] %v1694_v61  ;;  %v1699_v8 = vadd.f32 %v2698_v10, %v1186_v62  ;;  %v1188_v11 = vmul.f32 %v2694_v7, %v675_v56  ;;  %v1189_v12 = vmul.f32 %v2694_v7, %v676_v57  ;;  %2207 = vst [vmem:[%s2724_s20 + $0xf58] sm:$0xff] %v1695_v2 }
 0x187   : > { %2208 = vst [vmem:[%s2724_s20 + $0xf60] sm:$0xff] %v1696_v3  ;;  %2209 = vst [vmem:[%s2724_s20 + $0xf68] sm:$0xff] %v1697_v4  ;;  %v1190_v14 = vmul.f32 %v2694_v7, %v677_v58  ;;  %v1191_v15 = vmul.f32 %v2694_v7, %v678_v63  ;;  %v1192_v16 = vmul.f32 %v2694_v7, %v679_v0 }
 0x188   : > { %2210 = vst [vmem:[%s2724_s20 + $0xf70] sm:$0xff] %v1698_v5  ;;  %v1193_v17 = vmul.f32 %v2694_v7, %v680_v1  ;;  %2211 = vst [vmem:[%s2724_s20 + $0xf78] sm:$0xff] %v1699_v8  ;;  %v1700_v21 = vadd.f32 %v2698_v10, %v1187_v9  ;;  %v1701_v22 = vadd.f32 %v2698_v10, %v1188_v11 }
 0x189   : > { %v1702_v23 = vadd.f32 %v2698_v10, %v1189_v12  ;;  %v1194_v24 = vmul.f32 %v2694_v7, %v681_v6  ;;  %v1703_v28 = vadd.f32 %v2698_v10, %v1190_v14  ;;  %v1704_v29 = vadd.f32 %v2698_v10, %v1191_v15 }
 0x18a   : > { %v1705_v30 = vadd.f32 %v2698_v10, %v1192_v16  ;;  %v1706_v31 = vadd.f32 %v2698_v10, %v1193_v17  ;;  %2212 = vst [vmem:[%s2724_s20 + $0xf80] sm:$0xff] %v1700_v21  ;;  %2213 = vst [vmem:[%s2724_s20 + $0xf88] sm:$0xff] %v1701_v22  ;;  %v1195_v34 = vmul.f32 %v2694_v7, %v682_v13 }
 0x18b   : > { %2214 = vst [vmem:[%s2724_s20 + $0xf90] sm:$0xff] %v1702_v23  ;;  %v1707_v33 = vadd.f32 %v2698_v10, %v1194_v24  ;;  %v1196_v35 = vmul.f32 %v2694_v7, %v683_v18  ;;  %v1197_v36 = vmul.f32 %v2694_v7, %v684_v19  ;;  %2215 = vst [vmem:[%s2724_s20 + $0xf98] sm:$0xff] %v1703_v28 }
 0x18c   : > { %2216 = vst [vmem:[%s2724_s20 + $0xfa0] sm:$0xff] %v1704_v29  ;;  %2217 = vst [vmem:[%s2724_s20 + $0xfa8] sm:$0xff] %v1705_v30  ;;  %v1198_v37 = vmul.f32 %v2694_v7, %v685_v20  ;;  %v1199_v38 = vmul.f32 %v2694_v7, %v686_v25  ;;  %v1200_v39 = vmul.f32 %v2694_v7, %v687_v26 }
 0x18d   : > { %2218 = vst [vmem:[%s2724_s20 + $0xfb0] sm:$0xff] %v1706_v31  ;;  %v1201_v40 = vmul.f32 %v2694_v7, %v688_v27  ;;  %2219 = vst [vmem:[%s2724_s20 + $0xfb8] sm:$0xff] %v1707_v33  ;;  %v1708_v41 = vadd.f32 %v2698_v10, %v1195_v34  ;;  %v1709_v42 = vadd.f32 %v2698_v10, %v1196_v35 }
 0x18e   : > { %v1710_v43 = vadd.f32 %v2698_v10, %v1197_v36  ;;  %v1202_v44 = vmul.f32 %v2694_v7, %v689_v32  ;;  %v1711_v45 = vadd.f32 %v2698_v10, %v1198_v37  ;;  %v1712_v46 = vadd.f32 %v2698_v10, %v1199_v38 }
 0x18f   : > { %v1713_v47 = vadd.f32 %v2698_v10, %v1200_v39  ;;  %v1714_v48 = vadd.f32 %v2698_v10, %v1201_v40  ;;  %2220 = vst [vmem:[%s2724_s20 + $0xfc0] sm:$0xff] %v1708_v41  ;;  %2221 = vst [vmem:[%s2724_s20 + $0xfc8] sm:$0xff] %v1709_v42 }
 0x190   : > { %2222 = vst [vmem:[%s2724_s20 + $0xfd0] sm:$0xff] %v1710_v43  ;;  %v1715_v7 = vadd.f32 %v2698_v10, %v1202_v44  ;;  %2223 = vst [vmem:[%s2724_s20 + $0xfd8] sm:$0xff] %v1711_v45 }
 0x191   : > { %2224 = vst [vmem:[%s2724_s20 + $0xfe0] sm:$0xff] %v1712_v46  ;;  %2225 = vst [vmem:[%s2724_s20 + $0xfe8] sm:$0xff] %v1713_v47 }
 0x192   : > { %2226 = vst [vmem:[%s2724_s20 + $0xff0] sm:$0xff] %v1714_v48  ;;  %2227 = vst [vmem:[%s2724_s20 + $0xff8] sm:$0xff] %v1715_v7 }
 0x193   : > { %2463 = shalt.err (!%p2460_p6)
}
 0x194   : > { %s2464_s14 = scalar_lea.hbm %s4739_s5, 65536  ;;  %s2468_s3 = scalar_lea.hbm %s4795_s2, 262144 }
 0x195   : > { %p2465_p7 = scmp.ne.s32.totalorder %s4739_s5, %s2464_s14  ;;  %p2469_p4 = scmp.lt.u32.totalorder %s4739_s5, %s4795_s2 }
 0x196   : > { %p2470_p2 = scmp.lt.u32.totalorder %s2468_s3, %s2464_s14  ;;  %p2472_p12 = scmp.lt.u32.totalorder %s2464_s14, %s4739_s5 }
 0x197   : > { %p2466_p8 = pnand %p2465_p7, %p4808_p13 }
 0x198   : > { %p2471_p11 = por %p2470_p2, %p2469_p4 }
 0x199   : > { %p2467_p9 = pneg %p2466_p8 }
 0x19a   : > { %p2473_p0 = por %p2472_p12, %p2471_p11 }
 0x19c   : > { %p2474_p3 = pnand %p2473_p0, %p2467_p9 }
 0x19e   : > { %2477 = shalt.err (!%p2474_p3)
}
 0x19f   : > { %s2527_s23 = smov 128   ;;  %s2528_s19 = smov 8  }
 0x1a0   : > { %2352 = dma.vmem_to_hbm [thread:$0]  (%p4808_p13), %s4741_s30, 65536, %s4739_s5, %s2229_s6, %s2527_s23, %s2527_s23, %s2528_s19  }
 0x1a1 PF: > { %p2369_p10 = scmp.ge.s32.totalorder %s2520_s12, 2  ;;  %s2257_s20 = sand.u32 1, %s2508_s9  }
 0x1a2   : > { %p4809_p5 = scmp.ne.s32.totalorder %s4802_s22, 0  ;;  %s2258_s29 = scalar_lea.sflag [#allocation4], %s2257_s20 }
 0x1a4   : > { %p2363_p1 = pnand %p2369_p10, %p4809_p5 }
 0x1a6   : > { %2503 = dma.done.wait (!%p2363_p1), %s2258_s29, 65536  }
 0x1a7   : > { %2505 = vsyncadd (!%p2363_p1), %s2258_s29, 4294901760  ;;  %p16_p6 = scmp.ge.s32.totalorder %s2569_s15, 6   ;;  %s4810_s9 = smov %s2512_s10 }
 0x1a8   : > { %s4811_s10 = smov %s2516_s11  ;;  %s4812_s11 = smov %s2581_s18 }
 0x1a9   : > { %s4813_s12 = smov %s2569_s15  ;;  %18 = sbr.rel (!%p16_p6) target bundleno = 6 (0x6), region = 78 }
 0x1b0   :  { %2263 = vsyncpa [#allocation3], 1 }
 0x1b1   :  { %2265 = vsyncpa [#allocation3 + $0x1], 1 }
 0x1b2   :  { %2266 = vsyncpa [#allocation4], 1 }
 0x1b3   :  { %2268 = vsyncpa [#allocation4 + $0x1], 1 }
 0x1b4   :  { %2269 = vsyncpa [#allocation5], 1 }
 0x1b5   :  { %2271 = vsyncpa [#allocation5 + $0x1], 1 }

</bundles_post_ra>
